<compile_context>
chip_gen: v5e
topology: v5e:2x2
jax: 0.10.0
libtpu: 0.0.40
codegen_flags: <defaults>
</compile_context>

<pallas_src>
import functools

import jax
import jax.numpy as jnp
from jax.experimental import pallas as pl
from jax.experimental.pallas import tpu as pltpu

_EPS = 1e-5


def _round_up(x, m):
    return (x + m - 1) // m * m


def _pad_channels(c):
    # Channels live on the 128-lane axis: pad small channel counts to a full
    # lane register (unmasked stores, filled MXU columns), larger ones to the
    # 8-sublane granule.
    return _round_up(c, 128) if c < 128 else _round_up(c, 8)


# ----------------------------------------------------------------------------
# Fused BasicBlock kernel (one image per grid step; everything stays in VMEM)
# ----------------------------------------------------------------------------
def _basic_block_kernel(x_ref, w1_ref, b1_ref, w2_ref, b2_ref, *rest,
                        stride, out_h, out_w, has_proj):
    """conv1(3x3,s)+bn1+relu -> conv2(3x3,1)+bn2 -> (+shortcut) -> relu.

    x_ref  : (1, H+2, W+2, Cin_p)        spatially + channel padded input
    w1_ref : (9*Cin_p, Cout_p)           BN1 scale folded, im2col layout
    b1_ref : (1, Cout_p)
    w2_ref : (9*Cout_p, Cout_p)          BN2 scale folded, im2col layout
    b2_ref : (1, Cout_p)
    wsc_ref: (Cin_p, Cout_p)             only if has_proj (BN_sc folded)
    bsc_ref: (1, Cout_p)                 only if has_proj
    out_ref: (1, out_h, out_w, Cout_p)
    mid_ref: (out_h+2, out_w+2, Cout_p)  VMEM scratch: conv1 output + halo
    """
    if has_proj:
        wsc_ref, bsc_ref, out_ref, mid_ref = rest
    else:
        out_ref, mid_ref = rest

    xr = x_ref.at[0]                       # 3-D ref view, no load yet
    cout_p = out_ref.shape[-1]
    m = out_h * out_w

    def tap(src_ref, dy, dx, s):
        """Shifted (and strided) 3x3 tap as a (M, C) matrix."""
        c = src_ref.shape[-1]
        if s == 1:
            p = src_ref[dy:dy + out_h, dx:dx + out_w, :]
        else:
            # TODO(synk): stride>1 uses an in-kernel strided slice (XLU
            # gather); a DMA-level strided read or wrapper phase-split would
            # avoid loading the discarded rows entirely.
            p = jax.lax.slice(
                src_ref[...], (dy, dx, 0),
                (dy + (out_h - 1) * s + 1, dx + (out_w - 1) * s + 1, c),
                (s, s, 1))
        return p.reshape(m, c)

    # ---- conv1 + bn1 + relu: one im2col matmul (K = 9*Cin_p) ----
    pm1 = jnp.concatenate([tap(xr, dy, dx, stride)
                           for dy in range(3) for dx in range(3)], axis=-1)
    y1 = jnp.dot(pm1, w1_ref[...], preferred_element_type=jnp.float32)
    y1 = jnp.maximum(y1 + b1_ref[0], 0.0)

    # Stage conv1 output (with zero halo) in VMEM scratch: no HBM round trip
    # between the two convolutions.
    mid_ref[...] = jnp.zeros_like(mid_ref)
    mid_ref[1:1 + out_h, 1:1 + out_w, :] = (
        y1.reshape(out_h, out_w, cout_p).astype(mid_ref.dtype))

    # ---- conv2 + bn2: one im2col matmul (K = 9*Cout_p) ----
    pm2 = jnp.concatenate([tap(mid_ref, dy, dx, 1)
                           for dy in range(3) for dx in range(3)], axis=-1)
    y2 = jnp.dot(pm2, w2_ref[...], preferred_element_type=jnp.float32)
    y2 = y2 + b2_ref[0]

    # ---- shortcut ----
    if has_proj:
        xs = tap(xr, 1, 1, stride)         # centre tap == un-padded input
        sc = jnp.dot(xs, wsc_ref[...], preferred_element_type=jnp.float32)
        sc = sc + bsc_ref[0]
    else:
        sc = tap(xr, 1, 1, 1).astype(jnp.float32)

    out = jnp.maximum(y2 + sc, 0.0)
    out_ref[0] = out.reshape(out_h, out_w, cout_p).astype(out_ref.dtype)


# ----------------------------------------------------------------------------
# Wrapper: layout, BN folding, pallas_call
# ----------------------------------------------------------------------------
def _fold_bn(bn):
    gamma, beta, mean, var = bn
    s = gamma / jnp.sqrt(var + _EPS)
    return s, beta - mean * s


def _prep_conv3x3(w_oihw, bn, cin_p, cout_p, dtype):
    # OIHW -> HWIO, fold BN scale into weights, zero-pad channels and flatten
    # to the (9*Cin_p, Cout_p) im2col layout used by the kernel.
    s, b = _fold_bn(bn)
    w = jnp.transpose(w_oihw, (2, 3, 1, 0)) * s          # (3,3,Cin,Cout)
    kh, kw, ci, co = w.shape
    w = jnp.pad(w, ((0, 0), (0, 0), (0, cin_p - ci), (0, cout_p - co)))
    w = w.reshape(kh * kw * cin_p, cout_p).astype(dtype)
    b = jnp.pad(b, (0, cout_p - co))[None, :].astype(jnp.float32)
    return w, b


def _prep_conv1x1(w_oihw, bn, cin_p, cout_p, dtype):
    s, b = _fold_bn(bn)
    w = jnp.transpose(w_oihw, (2, 3, 1, 0))[0, 0] * s    # (Cin, Cout)
    ci, co = w.shape
    w = jnp.pad(w, ((0, cin_p - ci), (0, cout_p - co))).astype(dtype)
    b = jnp.pad(b, (0, cout_p - co))[None, :].astype(jnp.float32)
    return w, b


@functools.partial(jax.jit, static_argnames=("stride", "compute_dtype"))
def basic_block_forward(x_nchw, params, stride=1, compute_dtype=jnp.float32):
    """relu(bn2(conv2(relu(bn1(conv1(x))))) + shortcut(x)), NCHW in/out."""
    n, in_planes, h, w = x_nchw.shape
    planes = params["conv1_w"].shape[0]
    has_proj = "sc_w" in params
    if not has_proj and (stride != 1 or in_planes != planes):
        raise ValueError(
            "identity shortcut requires stride == 1 and in_planes == planes")

    cin_p = _pad_channels(in_planes)
    cout_p = _pad_channels(planes)
    out_h = (h - 1) // stride + 1
    out_w = (w - 1) // stride + 1

    # NCHW -> NHWC, spatial halo pad (+1) and channel/lane pad.
    x = jnp.transpose(x_nchw, (0, 2, 3, 1))
    x = jnp.pad(x, ((0, 0), (1, 1), (1, 1), (0, cin_p - in_planes)))
    x = x.astype(compute_dtype)

    w1, b1 = _prep_conv3x3(params["conv1_w"], params["bn1"],
                           cin_p, cout_p, compute_dtype)
    w2, b2 = _prep_conv3x3(params["conv2_w"], params["bn2"],
                           cout_p, cout_p, compute_dtype)

    inputs = [x, w1, b1, w2, b2]
    in_specs = [
        pl.BlockSpec((1, h + 2, w + 2, cin_p), lambda i: (i, 0, 0, 0)),
        pl.BlockSpec((9 * cin_p, cout_p), lambda i: (0, 0)),
        pl.BlockSpec((1, cout_p), lambda i: (0, 0)),
        pl.BlockSpec((9 * cout_p, cout_p), lambda i: (0, 0)),
        pl.BlockSpec((1, cout_p), lambda i: (0, 0)),
    ]
    if has_proj:
        wsc, bsc = _prep_conv1x1(params["sc_w"], params["bn_sc"],
                                 cin_p, cout_p, compute_dtype)
        inputs += [wsc, bsc]
        in_specs += [
            pl.BlockSpec((cin_p, cout_p), lambda i: (0, 0)),
            pl.BlockSpec((1, cout_p), lambda i: (0, 0)),
        ]

    kernel = functools.partial(
        _basic_block_kernel, stride=stride, out_h=out_h, out_w=out_w,
        has_proj=has_proj)

    out = pl.pallas_call(
        kernel,
        out_shape=jax.ShapeDtypeStruct((n, out_h, out_w, cout_p), jnp.float32),
        grid=(n,),
        in_specs=in_specs,
        out_specs=pl.BlockSpec((1, out_h, out_w, cout_p),
                               lambda i: (i, 0, 0, 0)),
        scratch_shapes=[pltpu.VMEM((out_h + 2, out_w + 2, cout_p),
                                   compute_dtype)],
        compiler_params=pltpu.CompilerParams(
            dimension_semantics=("parallel",),
            vmem_limit_bytes=32 * 1024 * 1024),
    )(*inputs)

    out = out[:, :, :, :planes]                 # drop channel/lane padding
    return jnp.transpose(out, (0, 3, 1, 2))     # NHWC -> NCHW


# TODO(synk): training-mode BatchNorm (batch statistics) is not implemented;
# kernels implement eval-mode BN folded into the conv weights / bias.


# ----------------------------------------------------------------------------
# Deterministic parameter init (same shapes as the PyTorch module)
# ----------------------------------------------------------------------------
def init_params(key, in_planes, planes, stride):
    ks = jax.random.split(key, 6)

    def conv_init(k, shape):
        fan_in = shape[1] * shape[2] * shape[3]
        return (jax.random.normal(k, shape, jnp.float32)
                * (2.0 / fan_in) ** 0.5)

    def bn_init(k, c):
        k1, k2, k3, k4 = jax.random.split(k, 4)
        gamma = 1.0 + 0.1 * jax.random.normal(k1, (c,), jnp.float32)
        beta = 0.05 * jax.random.normal(k2, (c,), jnp.float32)
        mean = 0.1 * jax.random.normal(k3, (c,), jnp.float32)
        var = 0.5 + jax.random.uniform(k4, (c,), jnp.float32)
        return (gamma, beta, mean, var)

    params = {
        "conv1_w": conv_init(ks[0], (planes, in_planes, 3, 3)),
        "bn1": bn_init(ks[1], planes),
        "conv2_w": conv_init(ks[2], (planes, planes, 3, 3)),
        "bn2": bn_init(ks[3], planes),
    }
    if stride != 1 or in_planes != planes:
        params["sc_w"] = conv_init(ks[4], (planes, in_planes, 1, 1))
        params["bn_sc"] = bn_init(ks[5], planes)
    return params


# ----------------------------------------------------------------------------
# Pure-JAX reference (eval-mode BN), for correctness check
# ----------------------------------------------------------------------------
def reference_basic_block(x, params, stride):
    hi = jax.lax.Precision.HIGHEST

    def bn(y, p):
        gamma, beta, mean, var = p
        inv = gamma / jnp.sqrt(var + _EPS)
        return (y * inv[None, :, None, None]
                + (beta - mean * inv)[None, :, None, None])

    out = jax.lax.conv_general_dilated(
        x, params["conv1_w"], (stride, stride), ((1, 1), (1, 1)),
        dimension_numbers=("NCHW", "OIHW", "NCHW"), precision=hi)
    out = jax.nn.relu(bn(out, params["bn1"]))
    out = jax.lax.conv_general_dilated(
        out, params["conv2_w"], (1, 1), ((1, 1), (1, 1)),
        dimension_numbers=("NCHW", "OIHW", "NCHW"), precision=hi)
    out = bn(out, params["bn2"])
    if "sc_w" in params:
        sc = jax.lax.conv_general_dilated(
            x, params["sc_w"], (stride, stride), ((0, 0), (0, 0)),
            dimension_numbers=("NCHW", "OIHW", "NCHW"), precision=hi)
        sc = bn(sc, params["bn_sc"])
    else:
        sc = x
    return jax.nn.relu(out + sc)


if __name__ == "__main__":
    key = jax.random.PRNGKey(0)

    configs = [
        # (N, in_planes, planes, H, W, stride)
        (2, 4, 8, 16, 16, 1),    # projection shortcut (in_planes != planes)
        (2, 8, 8, 16, 16, 1),    # identity shortcut
    ]
    for n, in_planes, planes, h, w, stride in configs:
        key, k_x, k_p = jax.random.split(key, 3)
        x = jax.random.normal(k_x, (n, in_planes, h, w), jnp.float32)
        params = init_params(k_p, in_planes, planes, stride)

        out = jax.block_until_ready(
            basic_block_forward(x, params, stride=stride))
        ref = jax.block_until_ready(reference_basic_block(x, params, stride))

        assert out.shape == ref.shape, (out.shape, ref.shape)
        max_err = float(jnp.max(jnp.abs(out - ref)))
        assert jnp.allclose(out, ref, rtol=2e-3, atol=2e-3), max_err

    print("KERNEL_OK")
</pallas_src>

<mosaic_0001>
module attributes {stable_mosaic.version = 11 : i64} {
  func.func @_basic_block_kernel(%arg0: i32, %arg1: memref<1x18x18x128xf32, #tpu.memory_space<vmem>>, %arg2: memref<1152x128xf32, #tpu.memory_space<vmem>>, %arg3: memref<1x128xf32, #tpu.memory_space<vmem>>, %arg4: memref<1152x128xf32, #tpu.memory_space<vmem>>, %arg5: memref<1x128xf32, #tpu.memory_space<vmem>>, %arg6: memref<128x128xf32, #tpu.memory_space<vmem>>, %arg7: memref<1x128xf32, #tpu.memory_space<vmem>>, %arg8: memref<1x16x16x128xf32, #tpu.memory_space<vmem>>, %arg9: memref<18x18x128xf32, #tpu.memory_space<vmem>>) attributes {dimension_semantics = [#tpu.dimension_semantics<parallel>], iteration_bounds = array<i64: 2>, scalar_prefetch = 0 : i64, scratch_operands = 1 : i64, tpu.core_type = #tpu.core_type<tc>, window_params = [{transform_indices = @transform_0, window_bounds = array<i64: 1, 18, 18, 128>}, {pipeline_mode = #tpu.pipeline_mode<synchronous>, transform_indices = @transform_1, window_bounds = array<i64: 1152, 128>}, {pipeline_mode = #tpu.pipeline_mode<synchronous>, transform_indices = @transform_2, window_bounds = array<i64: 1, 128>}, {pipeline_mode = #tpu.pipeline_mode<synchronous>, transform_indices = @transform_3, window_bounds = array<i64: 1152, 128>}, {pipeline_mode = #tpu.pipeline_mode<synchronous>, transform_indices = @transform_4, window_bounds = array<i64: 1, 128>}, {pipeline_mode = #tpu.pipeline_mode<synchronous>, transform_indices = @transform_5, window_bounds = array<i64: 128, 128>}, {pipeline_mode = #tpu.pipeline_mode<synchronous>, transform_indices = @transform_6, window_bounds = array<i64: 1, 128>}, {transform_indices = @transform_7, window_bounds = array<i64: 1, 16, 16, 128>}]} {
    %c0_i32 = arith.constant 0 : i32
    %c0_i32_0 = arith.constant 0 : i32
    %c0_i32_1 = arith.constant 0 : i32
    %c0_i32_2 = arith.constant 0 : i32
    %0 = tpu.memref_slice %arg1[%c0_i32, %c0_i32_0, %c0_i32_1, %c0_i32_2] : memref<1x18x18x128xf32, #tpu.memory_space<vmem>> -> memref<1x18x18x128xf32, #tpu.memory_space<vmem>>
    %1 = tpu.memref_squeeze %0 : memref<1x18x18x128xf32, #tpu.memory_space<vmem>> -> memref<18x18x128xf32, #tpu.memory_space<vmem>>
    %c0 = arith.constant 0 : index
    %c0_3 = arith.constant 0 : index
    %c0_4 = arith.constant 0 : index
    %2 = vector.load %1[%c0, %c0_3, %c0_4] : memref<18x18x128xf32, #tpu.memory_space<vmem>>, vector<16x16x128xf32>
    %3 = vector.shape_cast %2 : vector<16x16x128xf32> to vector<256x128xf32>
    %c0_i32_5 = arith.constant 0 : i32
    %c0_i32_6 = arith.constant 0 : i32
    %c0_i32_7 = arith.constant 0 : i32
    %c0_i32_8 = arith.constant 0 : i32
    %4 = tpu.memref_slice %arg1[%c0_i32_5, %c0_i32_6, %c0_i32_7, %c0_i32_8] : memref<1x18x18x128xf32, #tpu.memory_space<vmem>> -> memref<1x18x18x128xf32, #tpu.memory_space<vmem>>
    %5 = tpu.memref_squeeze %4 : memref<1x18x18x128xf32, #tpu.memory_space<vmem>> -> memref<18x18x128xf32, #tpu.memory_space<vmem>>
    %c0_9 = arith.constant 0 : index
    %c1 = arith.constant 1 : index
    %c0_10 = arith.constant 0 : index
    %6 = vector.load %5[%c0_9, %c1, %c0_10] : memref<18x18x128xf32, #tpu.memory_space<vmem>>, vector<16x16x128xf32>
    %7 = vector.shape_cast %6 : vector<16x16x128xf32> to vector<256x128xf32>
    %c0_i32_11 = arith.constant 0 : i32
    %c0_i32_12 = arith.constant 0 : i32
    %c0_i32_13 = arith.constant 0 : i32
    %c0_i32_14 = arith.constant 0 : i32
    %8 = tpu.memref_slice %arg1[%c0_i32_11, %c0_i32_12, %c0_i32_13, %c0_i32_14] : memref<1x18x18x128xf32, #tpu.memory_space<vmem>> -> memref<1x18x18x128xf32, #tpu.memory_space<vmem>>
    %9 = tpu.memref_squeeze %8 : memref<1x18x18x128xf32, #tpu.memory_space<vmem>> -> memref<18x18x128xf32, #tpu.memory_space<vmem>>
    %c0_15 = arith.constant 0 : index
    %c2 = arith.constant 2 : index
    %c0_16 = arith.constant 0 : index
    %10 = vector.load %9[%c0_15, %c2, %c0_16] : memref<18x18x128xf32, #tpu.memory_space<vmem>>, vector<16x16x128xf32>
    %11 = vector.shape_cast %10 : vector<16x16x128xf32> to vector<256x128xf32>
    %c0_i32_17 = arith.constant 0 : i32
    %c0_i32_18 = arith.constant 0 : i32
    %c0_i32_19 = arith.constant 0 : i32
    %c0_i32_20 = arith.constant 0 : i32
    %12 = tpu.memref_slice %arg1[%c0_i32_17, %c0_i32_18, %c0_i32_19, %c0_i32_20] : memref<1x18x18x128xf32, #tpu.memory_space<vmem>> -> memref<1x18x18x128xf32, #tpu.memory_space<vmem>>
    %13 = tpu.memref_squeeze %12 : memref<1x18x18x128xf32, #tpu.memory_space<vmem>> -> memref<18x18x128xf32, #tpu.memory_space<vmem>>
    %c1_21 = arith.constant 1 : index
    %c0_22 = arith.constant 0 : index
    %c0_23 = arith.constant 0 : index
    %14 = vector.load %13[%c1_21, %c0_22, %c0_23] : memref<18x18x128xf32, #tpu.memory_space<vmem>>, vector<16x16x128xf32>
    %15 = vector.shape_cast %14 : vector<16x16x128xf32> to vector<256x128xf32>
    %c0_i32_24 = arith.constant 0 : i32
    %c0_i32_25 = arith.constant 0 : i32
    %c0_i32_26 = arith.constant 0 : i32
    %c0_i32_27 = arith.constant 0 : i32
    %16 = tpu.memref_slice %arg1[%c0_i32_24, %c0_i32_25, %c0_i32_26, %c0_i32_27] : memref<1x18x18x128xf32, #tpu.memory_space<vmem>> -> memref<1x18x18x128xf32, #tpu.memory_space<vmem>>
    %17 = tpu.memref_squeeze %16 : memref<1x18x18x128xf32, #tpu.memory_space<vmem>> -> memref<18x18x128xf32, #tpu.memory_space<vmem>>
    %c1_28 = arith.constant 1 : index
    %c1_29 = arith.constant 1 : index
    %c0_30 = arith.constant 0 : index
    %18 = vector.load %17[%c1_28, %c1_29, %c0_30] : memref<18x18x128xf32, #tpu.memory_space<vmem>>, vector<16x16x128xf32>
    %19 = vector.shape_cast %18 : vector<16x16x128xf32> to vector<256x128xf32>
    %c0_i32_31 = arith.constant 0 : i32
    %c0_i32_32 = arith.constant 0 : i32
    %c0_i32_33 = arith.constant 0 : i32
    %c0_i32_34 = arith.constant 0 : i32
    %20 = tpu.memref_slice %arg1[%c0_i32_31, %c0_i32_32, %c0_i32_33, %c0_i32_34] : memref<1x18x18x128xf32, #tpu.memory_space<vmem>> -> memref<1x18x18x128xf32, #tpu.memory_space<vmem>>
    %21 = tpu.memref_squeeze %20 : memref<1x18x18x128xf32, #tpu.memory_space<vmem>> -> memref<18x18x128xf32, #tpu.memory_space<vmem>>
    %c1_35 = arith.constant 1 : index
    %c2_36 = arith.constant 2 : index
    %c0_37 = arith.constant 0 : index
    %22 = vector.load %21[%c1_35, %c2_36, %c0_37] : memref<18x18x128xf32, #tpu.memory_space<vmem>>, vector<16x16x128xf32>
    %23 = vector.shape_cast %22 : vector<16x16x128xf32> to vector<256x128xf32>
    %c0_i32_38 = arith.constant 0 : i32
    %c0_i32_39 = arith.constant 0 : i32
    %c0_i32_40 = arith.constant 0 : i32
    %c0_i32_41 = arith.constant 0 : i32
    %24 = tpu.memref_slice %arg1[%c0_i32_38, %c0_i32_39, %c0_i32_40, %c0_i32_41] : memref<1x18x18x128xf32, #tpu.memory_space<vmem>> -> memref<1x18x18x128xf32, #tpu.memory_space<vmem>>
    %25 = tpu.memref_squeeze %24 : memref<1x18x18x128xf32, #tpu.memory_space<vmem>> -> memref<18x18x128xf32, #tpu.memory_space<vmem>>
    %c2_42 = arith.constant 2 : index
    %c0_43 = arith.constant 0 : index
    %c0_44 = arith.constant 0 : index
    %26 = vector.load %25[%c2_42, %c0_43, %c0_44] : memref<18x18x128xf32, #tpu.memory_space<vmem>>, vector<16x16x128xf32>
    %27 = vector.shape_cast %26 : vector<16x16x128xf32> to vector<256x128xf32>
    %c0_i32_45 = arith.constant 0 : i32
    %c0_i32_46 = arith.constant 0 : i32
    %c0_i32_47 = arith.constant 0 : i32
    %c0_i32_48 = arith.constant 0 : i32
    %28 = tpu.memref_slice %arg1[%c0_i32_45, %c0_i32_46, %c0_i32_47, %c0_i32_48] : memref<1x18x18x128xf32, #tpu.memory_space<vmem>> -> memref<1x18x18x128xf32, #tpu.memory_space<vmem>>
    %29 = tpu.memref_squeeze %28 : memref<1x18x18x128xf32, #tpu.memory_space<vmem>> -> memref<18x18x128xf32, #tpu.memory_space<vmem>>
    %c2_49 = arith.constant 2 : index
    %c1_50 = arith.constant 1 : index
    %c0_51 = arith.constant 0 : index
    %30 = vector.load %29[%c2_49, %c1_50, %c0_51] : memref<18x18x128xf32, #tpu.memory_space<vmem>>, vector<16x16x128xf32>
    %31 = vector.shape_cast %30 : vector<16x16x128xf32> to vector<256x128xf32>
    %c0_i32_52 = arith.constant 0 : i32
    %c0_i32_53 = arith.constant 0 : i32
    %c0_i32_54 = arith.constant 0 : i32
    %c0_i32_55 = arith.constant 0 : i32
    %32 = tpu.memref_slice %arg1[%c0_i32_52, %c0_i32_53, %c0_i32_54, %c0_i32_55] : memref<1x18x18x128xf32, #tpu.memory_space<vmem>> -> memref<1x18x18x128xf32, #tpu.memory_space<vmem>>
    %33 = tpu.memref_squeeze %32 : memref<1x18x18x128xf32, #tpu.memory_space<vmem>> -> memref<18x18x128xf32, #tpu.memory_space<vmem>>
    %c2_56 = arith.constant 2 : index
    %c2_57 = arith.constant 2 : index
    %c0_58 = arith.constant 0 : index
    %34 = vector.load %33[%c2_56, %c2_57, %c0_58] : memref<18x18x128xf32, #tpu.memory_space<vmem>>, vector<16x16x128xf32>
    %35 = vector.shape_cast %34 : vector<16x16x128xf32> to vector<256x128xf32>
    %36 = tpu.concatenate %3, %7, %11, %15, %19, %23, %27, %31, %35 in 1 : vector<256x128xf32>, vector<256x128xf32>, vector<256x128xf32>, vector<256x128xf32>, vector<256x128xf32>, vector<256x128xf32>, vector<256x128xf32>, vector<256x128xf32>, vector<256x128xf32> -> vector<256x1152xf32>
    %c0_59 = arith.constant 0 : index
    %c0_60 = arith.constant 0 : index
    %37 = vector.load %arg2[%c0_59, %c0_60] : memref<1152x128xf32, #tpu.memory_space<vmem>>, vector<1152x128xf32>
    %cst = arith.constant dense<0.000000e+00> : vector<256x128xf32>
    %38 = tpu.matmul %36, %37, %cst {dimension_numbers = #tpu.dot_dimension_numbers<[1], [0], [0], [1], [0, 0, 1, 1], [], []>} : vector<256x1152xf32>, vector<1152x128xf32>, vector<256x128xf32> -> vector<256x128xf32>
    %c0_61 = arith.constant 0 : index
    %c0_62 = arith.constant 0 : index
    %39 = vector.load %arg3[%c0_61, %c0_62] : memref<1x128xf32, #tpu.memory_space<vmem>>, vector<1x128xf32>
    %40 = vector.shape_cast %39 : vector<1x128xf32> to vector<128xf32>
    %41 = vector.shape_cast %40 : vector<128xf32> to vector<1x128xf32>
    %42 = vector.broadcast %41 : vector<1x128xf32> to vector<256x128xf32>
    %43 = arith.addf %38, %42 : vector<256x128xf32>
    %cst_63 = arith.constant 0.000000e+00 : f32
    %44 = vector.broadcast %cst_63 : f32 to vector<256x128xf32>
    %45 = arith.maximumf %43, %44 : vector<256x128xf32>
    %cst_64 = arith.constant 0.000000e+00 : f32
    %46 = vector.broadcast %cst_64 : f32 to vector<18x18x128xf32>
    %c0_65 = arith.constant 0 : index
    %c0_66 = arith.constant 0 : index
    %c0_67 = arith.constant 0 : index
    %47 = vector.load %arg9[%c0_65, %c0_66, %c0_67] : memref<18x18x128xf32, #tpu.memory_space<vmem>>, vector<18x18x128xf32>
    tpu.vector_store %arg9[%c0_65, %c0_66, %c0_67], %46 {strides = array<i32>} : memref<18x18x128xf32, #tpu.memory_space<vmem>>, vector<18x18x128xf32>,
    %48 = vector.shape_cast %45 : vector<256x128xf32> to vector<16x16x128xf32>
    %c1_68 = arith.constant 1 : index
    %c1_69 = arith.constant 1 : index
    %c0_70 = arith.constant 0 : index
    %49 = vector.load %arg9[%c1_68, %c1_69, %c0_70] : memref<18x18x128xf32, #tpu.memory_space<vmem>>, vector<16x16x128xf32>
    tpu.vector_store %arg9[%c1_68, %c1_69, %c0_70], %48 {strides = array<i32>} : memref<18x18x128xf32, #tpu.memory_space<vmem>>, vector<16x16x128xf32>,
    %c0_71 = arith.constant 0 : index
    %c0_72 = arith.constant 0 : index
    %c0_73 = arith.constant 0 : index
    %50 = vector.load %arg9[%c0_71, %c0_72, %c0_73] : memref<18x18x128xf32, #tpu.memory_space<vmem>>, vector<16x16x128xf32>
    %51 = vector.shape_cast %50 : vector<16x16x128xf32> to vector<256x128xf32>
    %c0_74 = arith.constant 0 : index
    %c1_75 = arith.constant 1 : index
    %c0_76 = arith.constant 0 : index
    %52 = vector.load %arg9[%c0_74, %c1_75, %c0_76] : memref<18x18x128xf32, #tpu.memory_space<vmem>>, vector<16x16x128xf32>
    %53 = vector.shape_cast %52 : vector<16x16x128xf32> to vector<256x128xf32>
    %c0_77 = arith.constant 0 : index
    %c2_78 = arith.constant 2 : index
    %c0_79 = arith.constant 0 : index
    %54 = vector.load %arg9[%c0_77, %c2_78, %c0_79] : memref<18x18x128xf32, #tpu.memory_space<vmem>>, vector<16x16x128xf32>
    %55 = vector.shape_cast %54 : vector<16x16x128xf32> to vector<256x128xf32>
    %c1_80 = arith.constant 1 : index
    %c0_81 = arith.constant 0 : index
    %c0_82 = arith.constant 0 : index
    %56 = vector.load %arg9[%c1_80, %c0_81, %c0_82] : memref<18x18x128xf32, #tpu.memory_space<vmem>>, vector<16x16x128xf32>
    %57 = vector.shape_cast %56 : vector<16x16x128xf32> to vector<256x128xf32>
    %c1_83 = arith.constant 1 : index
    %c1_84 = arith.constant 1 : index
    %c0_85 = arith.constant 0 : index
    %58 = vector.load %arg9[%c1_83, %c1_84, %c0_85] : memref<18x18x128xf32, #tpu.memory_space<vmem>>, vector<16x16x128xf32>
    %59 = vector.shape_cast %58 : vector<16x16x128xf32> to vector<256x128xf32>
    %c1_86 = arith.constant 1 : index
    %c2_87 = arith.constant 2 : index
    %c0_88 = arith.constant 0 : index
    %60 = vector.load %arg9[%c1_86, %c2_87, %c0_88] : memref<18x18x128xf32, #tpu.memory_space<vmem>>, vector<16x16x128xf32>
    %61 = vector.shape_cast %60 : vector<16x16x128xf32> to vector<256x128xf32>
    %c2_89 = arith.constant 2 : index
    %c0_90 = arith.constant 0 : index
    %c0_91 = arith.constant 0 : index
    %62 = vector.load %arg9[%c2_89, %c0_90, %c0_91] : memref<18x18x128xf32, #tpu.memory_space<vmem>>, vector<16x16x128xf32>
    %63 = vector.shape_cast %62 : vector<16x16x128xf32> to vector<256x128xf32>
    %c2_92 = arith.constant 2 : index
    %c1_93 = arith.constant 1 : index
    %c0_94 = arith.constant 0 : index
    %64 = vector.load %arg9[%c2_92, %c1_93, %c0_94] : memref<18x18x128xf32, #tpu.memory_space<vmem>>, vector<16x16x128xf32>
    %65 = vector.shape_cast %64 : vector<16x16x128xf32> to vector<256x128xf32>
    %c2_95 = arith.constant 2 : index
    %c2_96 = arith.constant 2 : index
    %c0_97 = arith.constant 0 : index
    %66 = vector.load %arg9[%c2_95, %c2_96, %c0_97] : memref<18x18x128xf32, #tpu.memory_space<vmem>>, vector<16x16x128xf32>
    %67 = vector.shape_cast %66 : vector<16x16x128xf32> to vector<256x128xf32>
    %68 = tpu.concatenate %51, %53, %55, %57, %59, %61, %63, %65, %67 in 1 : vector<256x128xf32>, vector<256x128xf32>, vector<256x128xf32>, vector<256x128xf32>, vector<256x128xf32>, vector<256x128xf32>, vector<256x128xf32>, vector<256x128xf32>, vector<256x128xf32> -> vector<256x1152xf32>
    %c0_98 = arith.constant 0 : index
    %c0_99 = arith.constant 0 : index
    %69 = vector.load %arg4[%c0_98, %c0_99] : memref<1152x128xf32, #tpu.memory_space<vmem>>, vector<1152x128xf32>
    %cst_100 = arith.constant dense<0.000000e+00> : vector<256x128xf32>
    %70 = tpu.matmul %68, %69, %cst_100 {dimension_numbers = #tpu.dot_dimension_numbers<[1], [0], [0], [1], [0, 0, 1, 1], [], []>} : vector<256x1152xf32>, vector<1152x128xf32>, vector<256x128xf32> -> vector<256x128xf32>
    %c0_101 = arith.constant 0 : index
    %c0_102 = arith.constant 0 : index
    %71 = vector.load %arg5[%c0_101, %c0_102] : memref<1x128xf32, #tpu.memory_space<vmem>>, vector<1x128xf32>
    %72 = vector.shape_cast %71 : vector<1x128xf32> to vector<128xf32>
    %73 = vector.shape_cast %72 : vector<128xf32> to vector<1x128xf32>
    %74 = vector.broadcast %73 : vector<1x128xf32> to vector<256x128xf32>
    %75 = arith.addf %70, %74 : vector<256x128xf32>
    %c0_i32_103 = arith.constant 0 : i32
    %c0_i32_104 = arith.constant 0 : i32
    %c0_i32_105 = arith.constant 0 : i32
    %c0_i32_106 = arith.constant 0 : i32
    %76 = tpu.memref_slice %arg1[%c0_i32_103, %c0_i32_104, %c0_i32_105, %c0_i32_106] : memref<1x18x18x128xf32, #tpu.memory_space<vmem>> -> memref<1x18x18x128xf32, #tpu.memory_space<vmem>>
    %77 = tpu.memref_squeeze %76 : memref<1x18x18x128xf32, #tpu.memory_space<vmem>> -> memref<18x18x128xf32, #tpu.memory_space<vmem>>
    %c1_107 = arith.constant 1 : index
    %c1_108 = arith.constant 1 : index
    %c0_109 = arith.constant 0 : index
    %78 = vector.load %77[%c1_107, %c1_108, %c0_109] : memref<18x18x128xf32, #tpu.memory_space<vmem>>, vector<16x16x128xf32>
    %79 = vector.shape_cast %78 : vector<16x16x128xf32> to vector<256x128xf32>
    %c0_110 = arith.constant 0 : index
    %c0_111 = arith.constant 0 : index
    %80 = vector.load %arg6[%c0_110, %c0_111] : memref<128x128xf32, #tpu.memory_space<vmem>>, vector<128x128xf32>
    %cst_112 = arith.constant dense<0.000000e+00> : vector<256x128xf32>
    %81 = tpu.matmul %79, %80, %cst_112 {dimension_numbers = #tpu.dot_dimension_numbers<[1], [0], [0], [1], [0, 0, 1, 1], [], []>} : vector<256x128xf32>, vector<128x128xf32>, vector<256x128xf32> -> vector<256x128xf32>
    %c0_113 = arith.constant 0 : index
    %c0_114 = arith.constant 0 : index
    %82 = vector.load %arg7[%c0_113, %c0_114] : memref<1x128xf32, #tpu.memory_space<vmem>>, vector<1x128xf32>
    %83 = vector.shape_cast %82 : vector<1x128xf32> to vector<128xf32>
    %84 = vector.shape_cast %83 : vector<128xf32> to vector<1x128xf32>
    %85 = vector.broadcast %84 : vector<1x128xf32> to vector<256x128xf32>
    %86 = arith.addf %81, %85 : vector<256x128xf32>
    %87 = arith.addf %75, %86 : vector<256x128xf32>
    %cst_115 = arith.constant 0.000000e+00 : f32
    %88 = vector.broadcast %cst_115 : f32 to vector<256x128xf32>
    %89 = arith.maximumf %87, %88 : vector<256x128xf32>
    %90 = vector.shape_cast %89 : vector<256x128xf32> to vector<16x16x128xf32>
    %c0_116 = arith.constant 0 : index
    %c0_117 = arith.constant 0 : index
    %c0_118 = arith.constant 0 : index
    %c0_119 = arith.constant 0 : index
    %91 = vector.load %arg8[%c0_116, %c0_117, %c0_118, %c0_119] : memref<1x16x16x128xf32, #tpu.memory_space<vmem>>, vector<1x16x16x128xf32>
    %92 = vector.shape_cast %91 : vector<1x16x16x128xf32> to vector<16x16x128xf32>
    %93 = vector.shape_cast %90 : vector<16x16x128xf32> to vector<1x16x16x128xf32>
    tpu.vector_store %arg8[%c0_116, %c0_117, %c0_118, %c0_119], %93 {strides = array<i32>} : memref<1x16x16x128xf32, #tpu.memory_space<vmem>>, vector<1x16x16x128xf32>,
    return
  }
  func.func @transform_0(%arg0: i32) -> (i32, i32, i32, i32) {
    %c0_i32 = arith.constant 0 : i32
    %c0_i32_0 = arith.constant 0 : i32
    %c0_i32_1 = arith.constant 0 : i32
    %c0_i32_2 = arith.constant 0 : i32
    return %arg0, %c0_i32, %c0_i32_0, %c0_i32_1 : i32, i32, i32, i32
  }
  func.func @transform_1(%arg0: i32) -> (i32, i32) {
    %c0_i32 = arith.constant 0 : i32
    %c0_i32_0 = arith.constant 0 : i32
    %c0_i32_1 = arith.constant 0 : i32
    return %c0_i32, %c0_i32_0 : i32, i32
  }
  func.func @transform_2(%arg0: i32) -> (i32, i32) {
    %c0_i32 = arith.constant 0 : i32
    %c0_i32_0 = arith.constant 0 : i32
    %c0_i32_1 = arith.constant 0 : i32
    return %c0_i32, %c0_i32_0 : i32, i32
  }
  func.func @transform_3(%arg0: i32) -> (i32, i32) {
    %c0_i32 = arith.constant 0 : i32
    %c0_i32_0 = arith.constant 0 : i32
    %c0_i32_1 = arith.constant 0 : i32
    return %c0_i32, %c0_i32_0 : i32, i32
  }
  func.func @transform_4(%arg0: i32) -> (i32, i32) {
    %c0_i32 = arith.constant 0 : i32
    %c0_i32_0 = arith.constant 0 : i32
    %c0_i32_1 = arith.constant 0 : i32
    return %c0_i32, %c0_i32_0 : i32, i32
  }
  func.func @transform_5(%arg0: i32) -> (i32, i32) {
    %c0_i32 = arith.constant 0 : i32
    %c0_i32_0 = arith.constant 0 : i32
    %c0_i32_1 = arith.constant 0 : i32
    return %c0_i32, %c0_i32_0 : i32, i32
  }
  func.func @transform_6(%arg0: i32) -> (i32, i32) {
    %c0_i32 = arith.constant 0 : i32
    %c0_i32_0 = arith.constant 0 : i32
    %c0_i32_1 = arith.constant 0 : i32
    return %c0_i32, %c0_i32_0 : i32, i32
  }
  func.func @transform_7(%arg0: i32) -> (i32, i32, i32, i32) {
    %c0_i32 = arith.constant 0 : i32
    %c0_i32_0 = arith.constant 0 : i32
    %c0_i32_1 = arith.constant 0 : i32
    %c0_i32_2 = arith.constant 0 : i32
    return %arg0, %c0_i32, %c0_i32_0, %c0_i32_1 : i32, i32, i32, i32
  }
}

</mosaic_0001>

<bundles_post_ra>
// kernel: basic_block_forward.1
= control target key start
LH: loop header
LB: loop body
LE: loop exit
PB: predicated region body
PF: predicated region fallthrough
CT: control target
= control target key end

     0   :  { %s3971_s24 = smov 0   ;;  %s7115_s0 = inlined_call_operand.vmem [shape: f32[2,18,18,128], index: 0, kind: input, shape index: {}]   ;;  %s7116_s1 = inlined_call_operand.vmem [shape: f32[1152,128], index: 1, kind: input, shape index: {}]   ;;  %s7117_s2 = inlined_call_operand.vmem [shape: f32[1,128], index: 2, kind: input, shape index: {}]   ;;  %s7118_s3 = inlined_call_operand.vmem [shape: f32[1152,128], index: 3, kind: input, shape index: {}]   ;;  %s7119_s4 = inlined_call_operand.vmem [shape: f32[1,128], index: 4, kind: input, shape index: {}]   ;;  %s7120_s5 = inlined_call_operand.vmem [shape: f32[128,128], index: 5, kind: input, shape index: {}]   ;;  %s7121_s6 = inlined_call_operand.vmem [shape: f32[1,128], index: 6, kind: input, shape index: {}]   ;;  %s7122_s7 = inlined_call_operand.vmem [shape: f32[2,16,16,128], index: 7, kind: output, shape index: {}]  }
   0x1 LB: > { %s3623_s25 = sadd.s32 4294967295, %s3928_s24   ;;  %p3627_p0 = scmp.ge.s32.totalorder %s3928_s24, 1  ;;  %s3928_s24 = sphi %s3971_s24, %s17_s24  }
   0x2   : > { %p237_p1 = scmp.lt.s32.totalorder %s3928_s24, 3 }
   0x4   : > { %p238_p2 = pnand %p3627_p0, %p237_p1 }
   0x6   : > { %241 = sbr.rel (%p238_p2) target bundleno = 1514 (0x5ea), region = 48 }
   0xb   : > { %v584_v0 = vld [vmem:[%s7116_s1 + $0x78] sm:$0xff]  ;;  %v583_v1 = vld [vmem:[%s7116_s1 + $0x70] sm:$0xff]  ;;  %v582_v3 = vld [vmem:[%s7116_s1 + $0x68] sm:$0xff]  ;;  %p4096_p3 = scmp.lt.s32.totalorder %s3623_s25, 1 }
   0xc   : > { %717 = vmatpush.msra.mxu0 %v584_v0  ;;  %3858 = vmatpush.msra.mxu3 %v584_v0  ;;  %v3988_v2 = vld [vmem:[%s7116_s1 + $0x178] sm:$0xff]  ;;  %v3997_v4 = vld [vmem:[%s7116_s1 + $0x170] sm:$0xff]  ;;  %v4007_v6 = vld [vmem:[%s7116_s1 + $0x168] sm:$0xff] }
   0xd   : > { %943 = vmatpush.msra.mxu2 %v3988_v2  ;;  %v4002_v5 = vld [vmem:[%s7116_s1 + $0xf8] sm:$0xff]  ;;  %v4012_v7 = vld [vmem:[%s7116_s1 + $0xf0] sm:$0xff]  ;;  %v581_v8 = vld [vmem:[%s7116_s1 + $0x60] sm:$0xff]  ;;  %s7370_s25 = smov (!%p4096_p3, %s3623_s25), 1 }
   0xe   : > { %718 = vmatpush.msra.mxu0 %v583_v1  ;;  %3859 = vmatpush.msra.mxu3 %v583_v1  ;;  %v4022_v9 = vld [vmem:[%s7116_s1 + $0x160] sm:$0xff]  ;;  %v4027_v10 = vld [vmem:[%s7116_s1 + $0xe8] sm:$0xff]  ;;  %v580_v11 = vld [vmem:[%s7116_s1 + $0x58] sm:$0xff]  ;;  %s3906_s13 = smul.u32 432, %s7370_s25  ;;  %s3857_s22 = sshll.u32 %s7370_s25, 8 }
   0xf   : > { %944 = vmatpush.msra.mxu2 %v3997_v4  ;;  %830 = vmatpush.msra.mxu1 %v4002_v5  ;;  %v4037_v12 = vld [vmem:[%s7116_s1 + $0x158] sm:$0xff]  ;;  %v4042_v13 = vld [vmem:[%s7116_s1 + $0xe0] sm:$0xff]  ;;  %v579_v14 = vld [vmem:[%s7116_s1 + $0x50] sm:$0xff]  ;;  %s6949_s27 = scalar_lea.vmem %s7122_s7, %s3857_s22 }
  0x10   : > { %719 = vmatpush.msra.mxu0 %v582_v3  ;;  %3860 = vmatpush.msra.mxu3 %v582_v3  ;;  %v4052_v15 = vld [vmem:[%s7116_s1 + $0x150] sm:$0xff]  ;;  %v4057_v16 = vld [vmem:[%s7116_s1 + $0xd8] sm:$0xff]  ;;  %v578_v17 = vld [vmem:[%s7116_s1 + $0x48] sm:$0xff]  ;;  %s4199_s30 = scalar_lea.vmem %s7115_s0, %s3906_s13 }
  0x11   : > { %945 = vmatpush.msra.mxu2 %v4007_v6  ;;  %831 = vmatpush.msra.mxu1 %v4012_v7  ;;  %v4067_v18 = vld [vmem:[%s7116_s1 + $0x148] sm:$0xff]  ;;  %v4072_v19 = vld [vmem:[%s7116_s1 + $0xd0] sm:$0xff]  ;;  %v577_v20 = vld [vmem:[%s7116_s1 + $0x40] sm:$0xff] }
  0x12   : > { %720 = vmatpush.msra.mxu0 %v581_v8  ;;  %3861 = vmatpush.msra.mxu3 %v581_v8  ;;  %v4082_v21 = vld [vmem:[%s7116_s1 + $0x140] sm:$0xff]  ;;  %v4087_v22 = vld [vmem:[%s7116_s1 + $0xc8] sm:$0xff]  ;;  %v576_v23 = vld [vmem:[%s7116_s1 + $0x38] sm:$0xff] }
  0x13   : > { %946 = vmatpush.msra.mxu2 %v4022_v9  ;;  %832 = vmatpush.msra.mxu1 %v4027_v10  ;;  %v4103_v24 = vld [vmem:[%s7116_s1 + $0x138] sm:$0xff]  ;;  %v4108_v25 = vld [vmem:[%s7116_s1 + $0xc0] sm:$0xff]  ;;  %v575_v26 = vld [vmem:[%s7116_s1 + $0x30] sm:$0xff] }
  0x14   : > { %721 = vmatpush.msra.mxu0 %v580_v11  ;;  %3862 = vmatpush.msra.mxu3 %v580_v11  ;;  %v4118_v27 = vld [vmem:[%s7116_s1 + $0x130] sm:$0xff]  ;;  %v4123_v28 = vld [vmem:[%s7116_s1 + $0xb8] sm:$0xff]  ;;  %v574_v29 = vld [vmem:[%s7116_s1 + $0x28] sm:$0xff] }
  0x15   : > { %947 = vmatpush.msra.mxu2 %v4037_v12  ;;  %833 = vmatpush.msra.mxu1 %v4042_v13  ;;  %v4139_v30 = vld [vmem:[%s7116_s1 + $0x128] sm:$0xff]  ;;  %v4144_v31 = vld [vmem:[%s7116_s1 + $0xb0] sm:$0xff]  ;;  %v573_v32 = vld [vmem:[%s7116_s1 + $0x20] sm:$0xff] }
  0x16   : > { %722 = vmatpush.msra.mxu0 %v579_v14  ;;  %3863 = vmatpush.msra.mxu3 %v579_v14  ;;  %v4154_v33 = vld [vmem:[%s7116_s1 + $0x120] sm:$0xff]  ;;  %v4159_v34 = vld [vmem:[%s7116_s1 + $0xa8] sm:$0xff]  ;;  %v572_v35 = vld [vmem:[%s7116_s1 + $0x18] sm:$0xff] }
  0x17   : > { %948 = vmatpush.msra.mxu2 %v4052_v15  ;;  %834 = vmatpush.msra.mxu1 %v4057_v16  ;;  %v4170_v36 = vld [vmem:[%s7116_s1 + $0x118] sm:$0xff]  ;;  %v4175_v37 = vld [vmem:[%s7116_s1 + $0xa0] sm:$0xff]  ;;  %v571_v38 = vld [vmem:[%s7116_s1 + $0x10] sm:$0xff] }
  0x18   : > { %723 = vmatpush.msra.mxu0 %v578_v17  ;;  %3864 = vmatpush.msra.mxu3 %v578_v17  ;;  %v4185_v39 = vld [vmem:[%s7116_s1 + $0x110] sm:$0xff]  ;;  %v4190_v40 = vld [vmem:[%s7116_s1 + $0x98] sm:$0xff]  ;;  %v570_v41 = vld [vmem:[%s7116_s1 + $0x8] sm:$0xff] }
  0x19   : > { %949 = vmatpush.msra.mxu2 %v4067_v18  ;;  %835 = vmatpush.msra.mxu1 %v4072_v19  ;;  %v4205_v42 = vld [vmem:[%s7116_s1 + $0x108] sm:$0xff]  ;;  %v4210_v43 = vld [vmem:[%s7116_s1 + $0x90] sm:$0xff]  ;;  %v569_v44 = vld [vmem:[%s7116_s1] sm:$0xff] }
  0x1a   : > { %724 = vmatpush.msra.mxu0 %v577_v20  ;;  %3865 = vmatpush.msra.mxu3 %v577_v20  ;;  %v279_v45 = vld [vmem:[%s4199_s30] sm:$0xff]  ;;  %v586_v49 = vld [vmem:[%s7116_s1 + $0x88] sm:$0xff]  ;;  %v648_v50 = vld [vmem:[%s7116_s1 + $0x278] sm:$0xff] }
  0x1b   : > { %950 = vmatpush.msra.mxu2 %v4082_v21  ;;  %836 = vmatpush.msra.mxu1 %v4087_v22  ;;  %v303_v46 = vld [vmem:[%s4199_s30 + $0x120] sm:$0xff]  ;;  %v647_v53 = vld [vmem:[%s7116_s1 + $0x270] sm:$0xff]  ;;  %v280_v54 = vld [vmem:[%s4199_s30 + $0x8] sm:$0xff] }
  0x1c   : > { %725 = vmatpush.msra.mxu0 %v576_v23  ;;  %3866 = vmatpush.msra.mxu3 %v576_v23  ;;  %v4224_v47 = vld [vmem:[%s7116_s1 + $0x100] sm:$0xff]  ;;  %v304_v55 = vld [vmem:[%s4199_s30 + $0x128] sm:$0xff]  ;;  %v4258_v60 = vld [vmem:[%s4199_s30 + $0x18] sm:$0xff] }
  0x1d   : > { %951 = vmatpush.msra.mxu2 %v4103_v24  ;;  %837 = vmatpush.msra.mxu1 %v4108_v25  ;;  %v343_v48 = vld [vmem:[%s4199_s30 + $0x2] sm:$0xff]  ;;  %v344_v57 = vld [vmem:[%s4199_s30 + $0xa] sm:$0xff]  ;;  %v305_v61 = vld [vmem:[%s4199_s30 + $0x138] sm:$0xff] }
  0x1e   : > { %726 = vmatpush.msra.mxu0 %v575_v26  ;;  %3867 = vmatpush.msra.mxu3 %v575_v26  ;;  %v585_v51 = vld [vmem:[%s7116_s1 + $0x80] sm:$0xff]  ;;  %v646_v56 = vld [vmem:[%s7116_s1 + $0x268] sm:$0xff]  ;;  %v4294_v8 = vld [vmem:[%s4199_s30 + $0x30] sm:$0xff] }
  0x1f   : > { %952 = vmatpush.msra.mxu2 %v4118_v27  ;;  %838 = vmatpush.msra.mxu1 %v4123_v28  ;;  %v311_v52 = vld [vmem:[%s4199_s30 + $0x1] sm:$0xff]  ;;  %v312_v59 = vld [vmem:[%s4199_s30 + $0x9] sm:$0xff]  ;;  %v4270_v63 = vld [vmem:[%s4199_s30 + $0x19] sm:$0xff] }
  0x20   : > { %727 = vmatpush.msra.mxu0 %v574_v29  ;;  %3868 = vmatpush.msra.mxu3 %v574_v29  ;;  %v645_v58 = vld [vmem:[%s7116_s1 + $0x260] sm:$0xff]  ;;  %v4299_v11 = vld [vmem:[%s4199_s30 + $0x32] sm:$0xff]  ;;  %v336_v29 = vld [vmem:[%s4199_s30 + $0x129] sm:$0xff] }
  0x21   : > { %953 = vmatpush.msra.mxu2 %v4139_v30  ;;  %839 = vmatpush.msra.mxu1 %v4144_v31  ;;  %v4263_v62 = vld [vmem:[%s4199_s30 + $0x1a] sm:$0xff]  ;;  %v4280_v3 = vld [vmem:[%s4199_s30 + $0x22] sm:$0xff]  ;;  %v4308_v14 = vld [vmem:[%s4199_s30 + $0x31] sm:$0xff] }
  0x22   : > { %728 = vmatpush.msra.mxu0 %v573_v32  ;;  %3869 = vmatpush.msra.mxu3 %v573_v32  ;;  %v4274_v0 = vld [vmem:[%s4199_s30 + $0x20] sm:$0xff]  ;;  %v308_v17 = vld [vmem:[%s4199_s30 + $0x158] sm:$0xff]  ;;  %v310_v20 = vld [vmem:[%s4199_s30 + $0x170] sm:$0xff] }
  0x23   : > { %954 = vmatpush.msra.mxu2 %v4154_v33  ;;  %840 = vmatpush.msra.mxu1 %v4159_v34  ;;  %v306_v1 = vld [vmem:[%s4199_s30 + $0x140] sm:$0xff]  ;;  %v4365_v23 = vld [vmem:[%s4199_s30 + $0x51] sm:$0xff]  ;;  %v4397_v32 = vld [vmem:[%s4199_s30 + $0x69] sm:$0xff] }
  0x24   : > { %729 = vmatpush.msra.mxu0 %v572_v35  ;;  %3870 = vmatpush.msra.mxu3 %v572_v35  ;;  %v4375_v26 = vld [vmem:[%s4199_s30 + $0x62] sm:$0xff]  ;;  %v4405_v35 = vld [vmem:[%s4199_s30 + $0x7a] sm:$0xff] }
  0x25   : > { %955 = vmatpush.msra.mxu2 %v4170_v36  ;;  %841 = vmatpush.msra.mxu1 %v4175_v37 }
  0x26   : > { %730 = vmatpush.msra.mxu0 %v571_v38  ;;  %3871 = vmatpush.msra.mxu3 %v571_v38  ;;  %v4416_v38 = vld [vmem:[%s4199_s30 + $0x80] sm:$0xff] }
  0x27   : > { %956 = vmatpush.msra.mxu2 %v4185_v39  ;;  %842 = vmatpush.msra.mxu1 %v4190_v40 }
  0x28   : > { %731 = vmatpush.msra.mxu0 %v570_v41  ;;  %3872 = vmatpush.msra.mxu3 %v570_v41  ;;  %v4426_v41 = vld [vmem:[%s4199_s30 + $0x81] sm:$0xff] }
  0x29   : > { %957 = vmatpush.msra.mxu2 %v4205_v42  ;;  %843 = vmatpush.msra.mxu1 %v4210_v43 }
  0x2a   : > { %732 = vmatpush.msra.mxu0 %v569_v44  ;;  %3873 = vmatpush.msra.mxu3 %v569_v44  ;;  %v4434_v44 = vld [vmem:[%s4199_s30 + $0x92] sm:$0xff] }
  0x2b   : > { %733 = vmatmul.f32.vlgmr.msra.gmra.mxu0 %v279_v45  ;;  %805 = vmatmul.f32.vlgmr.msra.gmra.mxu3 %v303_v46  ;;  %v632_v45 = vld [vmem:[%s7116_s1 + $0x1f8] sm:$0xff]  ;;  %v638_v46 = vld [vmem:[%s7116_s1 + $0x228] sm:$0xff] }
  0x2c   : > { %3874 = vmatpush.msrb.mxu3 %v4002_v5  ;;  %958 = vmatpush.msra.mxu2 %v4224_v47  ;;  %v644_v5 = vld [vmem:[%s7116_s1 + $0x258] sm:$0xff] }
  0x2d   : > { %959 = vmatmul.f32.vlgmr.msra.gmra.mxu2 %v343_v48  ;;  %844 = vmatpush.msra.mxu1 %v586_v49  ;;  %v4448_v48 = vld [vmem:[%s4199_s30 + $0x91] sm:$0xff] }
  0x2e   : > { %3875 = vmatpush.msrb.mxu3 %v4012_v7  ;;  %1169 = vmatpush.msrb.mxu0 %v648_v50  ;;  %v4290_v7 = vld [vmem:[%s4199_s30 + $0x21] sm:$0xff]  ;;  %v4454_v50 = vld [vmem:[%s4199_s30 + $0x98] sm:$0xff] }
  0x2f   : > { %845 = vmatpush.msra.mxu1 %v585_v51 }
  0x30   : > { %3876 = vmatpush.msrb.mxu3 %v4027_v10  ;;  %846 = vmatmul.f32.vlgmr.msra.gmra.mxu1 %v311_v52  ;;  %v307_v10 = vld [vmem:[%s4199_s30 + $0x150] sm:$0xff]  ;;  %v4459_v52 = vld [vmem:[%s4199_s30 + $0x9a] sm:$0xff] }
  0x31   : > { %1170 = vmatpush.msrb.mxu0 %v647_v53  ;;  %v630_v53 = vld [vmem:[%s7116_s1 + $0x1e8] sm:$0xff] }
  0x32   : > { %3877 = vmatpush.msrb.mxu3 %v4042_v13  ;;  %v643_v13 = vld [vmem:[%s7116_s1 + $0x250] sm:$0xff] }
  0x33   : > { %736 = vmatmul.f32.gmra.mxu0 %v280_v54  ;;  %808 = vmatmul.f32.gmra.mxu3 %v304_v55  ;;  %v664_v54 = vld [vmem:[%s7116_s1 + $0x2f8] sm:$0xff] }
  0x34   : > { %3878 = vmatpush.msrb.mxu3 %v4057_v16  ;;  %1171 = vmatpush.msrb.mxu0 %v646_v56  ;;  %v4312_v16 = vld [vmem:[%s4199_s30 + $0x38] sm:$0xff]  ;;  %v629_v56 = vld [vmem:[%s7116_s1 + $0x1e0] sm:$0xff] }
  0x35   : > { %962 = vmatmul.f32.gmra.mxu2 %v344_v57  ;;  %1282 = vmatpush.msrb.mxu1 %v664_v54  ;;  %v4470_v55 = vld [vmem:[%s4199_s30 + $0x99] sm:$0xff]  ;;  %v623_v54 = vld [vmem:[%s7116_s1 + $0x1b0] sm:$0xff] }
  0x36   : > { %3879 = vmatpush.msrb.mxu3 %v4072_v19  ;;  %1172 = vmatpush.msrb.mxu0 %v645_v58  ;;  %v4318_v19 = vld [vmem:[%s4199_s30 + $0x3a] sm:$0xff]  ;;  %v4479_v58 = vld [vmem:[%s4199_s30 + $0xa8] sm:$0xff] }
  0x37   : > { %v637_v57 = vld [vmem:[%s7116_s1 + $0x220] sm:$0xff] }
  0x38   : > { %849 = vmatmul.f32.gmra.mxu1 %v312_v59  ;;  %3880 = vmatpush.msrb.mxu3 %v4087_v22  ;;  %v641_v22 = vld [vmem:[%s7116_s1 + $0x240] sm:$0xff]  ;;  %v341_v59 = vld [vmem:[%s4199_s30 + $0x169] sm:$0xff] }
  0x39   : > { %1173 = vmatpush.msrb.mxu0 %v644_v5  ;;  %v628_v5 = vld [vmem:[%s7116_s1 + $0x1d8] sm:$0xff] }
  0x3a   : > { %3881 = vmatpush.msrb.mxu3 %v4108_v25  ;;  %v335_v25 = vld [vmem:[%s4199_s30 + $0x121] sm:$0xff] }
  0x3b   : > { %739 = vmatmul.f32.gmra.mxu0 %v4258_v60  ;;  %811 = vmatmul.f32.gmra.mxu3 %v305_v61  ;;  %v679_v61 = vld [vmem:[%s7116_s1 + $0x370] sm:$0xff] }
  0x3c   : > { %3882 = vmatpush.msrb.mxu3 %v4123_v28  ;;  %1174 = vmatpush.msrb.mxu0 %v643_v13  ;;  %v4384_v28 = vld [vmem:[%s4199_s30 + $0x68] sm:$0xff]  ;;  %v627_v13 = vld [vmem:[%s7116_s1 + $0x1d0] sm:$0xff] }
  0x3d   : > { %965 = vmatmul.f32.gmra.mxu2 %v4263_v62 }
  0x3e   : > { %3883 = vmatpush.msrb.mxu3 %v4144_v31  ;;  %v640_v31 = vld [vmem:[%s7116_s1 + $0x238] sm:$0xff] }
  0x40   : > { %852 = vmatmul.f32.gmra.mxu1 %v4270_v63  ;;  %3884 = vmatpush.msrb.mxu3 %v4159_v34  ;;  %v337_v34 = vld [vmem:[%s4199_s30 + $0x139] sm:$0xff] }
  0x42   : > { %3885 = vmatpush.msrb.mxu3 %v4175_v37  ;;  %v4413_v37 = vld [vmem:[%s4199_s30 + $0x79] sm:$0xff] }
  0x43   : > { %742 = vmatmul.f32.gmra.mxu0 %v4274_v0  ;;  %814 = vmatmul.f32.gmra.mxu3 %v306_v1  ;;  %v4487_v1 = vld [vmem:[%s4199_s30 + $0xaa] sm:$0xff] }
  0x44   : > { %3886 = vmatpush.msrb.mxu3 %v4190_v40  ;;  %v4421_v40 = vld [vmem:[%s4199_s30 + $0x82] sm:$0xff] }
  0x45   : > { %968 = vmatmul.f32.gmra.mxu2 %v4280_v3 }
  0x46   : > { %3887 = vmatpush.msrb.mxu3 %v4210_v43  ;;  %v339_v43 = vld [vmem:[%s4199_s30 + $0x151] sm:$0xff] }
  0x48   : > { %855 = vmatmul.f32.gmra.mxu1 %v4290_v7  ;;  %3888 = vmatpush.msrb.mxu3 %v586_v49  ;;  %v631_v49 = vld [vmem:[%s7116_s1 + $0x1f0] sm:$0xff] }
  0x4a   : > { %3889 = vmatpush.msrb.mxu3 %v585_v51  ;;  %v340_v51 = vld [vmem:[%s4199_s30 + $0x159] sm:$0xff] }
  0x4b   : > { %745 = vmatmul.f32.gmra.mxu0 %v4294_v8  ;;  %817 = vmatmul.f32.gmra.mxu3 %v307_v10  ;;  %v4495_v10 = vld [vmem:[%s4199_s30 + $0xa9] sm:$0xff] }
  0x4c   : > { %3890 = vmatpush.msra.mxu3 %v3988_v2  ;;  %v4325_v2 = vld [vmem:[%s4199_s30 + $0x39] sm:$0xff] }
  0x4d   : > { %971 = vmatmul.f32.gmra.mxu2 %v4299_v11 }
  0x4e   : > { %3891 = vmatpush.msra.mxu3 %v3997_v4  ;;  %v4329_v4 = vld [vmem:[%s4199_s30 + $0x48] sm:$0xff] }
  0x50   : > { %858 = vmatmul.f32.gmra.mxu1 %v4308_v14  ;;  %3892 = vmatpush.msra.mxu3 %v4007_v6  ;;  %v309_v6 = vld [vmem:[%s4199_s30 + $0x168] sm:$0xff] }
  0x52   : > { %3893 = vmatpush.msra.mxu3 %v4022_v9  ;;  %v4335_v9 = vld [vmem:[%s4199_s30 + $0x4a] sm:$0xff] }
  0x53   : > { %748 = vmatmul.f32.gmra.mxu0 %v4312_v16  ;;  %820 = vmatmul.f32.gmra.mxu3 %v308_v17  ;;  %v663_v17 = vld [vmem:[%s7116_s1 + $0x2f0] sm:$0xff] }
  0x54   : > { %3894 = vmatpush.msra.mxu3 %v4037_v12  ;;  %v642_v12 = vld [vmem:[%s7116_s1 + $0x248] sm:$0xff]  ;;  %1283 = vmatpush.msrb.mxu1 %v663_v17 }
  0x55   : > { %974 = vmatmul.f32.gmra.mxu2 %v4318_v19  ;;  %1175 = vmatpush.msrb.mxu0 %v642_v12  ;;  %v342_v12 = vld [vmem:[%s4199_s30 + $0x171] sm:$0xff] }
  0x56   : > { %3895 = vmatpush.msra.mxu3 %v4052_v15  ;;  %v4345_v15 = vld [vmem:[%s4199_s30 + $0x49] sm:$0xff] }
  0x57   : > { %1176 = vmatpush.msrb.mxu0 %v641_v22  ;;  %v626_v22 = vld [vmem:[%s7116_s1 + $0x1c8] sm:$0xff] }
  0x58   : > { %861 = vmatmul.f32.gmra.mxu1 %v4325_v2  ;;  %3896 = vmatpush.msra.mxu3 %v4067_v18  ;;  %v4349_v18 = vld [vmem:[%s4199_s30 + $0x50] sm:$0xff] }
  0x59   : > { %1177 = vmatpush.msrb.mxu0 %v640_v31  ;;  %v4523_v31 = vld [vmem:[%s4199_s30 + $0xb1] sm:$0xff] }
  0x5a   : > { %3897 = vmatpush.msra.mxu3 %v4082_v21  ;;  %v4355_v21 = vld [vmem:[%s4199_s30 + $0x52] sm:$0xff]  ;;  %v4572_v17 = vld [vmem:[%s4199_s30 + $0xca] sm:$0xff] }
  0x5b   : > { %751 = vmatmul.f32.gmra.mxu0 %v4329_v4  ;;  %823 = vmatmul.f32.gmra.mxu3 %v309_v6  ;;  %v4504_v6 = vld [vmem:[%s4199_s30 + $0xb0] sm:$0xff]  ;;  %7149 = vst [vmem:[#allocation7_spill] sm:$0xff] %v4572_v17 }
  0x5c   : > { %3898 = vmatpush.msra.mxu3 %v4103_v24  ;;  %v4369_v24 = vld [vmem:[%s4199_s30 + $0x60] sm:$0xff] }
  0x5d   : > { %977 = vmatmul.f32.gmra.mxu2 %v4335_v9 }
  0x5e   : > { %3899 = vmatpush.msra.mxu3 %v4118_v27  ;;  %v4381_v27 = vld [vmem:[%s4199_s30 + $0x61] sm:$0xff] }
  0x60   : > { %864 = vmatmul.f32.gmra.mxu1 %v4345_v15  ;;  %3900 = vmatpush.msra.mxu3 %v4139_v30  ;;  %v4389_v30 = vld [vmem:[%s4199_s30 + $0x6a] sm:$0xff] }
  0x62   : > { %3901 = vmatpush.msra.mxu3 %v4154_v33  ;;  %v4400_v33 = vld [vmem:[%s4199_s30 + $0x78] sm:$0xff] }
  0x63   : > { %754 = vmatmul.f32.gmra.mxu0 %v4349_v18  ;;  %826 = vmatmul.f32.gmra.mxu3 %v310_v20  ;;  %v4509_v20 = vld [vmem:[%s4199_s30 + $0xb2] sm:$0xff] }
  0x64   : > { %3902 = vmatpush.msra.mxu3 %v4170_v36  ;;  %v639_v36 = vld [vmem:[%s7116_s1 + $0x230] sm:$0xff] }
  0x65   : > { %980 = vmatmul.f32.gmra.mxu2 %v4355_v21  ;;  %1178 = vmatpush.msrb.mxu0 %v639_v36 }
  0x66   : > { %3903 = vmatpush.msra.mxu3 %v4185_v39  ;;  %v338_v39 = vld [vmem:[%s4199_s30 + $0x141] sm:$0xff] }
  0x67   : > { %1179 = vmatpush.msrb.mxu0 %v638_v46  ;;  %v624_v46 = vld [vmem:[%s7116_s1 + $0x1b8] sm:$0xff] }
  0x68   : > { %867 = vmatmul.f32.gmra.mxu1 %v4365_v23  ;;  %3904 = vmatpush.msra.mxu3 %v4205_v42  ;;  %v4429_v42 = vld [vmem:[%s4199_s30 + $0x90] sm:$0xff] }
  0x69   : > { %1180 = vmatpush.msrb.mxu0 %v637_v57 }
  0x6a   : > { %3905 = vmatpush.msra.mxu3 %v4224_v47  ;;  %v680_v47 = vld [vmem:[%s7116_s1 + $0x378] sm:$0xff] }
  0x6b   : > { %757 = vmatmul.f32.gmra.mxu0 %v4369_v24  ;;  %918 = vmatmul.f32.vlgmr.msrb.gmra.mxu3 %v335_v25  ;;  %v636_v25 = vld [vmem:[%s7116_s1 + $0x218] sm:$0xff] }
  0x6c   : > { %1056 = vmatpush.msrb.mxu3 %v632_v45  ;;  %1395 = vmatpush.msrb.mxu2 %v680_v47  ;;  %v4536_v45 = vld [vmem:[%s4199_s30 + $0xc2] sm:$0xff] }
  0x6d   : > { %983 = vmatmul.f32.gmra.mxu2 %v4375_v26  ;;  %1181 = vmatpush.msrb.mxu0 %v636_v25  ;;  %v662_v47 = vld [vmem:[%s7116_s1 + $0x2e8] sm:$0xff] }
  0x6e   : > { %1057 = vmatpush.msrb.mxu3 %v631_v49  ;;  %1396 = vmatpush.msrb.mxu2 %v679_v61  ;;  %v368_v61 = vld [vmem:[%s4199_s30 + $0x12a] sm:$0xff] }
  0x6f   : > { %1284 = vmatpush.msrb.mxu1 %v662_v47  ;;  %v4582_v25 = vld [vmem:[%s4199_s30 + $0xc9] sm:$0xff]  ;;  %v4595_v47 = vld [vmem:[%s4199_s30 + $0xd8] sm:$0xff] }
  0x70   : > { %870 = vmatmul.f32.gmra.mxu1 %v4381_v27  ;;  %1058 = vmatpush.msrb.mxu3 %v630_v53 }
  0x72   : > { %1059 = vmatpush.msrb.mxu3 %v629_v56  ;;  %v635_v56 = vld [vmem:[%s7116_s1 + $0x210] sm:$0xff] }
  0x73   : > { %760 = vmatmul.f32.gmra.mxu0 %v4384_v28  ;;  %921 = vmatmul.f32.gmra.mxu3 %v336_v29  ;;  %v678_v29 = vld [vmem:[%s7116_s1 + $0x368] sm:$0xff] }
  0x74   : > { %1060 = vmatpush.msrb.mxu3 %v628_v5  ;;  %1397 = vmatpush.msrb.mxu2 %v678_v29 }
  0x75   : > { %986 = vmatmul.f32.gmra.mxu2 %v4389_v30  ;;  %1182 = vmatpush.msrb.mxu0 %v635_v56 }
  0x76   : > { %1061 = vmatpush.msrb.mxu3 %v627_v13  ;;  %v677_v13 = vld [vmem:[%s7116_s1 + $0x360] sm:$0xff] }
  0x77   : > { %1398 = vmatpush.msrb.mxu2 %v677_v13  ;;  %v4605_v13 = vld [vmem:[%s4199_s30 + $0xda] sm:$0xff] }
  0x78   : > { %873 = vmatmul.f32.gmra.mxu1 %v4397_v32  ;;  %1062 = vmatpush.msrb.mxu3 %v626_v22  ;;  %7153 = vst [vmem:[#allocation11_spill] sm:$0xff] %v4605_v13 }
  0x7b   : > { %763 = vmatmul.f32.gmra.mxu0 %v4400_v33  ;;  %924 = vmatmul.f32.gmra.mxu3 %v337_v34  ;;  %v625_v34 = vld [vmem:[%s7116_s1 + $0x1c0] sm:$0xff] }
  0x7c   : > { %1063 = vmatpush.msrb.mxu3 %v625_v34  ;;  %v621_v34 = vld [vmem:[%s7116_s1 + $0x1a0] sm:$0xff] }
  0x7d   : > { %989 = vmatmul.f32.gmra.mxu2 %v4405_v35 }
  0x7e   : > { %1064 = vmatpush.msrb.mxu3 %v624_v46 }
  0x80   : > { %876 = vmatmul.f32.gmra.mxu1 %v4413_v37  ;;  %1065 = vmatpush.msrb.mxu3 %v623_v54  ;;  %v369_v54 = vld [vmem:[%s4199_s30 + $0x13a] sm:$0xff] }
  0x83   : > { %766 = vmatmul.f32.gmra.mxu0 %v4416_v38  ;;  %927 = vmatmul.f32.gmra.mxu3 %v338_v39  ;;  %v4531_v39 = vld [vmem:[%s4199_s30 + $0xc0] sm:$0xff] }
  0x85   : > { %992 = vmatmul.f32.gmra.mxu2 %v4421_v40 }
  0x88   : > { %879 = vmatmul.f32.gmra.mxu1 %v4426_v41 }
  0x8b   : > { %769 = vmatmul.f32.gmra.mxu0 %v4429_v42  ;;  %930 = vmatmul.f32.gmra.mxu3 %v339_v43  ;;  %v367_v43 = vld [vmem:[%s4199_s30 + $0x122] sm:$0xff] }
  0x8d   : > { %995 = vmatmul.f32.gmra.mxu2 %v4434_v44 }
  0x90   : > { %882 = vmatmul.f32.gmra.mxu1 %v4448_v48 }
  0x93   : > { %772 = vmatmul.f32.gmra.mxu0 %v4454_v50  ;;  %933 = vmatmul.f32.gmra.mxu3 %v340_v51  ;;  %v4549_v51 = vld [vmem:[%s4199_s30 + $0xc1] sm:$0xff] }
  0x95   : > { %998 = vmatmul.f32.gmra.mxu2 %v4459_v52 }
  0x98   : > { %885 = vmatmul.f32.gmra.mxu1 %v4470_v55 }
  0x9b   : > { %775 = vmatmul.f32.gmra.mxu0 %v4479_v58  ;;  %936 = vmatmul.f32.gmra.mxu3 %v341_v59  ;;  %v4562_v59 = vld [vmem:[%s4199_s30 + $0xc8] sm:$0xff] }
  0x9d   : > { %1001 = vmatmul.f32.gmra.mxu2 %v4487_v1 }
  0xa0   : > { %888 = vmatmul.f32.gmra.mxu1 %v4495_v10 }
  0xa3   : > { %778 = vmatmul.f32.gmra.mxu0 %v4504_v6  ;;  %939 = vmatmul.f32.gmra.mxu3 %v342_v12  ;;  %v622_v12 = vld [vmem:[%s7116_s1 + $0x1a8] sm:$0xff] }
  0xa4   : > { %1066 = vmatpush.msrb.mxu3 %v622_v12  ;;  %v620_v12 = vld [vmem:[%s7116_s1 + $0x198] sm:$0xff] }
  0xa5   : > { %1004 = vmatmul.f32.gmra.mxu2 %v4509_v20 }
  0xa6   : > { %1067 = vmatpush.msrb.mxu3 %v621_v34  ;;  %v675_v34 = vld [vmem:[%s7116_s1 + $0x350] sm:$0xff] }
  0xa8   : > { %v4528_v36 = vpop.f32.mrf.mxu0  ;;  %891 = vmatmul.f32.gmra.mxu1 %v4523_v31  ;;  %1068 = vmatpush.msrb.mxu3 %v620_v12  ;;  %v659_v12 = vld [vmem:[%s7116_s1 + $0x2d0] sm:$0xff] }
  0xa9   : > { %7145 = vst [vmem:[#allocation3_spill] sm:$0xff] %v4528_v36  ;;  %v4707_v36 = vld [vmem:[%s4199_s30 + $0xf2] sm:$0xff] }
  0xaa   : > { %7165 = vst [vmem:[#allocation23_spill] sm:$0xff] %v4707_v36 }
  0xab   : > { %781 = vmatmul.f32.gmra.mxu0 %v4531_v39  ;;  %1031 = vmatmul.f32.vlgmr.msra.gmra.mxu3 %v367_v43  ;;  %v661_v43 = vld [vmem:[%s7116_s1 + $0x2e0] sm:$0xff] }
  0xac   : > { %1285 = vmatpush.msrb.mxu1 %v661_v43 }
  0xad   : > { %1007 = vmatmul.f32.gmra.mxu2 %v4536_v45  ;;  %v4546_v49 = vpop.f32.mrf.mxu1 }
  0xae   : > { %7146 = vst [vmem:[#allocation4_spill] sm:$0xff] %v4546_v49  ;;  %v4551_v53 = vpop.f32.mrf.mxu3 }
  0xb0   : > { %v4559_v57 = vpop.f32.mrf.mxu0  ;;  %v4565_v5 = vpop.f32.mrf.mxu2  ;;  %894 = vmatmul.f32.gmra.mxu1 %v4549_v51 }
  0xb1   : > { %7147 = vst [vmem:[#allocation5_spill] sm:$0xff] %v4559_v57  ;;  %v370_v57 = vld [vmem:[%s4199_s30 + $0x142] sm:$0xff] }
  0xb2   : > { %7148 = vst [vmem:[#allocation6_spill] sm:$0xff] %v4565_v5  ;;  %v4643_v5 = vld [vmem:[%s4199_s30 + $0xe0] sm:$0xff] }
  0xb3   : > { %784 = vmatmul.f32.gmra.mxu0 %v4562_v59  ;;  %1034 = vmatmul.f32.gmra.mxu3 %v368_v61  ;;  %v676_v61 = vld [vmem:[%s7116_s1 + $0x358] sm:$0xff]  ;;  %7157 = vst [vmem:[#allocation15_spill] sm:$0xff] %v4643_v5 }
  0xb4   : > { %1399 = vmatpush.msrb.mxu2 %v676_v61  ;;  %v660_v61 = vld [vmem:[%s7116_s1 + $0x2d8] sm:$0xff] }
  0xb5   : > { %1010 = vmatmul.f32.gmra.mxu2 %v4572_v17  ;;  %v4579_v22 = vpop.f32.mrf.mxu1  ;;  %1286 = vmatpush.msrb.mxu1 %v660_v61  ;;  %v672_v61 = vld [vmem:[%s7116_s1 + $0x338] sm:$0xff] }
  0xb6   : > { %7150 = vst [vmem:[#allocation8_spill] sm:$0xff] %v4579_v22  ;;  %v4584_v29 = vpop.f32.mrf.mxu3  ;;  %1400 = vmatpush.msrb.mxu2 %v675_v34  ;;  %v658_v34 = vld [vmem:[%s7116_s1 + $0x2c8] sm:$0xff]  ;;  %v371_v17 = vld [vmem:[%s4199_s30 + $0x152] sm:$0xff] }
  0xb7   : > { %1287 = vmatpush.msrb.mxu1 %v659_v12  ;;  %v671_v12 = vld [vmem:[%s7116_s1 + $0x330] sm:$0xff] }
  0xb8   : > { %v4592_v46 = vpop.f32.mrf.mxu0  ;;  %v4598_v56 = vpop.f32.mrf.mxu2  ;;  %897 = vmatmul.f32.gmra.mxu1 %v4582_v25 }
  0xb9   : > { %7151 = vst [vmem:[#allocation9_spill] sm:$0xff] %v4592_v46  ;;  %v674_v46 = vld [vmem:[%s7116_s1 + $0x348] sm:$0xff]  ;;  %1288 = vmatpush.msrb.mxu1 %v658_v34  ;;  %v656_v34 = vld [vmem:[%s7116_s1 + $0x2b8] sm:$0xff] }
  0xba   : > { %7152 = vst [vmem:[#allocation10_spill] sm:$0xff] %v4598_v56  ;;  %v634_v56 = vld [vmem:[%s7116_s1 + $0x208] sm:$0xff]  ;;  %1401 = vmatpush.msrb.mxu2 %v674_v46 }
  0xbb   : > { %787 = vmatmul.f32.gmra.mxu0 %v4595_v47  ;;  %1037 = vmatmul.f32.gmra.mxu3 %v369_v54  ;;  %v4621_v54 = vld [vmem:[%s4199_s30 + $0xd9] sm:$0xff]  ;;  %v618_v46 = vld [vmem:[%s7116_s1 + $0x188] sm:$0xff] }
  0xbc   : > { %1183 = vmatpush.msrb.mxu0 %v634_v56  ;;  %7155 = vst [vmem:[#allocation13_spill] sm:$0xff] %v4621_v54  ;;  %v619_v56 = vld [vmem:[%s7116_s1 + $0x190] sm:$0xff] }
  0xbd   : > { %1013 = vmatmul.f32.gmra.mxu2 %v4605_v13  ;;  %v4618_v43 = vpop.f32.mrf.mxu1  ;;  %1069 = vmatpush.msrb.mxu3 %v619_v56  ;;  %v657_v56 = vld [vmem:[%s7116_s1 + $0x2c0] sm:$0xff] }
  0xbe   : > { %7154 = vst [vmem:[#allocation12_spill] sm:$0xff] %v4618_v43  ;;  %v4629_v22 = vpop.f32.mrf.mxu3  ;;  %v673_v43 = vld [vmem:[%s7116_s1 + $0x340] sm:$0xff]  ;;  %1289 = vmatpush.msrb.mxu1 %v657_v56 }
  0xbf   : > { %1402 = vmatpush.msrb.mxu2 %v673_v43  ;;  %1070 = vmatpush.msrb.mxu3 %v618_v46  ;;  %v633_v46 = vld [vmem:[%s7116_s1 + $0x200] sm:$0xff] }
  0xc0   : > { %v4640_v13 = vpop.f32.mrf.mxu0  ;;  %v4646_v49 = vpop.f32.mrf.mxu2  ;;  %900 = vmatmul.f32.gmra.mxu1 %v4621_v54  ;;  %1184 = vmatpush.msrb.mxu0 %v633_v46 }
  0xc1   : > { %7156 = vst [vmem:[#allocation14_spill] sm:$0xff] %v4640_v13  ;;  %v4656_v13 = vld [vmem:[%s4199_s30 + $0xe2] sm:$0xff]  ;;  %1403 = vmatpush.msrb.mxu2 %v672_v61  ;;  %1290 = vmatpush.msrb.mxu1 %v656_v34  ;;  %v696_v34 = vld [vmem:[%s7116_s1 + $0x3f8] sm:$0xff] }
  0xc2   : > { %7158 = vst [vmem:[#allocation16_spill] sm:$0xff] %v4646_v49  ;;  %v670_v49 = vld [vmem:[%s7116_s1 + $0x328] sm:$0xff]  ;;  %v617_v61 = vld [vmem:[%s7116_s1 + $0x180] sm:$0xff] }
  0xc3   : > { %7159 = vst [vmem:[#allocation17_spill] sm:$0xff] %v4656_v13  ;;  %790 = vmatmul.f32.gmra.mxu0 %v4643_v5  ;;  %1040 = vmatmul.f32.gmra.mxu3 %v370_v57  ;;  %v4672_v57 = vld [vmem:[%s4199_s30 + $0xe1] sm:$0xff]  ;;  %v655_v5 = vld [vmem:[%s7116_s1 + $0x2b0] sm:$0xff] }
  0xc4   : > { %7161 = vst [vmem:[#allocation19_spill] sm:$0xff] %v4672_v57  ;;  %1404 = vmatpush.msrb.mxu2 %v671_v12  ;;  %v669_v12 = vld [vmem:[%s7116_s1 + $0x320] sm:$0xff]  ;;  %1071 = vmatpush.msrb.mxu3 %v617_v61  ;;  %v667_v61 = vld [vmem:[%s7116_s1 + $0x310] sm:$0xff] }
  0xc5   : > { %1016 = vmatmul.f32.gmra.mxu2 %v4656_v13  ;;  %v4669_v43 = vpop.f32.mrf.mxu1  ;;  %v4691_v13 = vld [vmem:[%s4199_s30 + $0xf0] sm:$0xff]  ;;  %1291 = vmatpush.msrb.mxu1 %v655_v5  ;;  %v653_v5 = vld [vmem:[%s7116_s1 + $0x2a0] sm:$0xff] }
  0xc6   : > { %7160 = vst [vmem:[#allocation18_spill] sm:$0xff] %v4669_v43  ;;  %v4677_v54 = vpop.f32.mrf.mxu3  ;;  %1405 = vmatpush.msrb.mxu2 %v670_v49  ;;  %v654_v49 = vld [vmem:[%s7116_s1 + $0x2a8] sm:$0xff]  ;;  %1508 = vmatpush.msra.mxu3 %v696_v34  ;;  %v372_v34 = vld [vmem:[%s4199_s30 + $0x15a] sm:$0xff] }
  0xc7   : > { %7163 = vst [vmem:[#allocation21_spill] sm:$0xff] %v4691_v13  ;;  %1292 = vmatpush.msrb.mxu1 %v654_v49  ;;  %v652_v49 = vld [vmem:[%s7116_s1 + $0x298] sm:$0xff] }
  0xc8   : > { %v4688_v43 = vpop.f32.mrf.mxu0  ;;  %v4694_v56 = vpop.f32.mrf.mxu2  ;;  %903 = vmatmul.f32.gmra.mxu1 %v4672_v57  ;;  %1406 = vmatpush.msrb.mxu2 %v669_v12  ;;  %v666_v12 = vld [vmem:[%s7116_s1 + $0x308] sm:$0xff] }
  0xc9   : > { %7162 = vst [vmem:[#allocation20_spill] sm:$0xff] %v4688_v43  ;;  %v668_v43 = vld [vmem:[%s7116_s1 + $0x318] sm:$0xff]  ;;  %1293 = vmatpush.msrb.mxu1 %v653_v5 }
  0xca   : > { %7164 = vst [vmem:[#allocation22_spill] sm:$0xff] %v4694_v56  ;;  %1407 = vmatpush.msrb.mxu2 %v668_v43  ;;  %v665_v43 = vld [vmem:[%s7116_s1 + $0x300] sm:$0xff] }
  0xcb   : > { %793 = vmatmul.f32.gmra.mxu0 %v4691_v13  ;;  %1043 = vmatmul.f32.gmra.mxu3 %v371_v17  ;;  %v4723_v17 = vld [vmem:[%s4199_s30 + $0xf1] sm:$0xff] }
  0xcc   : > { %7167 = vst [vmem:[#allocation25_spill] sm:$0xff] %v4723_v17  ;;  %1408 = vmatpush.msrb.mxu2 %v667_v61  ;;  %v4749_v61 = vld [vmem:[%s4199_s30 + $0xfa] sm:$0xff]  ;;  %1294 = vmatpush.msrb.mxu1 %v652_v49  ;;  %v373_v49 = vld [vmem:[%s4199_s30 + $0x16a] sm:$0xff] }
  0xcd   : > { %1019 = vmatmul.f32.gmra.mxu2 %v4707_v36  ;;  %v4720_v46 = vpop.f32.mrf.mxu1  ;;  %v4739_v36 = vld [vmem:[%s4199_s30 + $0xf8] sm:$0xff]  ;;  %7171 = vst [vmem:[#allocation29_spill] sm:$0xff] %v4749_v61  ;;  %v4799_v13 = vld [vmem:[%s4199_s30 + $0x110] sm:$0xff] }
  0xce   : > { %7166 = vst [vmem:[#allocation24_spill] sm:$0xff] %v4720_v46  ;;  %v4728_v56 = vpop.f32.mrf.mxu3  ;;  %1409 = vmatpush.msrb.mxu2 %v666_v12  ;;  %v712_v12 = vld [vmem:[%s7116_s1 + $0x478] sm:$0xff] }
  0xcf   : > { %7169 = vst [vmem:[#allocation27_spill] sm:$0xff] %v4739_v36  ;;  %1621 = vmatpush.msra.mxu0 %v712_v12 }
  0xd0   : > { %v4736_v46 = vpop.f32.mrf.mxu0  ;;  %v4742_v57 = vpop.f32.mrf.mxu2  ;;  %906 = vmatmul.f32.gmra.mxu1 %v4723_v17  ;;  %1410 = vmatpush.msrb.mxu2 %v665_v43 }
  0xd1   : > { %7168 = vst [vmem:[#allocation26_spill] sm:$0xff] %v4736_v46  ;;  %v4762_v46 = vld [vmem:[%s4199_s30 + $0xf9] sm:$0xff] }
  0xd2   : > { %7170 = vst [vmem:[#allocation28_spill] sm:$0xff] %v4742_v57  ;;  %v651_v57 = vld [vmem:[%s7116_s1 + $0x290] sm:$0xff] }
  0xd3   : > { %796 = vmatmul.f32.gmra.mxu0 %v4739_v36  ;;  %1046 = vmatmul.f32.gmra.mxu3 %v372_v34  ;;  %7173 = vst [vmem:[#allocation31_spill] sm:$0xff] %v4762_v46  ;;  %v650_v34 = vld [vmem:[%s7116_s1 + $0x288] sm:$0xff] }
  0xd4   : > { %1295 = vmatpush.msrb.mxu1 %v651_v57  ;;  %v4772_v36 = vld [vmem:[%s4199_s30 + $0x108] sm:$0xff]  ;;  %v649_v57 = vld [vmem:[%s7116_s1 + $0x280] sm:$0xff] }
  0xd5   : > { %1022 = vmatmul.f32.gmra.mxu2 %v4749_v61  ;;  %v4759_v5 = vpop.f32.mrf.mxu1  ;;  %7175 = vst [vmem:[#allocation33_spill] sm:$0xff] %v4772_v36 }
  0xd6   : > { %7172 = vst [vmem:[#allocation30_spill] sm:$0xff] %v4759_v5  ;;  %v4764_v43 = vpop.f32.mrf.mxu3  ;;  %1296 = vmatpush.msrb.mxu1 %v650_v34  ;;  %v4782_v5 = vld [vmem:[%s4199_s30 + $0x10a] sm:$0xff] }
  0xd7   : > { %7177 = vst [vmem:[#allocation35_spill] sm:$0xff] %v4782_v5 }
  0xd8   : > { %v4769_v17 = vpop.f32.mrf.mxu0  ;;  %v4775_v12 = vpop.f32.mrf.mxu2  ;;  %909 = vmatmul.f32.gmra.mxu1 %v4762_v46 }
  0xd9   : > { %7174 = vst [vmem:[#allocation32_spill] sm:$0xff] %v4769_v17  ;;  %v695_v17 = vld [vmem:[%s7116_s1 + $0x3f0] sm:$0xff]  ;;  %1297 = vmatpush.msrb.mxu1 %v649_v57 }
  0xda   : > { %7176 = vst [vmem:[#allocation34_spill] sm:$0xff] %v4775_v12  ;;  %1509 = vmatpush.msra.mxu3 %v695_v17  ;;  %v4792_v12 = vld [vmem:[%s4199_s30 + $0x109] sm:$0xff]  ;;  %v4806_v57 = vld [vmem:[%s4199_s30 + $0x112] sm:$0xff] }
  0xdb   : > { %799 = vmatmul.f32.gmra.mxu0 %v4772_v36  ;;  %1049 = vmatmul.f32.gmra.mxu3 %v373_v49  ;;  %7179 = vst [vmem:[#allocation37_spill] sm:$0xff] %v4792_v12  ;;  %v374_v49 = vld [vmem:[%s4199_s30 + $0x172] sm:$0xff] }
  0xdc   : > { %7182 = vst [vmem:[#allocation40_spill] sm:$0xff] %v4806_v57  ;;  %v711_v17 = vld [vmem:[%s7116_s1 + $0x470] sm:$0xff] }
  0xdd   : > { %1025 = vmatmul.f32.gmra.mxu2 %v4782_v5  ;;  %v4789_v34 = vpop.f32.mrf.mxu1  ;;  %1622 = vmatpush.msra.mxu0 %v711_v17  ;;  %v694_v17 = vld [vmem:[%s7116_s1 + $0x3e8] sm:$0xff] }
  0xde   : > { %7178 = vst [vmem:[#allocation36_spill] sm:$0xff] %v4789_v34  ;;  %v4794_v61 = vpop.f32.mrf.mxu3  ;;  %v4816_v34 = vld [vmem:[%s4199_s30 + $0x111] sm:$0xff]  ;;  %1510 = vmatpush.msra.mxu3 %v694_v17 }
  0xdf   : > { %7184 = vst [vmem:[#allocation42_spill] sm:$0xff] %v4816_v34 }
  0xe0   : > { %v4796_v46 = vpop.f32.mrf.mxu0  ;;  %v4802_v36 = vpop.f32.mrf.mxu2  ;;  %912 = vmatmul.f32.gmra.mxu1 %v4792_v12 }
  0xe1   : > { %7180 = vst [vmem:[#allocation38_spill] sm:$0xff] %v4796_v46 }
  0xe2   : > { %7181 = vst [vmem:[#allocation39_spill] sm:$0xff] %v4802_v36 }
  0xe3   : > { %802 = vmatmul.f32.gmra.mxu0 %v4799_v13  ;;  %1052 = vmatmul.f32.gmra.mxu3 %v374_v49  ;;  %v4828_v49 = vld [vmem:[%s7117_s2] ss:$0 sm:$0xff] }
  0xe5   : > { %1028 = vmatmul.f32.gmra.mxu2 %v4806_v57  ;;  %v4813_v46 = vpop.f32.mrf.mxu1 }
  0xe6   : > { %7183 = vst [vmem:[#allocation41_spill] sm:$0xff] %v4813_v46  ;;  %v4818_v5 = vpop.f32.mrf.mxu3 }
  0xe8   : > { %v4820_v36 = vpop.f32.mrf.mxu0  ;;  %v4822_v12 = vpop.f32.mrf.mxu2  ;;  %915 = vmatmul.f32.gmra.mxu1 %v4816_v34 }
  0xe9   : > { %7185 = vst [vmem:[#allocation43_spill] sm:$0xff] %v4820_v36  ;;  %v807_v36 = vadd.f32 %v4828_v49, %v4551_v53  ;;  %v810_v53 = vadd.f32 %v4828_v49, %v4584_v29  ;;  %v813_v29 = vadd.f32 %v4828_v49, %v4629_v22  ;;  %v816_v22 = vadd.f32 %v4828_v49, %v4677_v54 }
  0xea   : > { %7186 = vst [vmem:[#allocation44_spill] sm:$0xff] %v4822_v12  ;;  %v819_v54 = vadd.f32 %v4828_v49, %v4728_v56  ;;  %v822_v56 = vadd.f32 %v4828_v49, %v4764_v43  ;;  %v825_v43 = vadd.f32 %v4828_v49, %v4794_v61  ;;  %v828_v61 = vadd.f32 %v4828_v49, %v4818_v5 }
  0xeb   : > { %1072 = vmatmul.f32.vlgmr.msrb.gmra.mxu3 %v4258_v60  ;;  %1185 = vmatmul.f32.vlgmr.msrb.gmra.mxu0 %v4270_v63  ;;  %v710_v63 = vld [vmem:[%s7116_s1 + $0x468] sm:$0xff] }
  0xec   : > { %1623 = vmatpush.msra.mxu0 %v710_v63 }
  0xed   : > { %1411 = vmatmul.f32.vlgmr.msrb.gmra.mxu2 %v4294_v8  ;;  %v4838_v12 = vpop.f32.mrf.mxu1 }
  0xee   : > { %v919_v46 = vpop.f32.mrf.mxu3 }
  0xef   : > { %v4840_v57 = vadd.f32 %v919_v46, %v807_v36 }
  0xf0   : > { %v4842_v34 = vpop.f32.mrf.mxu0  ;;  %v4844_v60 = vpop.f32.mrf.mxu2  ;;  %1298 = vmatmul.f32.vlgmr.msrb.gmra.mxu1 %v4263_v62 }
  0xf3   : > { %1075 = vmatmul.f32.gmra.mxu3 %v4274_v0  ;;  %1188 = vmatmul.f32.gmra.mxu0 %v4290_v7  ;;  %v693_v7 = vld [vmem:[%s7116_s1 + $0x3e0] sm:$0xff] }
  0xf4   : > { %1511 = vmatpush.msra.mxu3 %v693_v7 }
  0xf5   : > { %1414 = vmatmul.f32.gmra.mxu2 %v4312_v16  ;;  %v4855_v36 = vpop.f32.mrf.mxu1 }
  0xf6   : > { %v922_v46 = vpop.f32.mrf.mxu3 }
  0xf7   : > { %v4857_v17 = vadd.f32 %v922_v46, %v810_v53 }
  0xf8   : > { %v4859_v62 = vpop.f32.mrf.mxu0  ;;  %v4861_v0 = vpop.f32.mrf.mxu2  ;;  %1301 = vmatmul.f32.gmra.mxu1 %v4280_v3 }
  0xfb   : > { %1078 = vmatmul.f32.gmra.mxu3 %v4294_v8  ;;  %1191 = vmatmul.f32.gmra.mxu0 %v4308_v14  ;;  %v709_v14 = vld [vmem:[%s7116_s1 + $0x460] sm:$0xff] }
  0xfc   : > { %1624 = vmatpush.msra.mxu0 %v709_v14 }
  0xfd   : > { %1417 = vmatmul.f32.gmra.mxu2 %v4329_v4  ;;  %v4872_v63 = vpop.f32.mrf.mxu1 }
  0xfe   : > { %v925_v53 = vpop.f32.mrf.mxu3 }
  0xff   : > { %v4874_v46 = vadd.f32 %v925_v53, %v813_v29 }
 0x100   : > { %v4876_v3 = vpop.f32.mrf.mxu0  ;;  %v4878_v8 = vpop.f32.mrf.mxu2  ;;  %1304 = vmatmul.f32.gmra.mxu1 %v4299_v11 }
 0x103   : > { %1081 = vmatmul.f32.gmra.mxu3 %v4312_v16  ;;  %1194 = vmatmul.f32.gmra.mxu0 %v4325_v2  ;;  %v692_v2 = vld [vmem:[%s7116_s1 + $0x3d8] sm:$0xff] }
 0x104   : > { %1512 = vmatpush.msra.mxu3 %v692_v2 }
 0x105   : > { %1420 = vmatmul.f32.gmra.mxu2 %v4349_v18  ;;  %v4889_v7 = vpop.f32.mrf.mxu1 }
 0x106   : > { %v928_v29 = vpop.f32.mrf.mxu3 }
 0x107   : > { %v4891_v53 = vadd.f32 %v928_v29, %v816_v22 }
 0x108   : > { %v4893_v11 = vpop.f32.mrf.mxu0  ;;  %v4895_v16 = vpop.f32.mrf.mxu2  ;;  %1307 = vmatmul.f32.gmra.mxu1 %v4318_v19 }
 0x10b   : > { %1084 = vmatmul.f32.gmra.mxu3 %v4329_v4  ;;  %1197 = vmatmul.f32.gmra.mxu0 %v4345_v15  ;;  %v708_v15 = vld [vmem:[%s7116_s1 + $0x458] sm:$0xff] }
 0x10c   : > { %1625 = vmatpush.msra.mxu0 %v708_v15 }
 0x10d   : > { %1423 = vmatmul.f32.gmra.mxu2 %v4369_v24  ;;  %v4906_v14 = vpop.f32.mrf.mxu1 }
 0x10e   : > { %v931_v22 = vpop.f32.mrf.mxu3 }
 0x10f   : > { %v4908_v29 = vadd.f32 %v931_v22, %v819_v54 }
 0x110   : > { %v4910_v19 = vpop.f32.mrf.mxu0  ;;  %v4912_v4 = vpop.f32.mrf.mxu2  ;;  %1310 = vmatmul.f32.gmra.mxu1 %v4335_v9 }
 0x113   : > { %1087 = vmatmul.f32.gmra.mxu3 %v4349_v18  ;;  %1200 = vmatmul.f32.gmra.mxu0 %v4365_v23  ;;  %v691_v23 = vld [vmem:[%s7116_s1 + $0x3d0] sm:$0xff] }
 0x114   : > { %1513 = vmatpush.msra.mxu3 %v691_v23 }
 0x115   : > { %1426 = vmatmul.f32.gmra.mxu2 %v4384_v28  ;;  %v4923_v2 = vpop.f32.mrf.mxu1 }
 0x116   : > { %v934_v54 = vpop.f32.mrf.mxu3 }
 0x117   : > { %v4925_v22 = vadd.f32 %v934_v54, %v822_v56 }
 0x118   : > { %v4927_v9 = vpop.f32.mrf.mxu0  ;;  %v4929_v18 = vpop.f32.mrf.mxu2  ;;  %1313 = vmatmul.f32.gmra.mxu1 %v4355_v21 }
 0x11b   : > { %1090 = vmatmul.f32.gmra.mxu3 %v4369_v24  ;;  %1203 = vmatmul.f32.gmra.mxu0 %v4381_v27  ;;  %v707_v27 = vld [vmem:[%s7116_s1 + $0x450] sm:$0xff] }
 0x11c   : > { %1626 = vmatpush.msra.mxu0 %v707_v27 }
 0x11d   : > { %1429 = vmatmul.f32.gmra.mxu2 %v4400_v33  ;;  %v4940_v15 = vpop.f32.mrf.mxu1 }
 0x11e   : > { %v937_v56 = vpop.f32.mrf.mxu3 }
 0x11f   : > { %v4942_v54 = vadd.f32 %v937_v56, %v825_v43 }
 0x120   : > { %v4944_v21 = vpop.f32.mrf.mxu0  ;;  %v4946_v24 = vpop.f32.mrf.mxu2  ;;  %1316 = vmatmul.f32.gmra.mxu1 %v4375_v26 }
 0x123   : > { %1093 = vmatmul.f32.gmra.mxu3 %v4384_v28  ;;  %1206 = vmatmul.f32.gmra.mxu0 %v4397_v32  ;;  %v690_v32 = vld [vmem:[%s7116_s1 + $0x3c8] sm:$0xff] }
 0x124   : > { %1514 = vmatpush.msra.mxu3 %v690_v32 }
 0x125   : > { %1432 = vmatmul.f32.gmra.mxu2 %v4416_v38  ;;  %v4957_v23 = vpop.f32.mrf.mxu1 }
 0x126   : > { %v940_v43 = vpop.f32.mrf.mxu3 }
 0x127   : > { %v4959_v56 = vadd.f32 %v940_v43, %v828_v61 }
 0x128   : > { %v4961_v26 = vpop.f32.mrf.mxu0  ;;  %v4963_v28 = vpop.f32.mrf.mxu2  ;;  %1319 = vmatmul.f32.gmra.mxu1 %v4389_v30 }
 0x12b   : > { %1096 = vmatmul.f32.gmra.mxu3 %v4400_v33  ;;  %1209 = vmatmul.f32.gmra.mxu0 %v4413_v37  ;;  %v706_v33 = vld [vmem:[%s7116_s1 + $0x448] sm:$0xff] }
 0x12c   : > { %1627 = vmatpush.msra.mxu0 %v706_v33 }
 0x12d   : > { %1435 = vmatmul.f32.gmra.mxu2 %v4429_v42  ;;  %v4972_v5 = vpop.f32.mrf.mxu1 }
 0x12e   : > { %v1032_v27 = vpop.f32.mrf.mxu3 }
 0x12f   : > { %v4975_v61 = vadd.f32 %v1032_v27, %v4840_v57 }
 0x130   : > { %v4977_v43 = vpop.f32.mrf.mxu0  ;;  %v4979_v30 = vpop.f32.mrf.mxu2  ;;  %1322 = vmatmul.f32.gmra.mxu1 %v4405_v35 }
 0x131   : > { %7187 = vst [vmem:[#allocation45_spill] sm:$0xff] %v4975_v61 }
 0x133   : > { %1099 = vmatmul.f32.gmra.mxu3 %v4416_v38  ;;  %1212 = vmatmul.f32.gmra.mxu0 %v4426_v41  ;;  %v689_v38 = vld [vmem:[%s7116_s1 + $0x3c0] sm:$0xff] }
 0x134   : > { %1515 = vmatpush.msra.mxu3 %v689_v38 }
 0x135   : > { %1438 = vmatmul.f32.gmra.mxu2 %v4454_v50  ;;  %v4988_v37 = vpop.f32.mrf.mxu1 }
 0x136   : > { %v1035_v57 = vpop.f32.mrf.mxu3 }
 0x137   : > { %v4991_v32 = vadd.f32 %v1035_v57, %v4857_v17 }
 0x138   : > { %v4993_v27 = vpop.f32.mrf.mxu0  ;;  %v4995_v35 = vpop.f32.mrf.mxu2  ;;  %1325 = vmatmul.f32.gmra.mxu1 %v4421_v40 }
 0x139   : > { %7188 = vst [vmem:[#allocation46_spill] sm:$0xff] %v4991_v32  ;;  %v7209_v32 = vld [vmem:[#allocation21_spill] sm:$0xff] }
 0x13b   : > { %1102 = vmatmul.f32.gmra.mxu3 %v4429_v42  ;;  %1215 = vmatmul.f32.gmra.mxu0 %v4448_v48  ;;  %v705_v42 = vld [vmem:[%s7116_s1 + $0x440] sm:$0xff] }
 0x13c   : > { %1628 = vmatpush.msra.mxu0 %v705_v42 }
 0x13d   : > { %1441 = vmatmul.f32.gmra.mxu2 %v4479_v58  ;;  %v5004_v41 = vpop.f32.mrf.mxu1 }
 0x13e   : > { %v1038_v17 = vpop.f32.mrf.mxu3 }
 0x13f   : > { %v5007_v33 = vadd.f32 %v1038_v17, %v4874_v46 }
 0x140   : > { %v5009_v57 = vpop.f32.mrf.mxu0  ;;  %v5011_v40 = vpop.f32.mrf.mxu2  ;;  %1328 = vmatmul.f32.gmra.mxu1 %v4434_v44 }
 0x141   : > { %7189 = vst [vmem:[#allocation47_spill] sm:$0xff] %v5007_v33 }
 0x143   : > { %1105 = vmatmul.f32.gmra.mxu3 %v4454_v50  ;;  %1218 = vmatmul.f32.gmra.mxu0 %v4470_v55  ;;  %v688_v50 = vld [vmem:[%s7116_s1 + $0x3b8] sm:$0xff] }
 0x144   : > { %v2173_v55 = vld [vmem:[%s7118_s3 + $0xf8] sm:$0xff]  ;;  %1516 = vmatpush.msra.mxu3 %v688_v50 }
 0x145   : > { %1444 = vmatmul.f32.gmra.mxu2 %v4504_v6  ;;  %v5020_v48 = vpop.f32.mrf.mxu1  ;;  %v2157_v50 = vld [vmem:[%s7118_s3 + $0x78] sm:$0xff] }
 0x146   : > { %v1041_v46 = vpop.f32.mrf.mxu3  ;;  %2403 = vmatpush.msra.mxu2 %v2173_v55  ;;  %2290 = vmatpush.msra.mxu1 %v2157_v50 }
 0x147   : > { %v5023_v38 = vadd.f32 %v1041_v46, %v4891_v53  ;;  %v704_v46 = vld [vmem:[%s7116_s1 + $0x438] sm:$0xff] }
 0x148   : > { %v5025_v17 = vpop.f32.mrf.mxu0  ;;  %v5027_v44 = vpop.f32.mrf.mxu2  ;;  %1331 = vmatmul.f32.gmra.mxu1 %v4459_v52  ;;  %1629 = vmatpush.msra.mxu0 %v704_v46 }
 0x149   : > { %7190 = vst [vmem:[#allocation48_spill] sm:$0xff] %v5023_v38  ;;  %v7205_v38 = vld [vmem:[#allocation4_spill] sm:$0xff] }
 0x14b   : > { %1108 = vmatmul.f32.gmra.mxu3 %v4479_v58  ;;  %1221 = vmatmul.f32.gmra.mxu0 %v4495_v10 }
 0x14d   : > { %1447 = vmatmul.f32.gmra.mxu2 %v4531_v39  ;;  %v5039_v53 = vpop.f32.mrf.mxu1 }
 0x14e   : > { %v1044_v42 = vpop.f32.mrf.mxu3 }
 0x14f   : > { %v5042_v52 = vadd.f32 %v1044_v42, %v4908_v29  ;;  %v687_v42 = vld [vmem:[%s7116_s1 + $0x3b0] sm:$0xff] }
 0x150   : > { %v5044_v58 = vpop.f32.mrf.mxu0  ;;  %v5046_v10 = vpop.f32.mrf.mxu2  ;;  %1334 = vmatmul.f32.gmra.mxu1 %v4487_v1  ;;  %1517 = vmatpush.msra.mxu3 %v687_v42  ;;  %v2156_v42 = vld [vmem:[%s7118_s3 + $0x70] sm:$0xff] }
 0x151   : > { %7191 = vst [vmem:[#allocation49_spill] sm:$0xff] %v5042_v52  ;;  %2291 = vmatpush.msra.mxu1 %v2156_v42  ;;  %v7204_v52 = vld [vmem:[#allocation7_spill] sm:$0xff]  ;;  %v686_v42 = vld [vmem:[%s7116_s1 + $0x3a8] sm:$0xff] }
 0x152   : > { %1518 = vmatpush.msra.mxu3 %v686_v42  ;;  %v7211_v42 = vld [vmem:[#allocation8_spill] sm:$0xff] }
 0x153   : > { %1111 = vmatmul.f32.gmra.mxu3 %v4504_v6  ;;  %1224 = vmatmul.f32.gmra.mxu0 %v4523_v31 }
 0x155   : > { %1450 = vmatmul.f32.gmra.mxu2 %v4562_v59  ;;  %v5058_v29 = vpop.f32.mrf.mxu1 }
 0x156   : > { %v1047_v55 = vpop.f32.mrf.mxu3 }
 0x157   : > { %v5061_v1 = vadd.f32 %v1047_v55, %v4925_v22  ;;  %v2172_v22 = vld [vmem:[%s7118_s3 + $0xf0] sm:$0xff] }
 0x158   : > { %v5063_v6 = vpop.f32.mrf.mxu0  ;;  %v5065_v31 = vpop.f32.mrf.mxu2  ;;  %1337 = vmatmul.f32.gmra.mxu1 %v4509_v20  ;;  %2404 = vmatpush.msra.mxu2 %v2172_v22  ;;  %v703_v55 = vld [vmem:[%s7116_s1 + $0x430] sm:$0xff] }
 0x159   : > { %7192 = vst [vmem:[#allocation50_spill] sm:$0xff] %v5061_v1  ;;  %1630 = vmatpush.msra.mxu0 %v703_v55  ;;  %v7206_v55 = vld [vmem:[#allocation13_spill] sm:$0xff] }
 0x15a   : > { %7193 = vst [vmem:[#allocation51_spill] sm:$0xff] %v5063_v6 }
 0x15b   : > { %7194 = vst [vmem:[#allocation52_spill] sm:$0xff] %v5065_v31  ;;  %1114 = vmatmul.f32.gmra.mxu3 %v4531_v39  ;;  %1227 = vmatmul.f32.gmra.mxu0 %v4549_v51 }
 0x15d   : > { %1453 = vmatmul.f32.gmra.mxu2 %v4595_v47  ;;  %v5074_v46 = vpop.f32.mrf.mxu1 }
 0x15e   : > { %7195 = vst [vmem:[#allocation53_spill] sm:$0xff] %v5074_v46  ;;  %v1050_v50 = vpop.f32.mrf.mxu3  ;;  %v7218_v46 = vld [vmem:[#allocation12_spill] sm:$0xff] }
 0x15f   : > { %v5080_v20 = vadd.f32 %v1050_v50, %v4942_v54  ;;  %v7199_v54 = vld [vmem:[#allocation3_spill] sm:$0xff] }
 0x160   : > { %v5082_v39 = vpop.f32.mrf.mxu0  ;;  %v5084_v51 = vpop.f32.mrf.mxu2  ;;  %1340 = vmatmul.f32.gmra.mxu1 %v4536_v45  ;;  %v735_v22 = vadd.f32 %v4828_v49, %v7199_v54  ;;  %v7200_v50 = vld [vmem:[#allocation15_spill] sm:$0xff]  ;;  %v7207_v54 = vld [vmem:[#allocation5_spill] sm:$0xff] }
 0x161   : > { %7196 = vst [vmem:[#allocation54_spill] sm:$0xff] %v5080_v20 }
 0x162   : > { %7197 = vst [vmem:[#allocation55_spill] sm:$0xff] %v5082_v39  ;;  %v848_v33 = vadd.f32 %v7205_v38, %v735_v22  ;;  %v2171_v38 = vld [vmem:[%s7118_s3 + $0xe8] sm:$0xff]  ;;  %v7217_v39 = vld [vmem:[#allocation17_spill] sm:$0xff] }
 0x163   : > { %7198 = vst [vmem:[#allocation56_spill] sm:$0xff] %v5084_v51  ;;  %1117 = vmatmul.f32.gmra.mxu3 %v4562_v59  ;;  %1230 = vmatmul.f32.gmra.mxu0 %v4582_v25 }
 0x164   : > { %2405 = vmatpush.msra.mxu2 %v2171_v38  ;;  %v7213_v38 = vld [vmem:[#allocation9_spill] sm:$0xff] }
 0x165   : > { %1456 = vmatmul.f32.gmra.mxu2 %v7200_v50  ;;  %v5098_v45 = vpop.f32.mrf.mxu1 }
 0x166   : > { %7201 = vst [vmem:[#allocation3_spill] sm:$0xff] %v5098_v45  ;;  %v1053_v59 = vpop.f32.mrf.mxu3 }
 0x167   : > { %v5101_v25 = vadd.f32 %v1053_v59, %v4959_v56  ;;  %v738_v56 = vadd.f32 %v4828_v49, %v7207_v54  ;;  %v7208_v59 = vld [vmem:[#allocation6_spill] sm:$0xff] }
 0x168   : > { %v1186_v20 = vpop.f32.mrf.mxu0  ;;  %v5103_v1 = vpop.f32.mrf.mxu2  ;;  %1343 = vmatmul.f32.gmra.mxu1 %v7204_v52 }
 0x169   : > { %7202 = vst [vmem:[#allocation15_spill] sm:$0xff] %v5101_v25  ;;  %v961_v25 = vadd.f32 %v7208_v59, %v848_v33  ;;  %v851_v45 = vadd.f32 %v7211_v42, %v738_v56  ;;  %v7212_v33 = vld [vmem:[#allocation19_spill] sm:$0xff]  ;;  %v702_v59 = vld [vmem:[%s7116_s1 + $0x428] sm:$0xff] }
 0x16a   : > { %7203 = vst [vmem:[#allocation57_spill] sm:$0xff] %v5103_v1  ;;  %v7210_v1 = vld [vmem:[#allocation11_spill] sm:$0xff]  ;;  %1631 = vmatpush.msra.mxu0 %v702_v59  ;;  %v7214_v56 = vld [vmem:[#allocation10_spill] sm:$0xff] }
 0x16b   : > { %1120 = vmatmul.f32.gmra.mxu3 %v4595_v47  ;;  %1233 = vmatmul.f32.gmra.mxu0 %v7206_v55 }
 0x16d   : > { %1459 = vmatmul.f32.gmra.mxu2 %v7209_v32  ;;  %v1299_v61 = vpop.f32.mrf.mxu1 }
 0x16e   : > { %v1073_v47 = vpop.f32.mrf.mxu3 }
 0x16f   : > { %v1074_v52 = vadd.f32 %v1073_v47, %v961_v25  ;;  %v2155_v25 = vld [vmem:[%s7118_s3 + $0x68] sm:$0xff] }
 0x170   : > { %v1189_v22 = vpop.f32.mrf.mxu0  ;;  %v1412_v55 = vpop.f32.mrf.mxu2  ;;  %1346 = vmatmul.f32.gmra.mxu1 %v7210_v1  ;;  %v741_v1 = vadd.f32 %v4828_v49, %v7213_v38  ;;  %v7219_v38 = vld [vmem:[#allocation25_spill] sm:$0xff] }
 0x171   : > { %v1187_v51 = vadd.f32 %v1186_v20, %v1074_v52  ;;  %2292 = vmatpush.msra.mxu1 %v2155_v25  ;;  %v964_v20 = vadd.f32 %v7214_v56, %v851_v45  ;;  %v685_v45 = vld [vmem:[%s7116_s1 + $0x3a0] sm:$0xff]  ;;  %v7221_v56 = vld [vmem:[#allocation16_spill] sm:$0xff] }
 0x172   : > { %v854_v31 = vadd.f32 %v7218_v46, %v741_v1  ;;  %1519 = vmatpush.msra.mxu3 %v685_v45 }
 0x173   : > { %v1300_v54 = vadd.f32 %v1299_v61, %v1187_v51  ;;  %1123 = vmatmul.f32.gmra.mxu3 %v7200_v50  ;;  %1236 = vmatmul.f32.gmra.mxu0 %v7212_v33  ;;  %v7216_v51 = vld [vmem:[#allocation27_spill] sm:$0xff] }
 0x175   : > { %v5132_v61 = vadd.f32 %v1412_v55, %v1300_v54  ;;  %1462 = vmatmul.f32.gmra.mxu2 %v7216_v51  ;;  %v1302_v50 = vpop.f32.mrf.mxu1  ;;  %v7220_v55 = vld [vmem:[#allocation14_spill] sm:$0xff] }
 0x176   : > { %v1076_v47 = vpop.f32.mrf.mxu3  ;;  %v744_v54 = vadd.f32 %v4828_v49, %v7220_v55 }
 0x177   : > { %7215 = vst [vmem:[#allocation7_spill] sm:$0xff] %v5132_v61  ;;  %v1077_v52 = vadd.f32 %v1076_v47, %v964_v20  ;;  %v967_v20 = vadd.f32 %v7221_v56, %v854_v31  ;;  %v2154_v56 = vld [vmem:[%s7118_s3 + $0x60] sm:$0xff] }
 0x178   : > { %v1192_v42 = vpop.f32.mrf.mxu0  ;;  %v1415_v33 = vpop.f32.mrf.mxu2  ;;  %1349 = vmatmul.f32.gmra.mxu1 %v7217_v39  ;;  %v7223_v39 = vld [vmem:[#allocation33_spill] sm:$0xff] }
 0x179   : > { %v1190_v59 = vadd.f32 %v1189_v22, %v1077_v52  ;;  %2293 = vmatpush.msra.mxu1 %v2154_v56  ;;  %v3747_v56 = vld [vmem:[%s4199_s30 + $0x120] sm:$0xff] }
 0x17b   : > { %v1303_v25 = vadd.f32 %v1302_v50, %v1190_v59  ;;  %1126 = vmatmul.f32.gmra.mxu3 %v7209_v32  ;;  %1239 = vmatmul.f32.gmra.mxu0 %v7219_v38  ;;  %v2170_v32 = vld [vmem:[%s7118_s3 + $0xe0] sm:$0xff]  ;;  %v7224_v59 = vld [vmem:[#allocation23_spill] sm:$0xff]  ;;  %v7225_v38 = vld [vmem:[#allocation18_spill] sm:$0xff] }
 0x17c   : > { %2406 = vmatpush.msra.mxu2 %v2170_v32  ;;  %v857_v45 = vadd.f32 %v7225_v38, %v744_v54 }
 0x17d   : > { %v5145_v47 = vadd.f32 %v1415_v33, %v1303_v25  ;;  %1465 = vmatmul.f32.gmra.mxu2 %v7223_v39  ;;  %v1305_v46 = vpop.f32.mrf.mxu1  ;;  %v7226_v33 = vld [vmem:[#allocation31_spill] sm:$0xff]  ;;  %v701_v25 = vld [vmem:[%s7116_s1 + $0x420] sm:$0xff] }
 0x17e   : > { %v1079_v22 = vpop.f32.mrf.mxu3  ;;  %1632 = vmatpush.msra.mxu0 %v701_v25 }
 0x17f   : > { %7222 = vst [vmem:[#allocation4_spill] sm:$0xff] %v5145_v47  ;;  %v1080_v1 = vadd.f32 %v1079_v22, %v967_v20  ;;  %v7227_v20 = vld [vmem:[#allocation20_spill] sm:$0xff] }
 0x180   : > { %v1195_v50 = vpop.f32.mrf.mxu0  ;;  %v1418_v52 = vpop.f32.mrf.mxu2  ;;  %1352 = vmatmul.f32.gmra.mxu1 %v7224_v59  ;;  %v747_v54 = vadd.f32 %v4828_v49, %v7227_v20  ;;  %v7232_v20 = vld [vmem:[#allocation37_spill] sm:$0xff] }
 0x181   : > { %v1193_v55 = vadd.f32 %v1192_v42, %v1080_v1  ;;  %v7228_v42 = vld [vmem:[#allocation22_spill] sm:$0xff] }
 0x183   : > { %v1306_v31 = vadd.f32 %v1305_v46, %v1193_v55  ;;  %1129 = vmatmul.f32.gmra.mxu3 %v7216_v51  ;;  %1242 = vmatmul.f32.gmra.mxu0 %v7226_v33  ;;  %v970_v46 = vadd.f32 %v7228_v42, %v857_v45  ;;  %v7230_v55 = vld [vmem:[#allocation29_spill] sm:$0xff]  ;;  %v7231_v33 = vld [vmem:[#allocation24_spill] sm:$0xff]  ;;  %v7233_v45 = vld [vmem:[#allocation26_spill] sm:$0xff] }
 0x184   : > { %v860_v47 = vadd.f32 %v7231_v33, %v747_v54  ;;  %v7234_v42 = vld [vmem:[#allocation28_spill] sm:$0xff]  ;;  %v7236_v33 = vld [vmem:[#allocation35_spill] sm:$0xff] }
 0x185   : > { %v5164_v32 = vadd.f32 %v1418_v52, %v1306_v31  ;;  %1468 = vmatmul.f32.gmra.mxu2 %v4799_v13  ;;  %v1308_v51 = vpop.f32.mrf.mxu1  ;;  %v684_v52 = vld [vmem:[%s7116_s1 + $0x398] sm:$0xff]  ;;  %v750_v31 = vadd.f32 %v4828_v49, %v7233_v45  ;;  %v3748_v45 = vld [vmem:[%s4199_s30 + $0x128] sm:$0xff] }
 0x186   : > { %v1082_v22 = vpop.f32.mrf.mxu3  ;;  %1520 = vmatpush.msra.mxu3 %v684_v52 }
 0x187   : > { %7229 = vst [vmem:[#allocation13_spill] sm:$0xff] %v5164_v32  ;;  %v1083_v1 = vadd.f32 %v1082_v22, %v970_v46  ;;  %v973_v46 = vadd.f32 %v7234_v42, %v860_v47  ;;  %v7238_v47 = vld [vmem:[#allocation42_spill] sm:$0xff]  ;;  %v2153_v42 = vld [vmem:[%s7118_s3 + $0x58] sm:$0xff] }
 0x188   : > { %v1198_v59 = vpop.f32.mrf.mxu0  ;;  %v1421_v38 = vpop.f32.mrf.mxu2  ;;  %1355 = vmatmul.f32.gmra.mxu1 %v7230_v55  ;;  %v3749_v32 = vld [vmem:[%s4199_s30 + $0x138] sm:$0xff] }
 0x189   : > { %v1196_v25 = vadd.f32 %v1195_v50, %v1083_v1  ;;  %2294 = vmatpush.msra.mxu1 %v2153_v42 }
 0x18b   : > { %v1309_v61 = vadd.f32 %v1308_v51, %v1196_v25  ;;  %1132 = vmatmul.f32.gmra.mxu3 %v7223_v39  ;;  %1245 = vmatmul.f32.gmra.mxu0 %v7232_v20  ;;  %v2169_v39 = vld [vmem:[%s7118_s3 + $0xd8] sm:$0xff]  ;;  %v7237_v25 = vld [vmem:[#allocation30_spill] sm:$0xff] }
 0x18c   : > { %2407 = vmatpush.msra.mxu2 %v2169_v39  ;;  %v863_v20 = vadd.f32 %v7237_v25, %v750_v31  ;;  %v7239_v31 = vld [vmem:[#allocation32_spill] sm:$0xff]  ;;  %v3685_v25 = vld [vmem:[%s4199_s30 + $0x121] sm:$0xff] }
 0x18d   : > { %v5178_v22 = vadd.f32 %v1421_v38, %v1309_v61  ;;  %1471 = vmatmul.f32.gmra.mxu2 %v3747_v56  ;;  %v1311_v50 = vpop.f32.mrf.mxu1  ;;  %v700_v38 = vld [vmem:[%s7116_s1 + $0x418] sm:$0xff] }
 0x18e   : > { %v1085_v54 = vpop.f32.mrf.mxu3  ;;  %1633 = vmatpush.msra.mxu0 %v700_v38 }
 0x18f   : > { %7235 = vst [vmem:[#allocation5_spill] sm:$0xff] %v5178_v22  ;;  %v1086_v51 = vadd.f32 %v1085_v54, %v973_v46  ;;  %v7240_v46 = vld [vmem:[#allocation34_spill] sm:$0xff]  ;;  %v7242_v22 = vld [vmem:[#allocation36_spill] sm:$0xff] }
 0x190   : > { %v1201_v1 = vpop.f32.mrf.mxu0  ;;  %v1424_v55 = vpop.f32.mrf.mxu2  ;;  %1358 = vmatmul.f32.gmra.mxu1 %v7236_v33 }
 0x191   : > { %v1199_v52 = vadd.f32 %v1198_v59, %v1086_v51  ;;  %v753_v59 = vadd.f32 %v4828_v49, %v7239_v31  ;;  %v7244_v31 = vld [vmem:[#allocation39_spill] sm:$0xff] }
 0x193   : > { %v1312_v61 = vadd.f32 %v1311_v50, %v1199_v52  ;;  %1135 = vmatmul.f32.gmra.mxu3 %v4799_v13  ;;  %1248 = vmatmul.f32.gmra.mxu0 %v7238_v47  ;;  %v976_v50 = vadd.f32 %v7240_v46, %v863_v20  ;;  %v7241_v47 = vld [vmem:[#allocation40_spill] sm:$0xff]  ;;  %v866_v38 = vadd.f32 %v7242_v22, %v753_v59  ;;  %v7243_v20 = vld [vmem:[#allocation38_spill] sm:$0xff] }
 0x194   : > { %v3717_v22 = vld [vmem:[%s4199_s30 + $0x122] sm:$0xff] }
 0x195   : > { %v5197_v39 = vadd.f32 %v1424_v55, %v1312_v61  ;;  %1474 = vmatmul.f32.gmra.mxu2 %v3748_v45  ;;  %v1314_v13 = vpop.f32.mrf.mxu1  ;;  %v683_v55 = vld [vmem:[%s7116_s1 + $0x390] sm:$0xff]  ;;  %v756_v61 = vadd.f32 %v4828_v49, %v7243_v20  ;;  %v979_v46 = vadd.f32 %v7244_v31, %v866_v38 }
 0x196   : > { %v1088_v54 = vpop.f32.mrf.mxu3  ;;  %1521 = vmatpush.msra.mxu3 %v683_v55  ;;  %v699_v55 = vld [vmem:[%s7116_s1 + $0x410] sm:$0xff] }
 0x197   : > { %v1089_v51 = vadd.f32 %v1088_v54, %v976_v50  ;;  %v2152_v20 = vld [vmem:[%s7118_s3 + $0x50] sm:$0xff]  ;;  %1634 = vmatpush.msra.mxu0 %v699_v55 }
 0x198   : > { %v1204_v33 = vpop.f32.mrf.mxu0  ;;  %v1427_v52 = vpop.f32.mrf.mxu2  ;;  %1361 = vmatmul.f32.gmra.mxu1 %v7241_v47  ;;  %v7245_v47 = vld [vmem:[#allocation41_spill] sm:$0xff]  ;;  %v7246_v31 = vld [vmem:[#allocation43_spill] sm:$0xff] }
 0x199   : > { %v1202_v42 = vadd.f32 %v1201_v1, %v1089_v51  ;;  %v3686_v51 = vld [vmem:[%s4199_s30 + $0x129] sm:$0xff]  ;;  %2295 = vmatpush.msra.mxu1 %v2152_v20 }
 0x19a   : > { %v3751_v20 = vld [vmem:[%s4199_s30 + $0x150] sm:$0xff] }
 0x19b   : > { %v1315_v6 = vadd.f32 %v1314_v13, %v1202_v42  ;;  %1138 = vmatmul.f32.gmra.mxu3 %v3747_v56  ;;  %1251 = vmatmul.f32.gmra.mxu0 %v3685_v25  ;;  %v2168_v56 = vld [vmem:[%s7118_s3 + $0xd0] sm:$0xff]  ;;  %v869_v42 = vadd.f32 %v7245_v47, %v756_v61  ;;  %v759_v61 = vadd.f32 %v4828_v49, %v7246_v31 }
 0x19c   : > { %2408 = vmatpush.msra.mxu2 %v2168_v56 }
 0x19d   : > { %v5209_v50 = vadd.f32 %v1427_v52, %v1315_v6  ;;  %1477 = vmatmul.f32.gmra.mxu2 %v3749_v32  ;;  %v1317_v59 = vpop.f32.mrf.mxu1  ;;  %v3750_v6 = vld [vmem:[%s4199_s30 + $0x140] sm:$0xff]  ;;  %v872_v47 = vadd.f32 %v4838_v12, %v759_v61 }
 0x19e   : > { %v1091_v1 = vpop.f32.mrf.mxu3  ;;  %v3719_v12 = vld [vmem:[%s4199_s30 + $0x13a] sm:$0xff] }
 0x19f   : > { %v1092_v13 = vadd.f32 %v1091_v1, %v979_v46 }
 0x1a0   : > { %v1207_v54 = vpop.f32.mrf.mxu0  ;;  %v1430_v25 = vpop.f32.mrf.mxu2  ;;  %1364 = vmatmul.f32.gmra.mxu1 %v3717_v22 }
 0x1a1   : > { %v1205_v38 = vadd.f32 %v1204_v33, %v1092_v13  ;;  %v7247_v33 = vld [vmem:[#allocation44_spill] sm:$0xff] }
 0x1a2   : > { %v982_v46 = vadd.f32 %v7247_v33, %v869_v42  ;;  %v762_v42 = vadd.f32 %v4828_v49, %v4842_v34 }
 0x1a3   : > { %v1318_v52 = vadd.f32 %v1317_v59, %v1205_v38  ;;  %1141 = vmatmul.f32.gmra.mxu3 %v3748_v45  ;;  %1254 = vmatmul.f32.gmra.mxu0 %v3686_v51  ;;  %v3718_v45 = vld [vmem:[%s4199_s30 + $0x12a] sm:$0xff]  ;;  %v3687_v51 = vld [vmem:[%s4199_s30 + $0x139] sm:$0xff] }
 0x1a5   : > { %v5227_v22 = vadd.f32 %v1430_v25, %v1318_v52  ;;  %1480 = vmatmul.f32.gmra.mxu2 %v3750_v6  ;;  %v1320_v13 = vpop.f32.mrf.mxu1  ;;  %v682_v25 = vld [vmem:[%s7116_s1 + $0x388] sm:$0xff]  ;;  %v985_v52 = vadd.f32 %v4844_v60, %v872_v47  ;;  %v3752_v60 = vld [vmem:[%s4199_s30 + $0x158] sm:$0xff] }
 0x1a6   : > { %v1094_v56 = vpop.f32.mrf.mxu3  ;;  %1522 = vmatpush.msra.mxu3 %v682_v25 }
 0x1a7   : > { %v1095_v1 = vadd.f32 %v1094_v56, %v982_v46  ;;  %v875_v56 = vadd.f32 %v4855_v36, %v762_v42  ;;  %v765_v36 = vadd.f32 %v4828_v49, %v4859_v62  ;;  %v3753_v42 = vld [vmem:[%s4199_s30 + $0x168] sm:$0xff]  ;;  %v681_v62 = vld [vmem:[%s7116_s1 + $0x380] sm:$0xff] }
 0x1a8   : > { %v1210_v59 = vpop.f32.mrf.mxu0  ;;  %1367 = vmatmul.f32.gmra.mxu1 %v3718_v45  ;;  %v1433_v55 = vpop.f32.mrf.mxu2  ;;  %v3688_v45 = vld [vmem:[%s4199_s30 + $0x141] sm:$0xff]  ;;  %1523 = vmatpush.msra.mxu3 %v681_v62 }
 0x1a9   : > { %v1208_v38 = vadd.f32 %v1207_v54, %v1095_v1  ;;  %v698_v1 = vld [vmem:[%s7116_s1 + $0x408] sm:$0xff] }
 0x1aa   : > { %1635 = vmatpush.msra.mxu0 %v698_v1 }
 0x1ab   : > { %v1321_v31 = vadd.f32 %v1320_v13, %v1208_v38  ;;  %1144 = vmatmul.f32.gmra.mxu3 %v3749_v32  ;;  %1257 = vmatmul.f32.gmra.mxu0 %v3687_v51  ;;  %v2167_v32 = vld [vmem:[%s7118_s3 + $0xc8] sm:$0xff] }
 0x1ac   : > { %2409 = vmatpush.msra.mxu2 %v2167_v32  ;;  %v2151_v13 = vld [vmem:[%s7118_s3 + $0x48] sm:$0xff] }
 0x1ad   : > { %v5239_v33 = vadd.f32 %v1433_v55, %v1321_v31  ;;  %1483 = vmatmul.f32.gmra.mxu2 %v3751_v20  ;;  %2296 = vmatpush.msra.mxu1 %v2151_v13  ;;  %v3720_v51 = vld [vmem:[%s4199_s30 + $0x142] sm:$0xff]  ;;  %v3689_v55 = vld [vmem:[%s4199_s30 + $0x151] sm:$0xff]  ;;  %v878_v31 = vadd.f32 %v4872_v63, %v765_v36 }
 0x1ae   : > { %v1097_v54 = vpop.f32.mrf.mxu3  ;;  %v2166_v63 = vld [vmem:[%s7118_s3 + $0xc0] sm:$0xff] }
 0x1af   : > { %v1098_v61 = vadd.f32 %v1097_v54, %v985_v52  ;;  %v991_v52 = vadd.f32 %v4878_v8, %v878_v31  ;;  %2410 = vmatpush.msra.mxu2 %v2166_v63  ;;  %v697_v8 = vld [vmem:[%s7116_s1 + $0x400] sm:$0xff]  ;;  %v2165_v31 = vld [vmem:[%s7118_s3 + $0xb8] sm:$0xff]  ;;  %v777_v63 = vadd.f32 %v4828_v49, %v4927_v9  ;;  %v780_v9 = vadd.f32 %v4828_v49, %v4944_v21 }
 0x1b0   : > { %v1213_v46 = vpop.f32.mrf.mxu0  ;;  %1370 = vmatmul.f32.gmra.mxu1 %v3719_v12  ;;  %v3721_v12 = vld [vmem:[%s4199_s30 + $0x152] sm:$0xff]  ;;  %1636 = vmatpush.msra.mxu0 %v697_v8 }
 0x1b1   : > { %v5247_v34 = vadd.f32 %v1210_v59, %v1098_v61  ;;  %v988_v59 = vadd.f32 %v4861_v0, %v875_v56  ;;  %v768_v0 = vadd.f32 %v4828_v49, %v4876_v3  ;;  %v3690_v61 = vld [vmem:[%s4199_s30 + $0x159] sm:$0xff]  ;;  %v3754_v3 = vld [vmem:[%s4199_s30 + $0x170] sm:$0xff]  ;;  %2411 = vmatpush.msra.mxu2 %v2165_v31 }
 0x1b2   : > { %v2150_v56 = vld [vmem:[%s7118_s3 + $0x40] sm:$0xff]  ;;  %v3759_v31 = vld [vmem:[%s4199_s30 + $0x31] sm:$0xff] }
 0x1b3   : > { %1147 = vmatmul.f32.gmra.mxu3 %v3750_v6  ;;  %1260 = vmatmul.f32.gmra.mxu0 %v3688_v45 }
 0x1b4   : > { %2297 = vmatpush.msra.mxu1 %v2150_v56  ;;  %v3757_v56 = vld [vmem:[%s4199_s30 + $0x198] sm:$0xff] }
 0x1b5   : > { %1486 = vmatmul.f32.gmra.mxu2 %v3752_v60 }
 0x1b6   : > { %v1100_v6 = vpop.f32.mrf.mxu3 }
 0x1b7   : > { %v1101_v47 = vadd.f32 %v1100_v6, %v988_v59 }
 0x1b8   : > { %v1216_v38 = vpop.f32.mrf.mxu0  ;;  %1373 = vmatmul.f32.gmra.mxu1 %v3720_v51  ;;  %v3691_v51 = vld [vmem:[%s4199_s30 + $0x169] sm:$0xff] }
 0x1b9   : > { %v5262_v25 = vadd.f32 %v1213_v46, %v1101_v47  ;;  %v881_v46 = vadd.f32 %v4889_v7, %v768_v0  ;;  %v771_v7 = vadd.f32 %v4828_v49, %v4893_v11  ;;  %v774_v11 = vadd.f32 %v4828_v49, %v4910_v19  ;;  %v3756_v19 = vld [vmem:[%s4199_s30 + $0x188] sm:$0xff] }
 0x1bb   : > { %1150 = vmatmul.f32.gmra.mxu3 %v3751_v20  ;;  %1263 = vmatmul.f32.gmra.mxu0 %v3689_v55  ;;  %v994_v1 = vadd.f32 %v4895_v16, %v881_v46  ;;  %v884_v6 = vadd.f32 %v4906_v14, %v771_v7  ;;  %v3723_v55 = vld [vmem:[%s4199_s30 + $0x16a] sm:$0xff]  ;;  %v3693_v46 = vld [vmem:[%s4199_s30 + $0x181] sm:$0xff] }
 0x1bc   : > { %v3725_v7 = vld [vmem:[%s4199_s30 + $0x182] sm:$0xff] }
 0x1bd   : > { %1489 = vmatmul.f32.gmra.mxu2 %v3753_v42  ;;  %v997_v16 = vadd.f32 %v4912_v4, %v884_v6  ;;  %v2149_v4 = vld [vmem:[%s7118_s3 + $0x38] sm:$0xff]  ;;  %v783_v6 = vadd.f32 %v4828_v49, %v4961_v26  ;;  %v786_v26 = vadd.f32 %v4828_v49, %v4977_v43  ;;  %v2147_v43 = vld [vmem:[%s7118_s3 + $0x28] sm:$0xff] }
 0x1be   : > { %v1103_v32 = vpop.f32.mrf.mxu3  ;;  %2298 = vmatpush.msra.mxu1 %v2149_v4 }
 0x1bf   : > { %v1104_v20 = vadd.f32 %v1103_v32, %v991_v52  ;;  %v3692_v52 = vld [vmem:[%s4199_s30 + $0x171] sm:$0xff] }
 0x1c0   : > { %v1219_v54 = vpop.f32.mrf.mxu0  ;;  %1376 = vmatmul.f32.gmra.mxu1 %v3721_v12 }
 0x1c1   : > { %v5277_v45 = vadd.f32 %v1216_v38, %v1104_v20  ;;  %v3755_v38 = vld [vmem:[%s4199_s30 + $0x180] sm:$0xff]  ;;  %v3724_v20 = vld [vmem:[%s4199_s30 + $0x172] sm:$0xff] }
 0x1c3   : > { %1153 = vmatmul.f32.gmra.mxu3 %v3752_v60  ;;  %1266 = vmatmul.f32.gmra.mxu0 %v3690_v61  ;;  %v3722_v60 = vld [vmem:[%s4199_s30 + $0x15a] sm:$0xff] }
 0x1c5   : > { %1492 = vmatmul.f32.gmra.mxu2 %v3754_v3 }
 0x1c6   : > { %v1106_v13 = vpop.f32.mrf.mxu3 }
 0x1c7   : > { %v1107_v36 = vadd.f32 %v1106_v13, %v994_v1  ;;  %v2164_v1 = vld [vmem:[%s7118_s3 + $0xb0] sm:$0xff] }
 0x1c8   : > { %v1222_v59 = vpop.f32.mrf.mxu0  ;;  %1379 = vmatmul.f32.gmra.mxu1 %v3722_v60  ;;  %2412 = vmatpush.msra.mxu2 %v2164_v1  ;;  %v2162_v1 = vld [vmem:[%s7118_s3 + $0xa0] sm:$0xff] }
 0x1c9   : > { %v5292_v47 = vadd.f32 %v1219_v54, %v1107_v36  ;;  %v3694_v36 = vld [vmem:[%s4199_s30 + $0x189] sm:$0xff] }
 0x1cb   : > { %1156 = vmatmul.f32.gmra.mxu3 %v3753_v42  ;;  %1269 = vmatmul.f32.gmra.mxu0 %v3691_v51  ;;  %v887_v42 = vadd.f32 %v4923_v2, %v774_v11  ;;  %v2148_v51 = vld [vmem:[%s7118_s3 + $0x30] sm:$0xff] }
 0x1cc   : > { %2299 = vmatpush.msra.mxu1 %v2148_v51  ;;  %v3726_v11 = vld [vmem:[%s4199_s30 + $0x18a] sm:$0xff] }
 0x1cd   : > { %1495 = vmatmul.f32.gmra.mxu2 %v3755_v38  ;;  %v1000_v32 = vadd.f32 %v4929_v18, %v887_v42 }
 0x1ce   : > { %v1109_v62 = vpop.f32.mrf.mxu3  ;;  %2300 = vmatpush.msra.mxu1 %v2147_v43 }
 0x1cf   : > { %v1110_v14 = vadd.f32 %v1109_v62, %v997_v16  ;;  %v3791_v62 = vld [vmem:[%s4199_s30 + $0x32] sm:$0xff] }
 0x1d0   : > { %v1225_v0 = vpop.f32.mrf.mxu0  ;;  %1382 = vmatmul.f32.gmra.mxu1 %v3723_v55 }
 0x1d1   : > { %v5304_v12 = vadd.f32 %v1222_v59, %v1110_v14  ;;  %v893_v59 = vadd.f32 %v4957_v23, %v780_v9  ;;  %v896_v14 = vadd.f32 %v4972_v5, %v783_v6  ;;  %v3760_v5 = vld [vmem:[%s4199_s30 + $0x39] sm:$0xff] }
 0x1d3   : > { %1159 = vmatmul.f32.gmra.mxu3 %v3754_v3  ;;  %1272 = vmatmul.f32.gmra.mxu0 %v3692_v52  ;;  %v890_v3 = vadd.f32 %v4940_v15, %v777_v63  ;;  %v2163_v52 = vld [vmem:[%s7118_s3 + $0xa8] sm:$0xff]  ;;  %v3792_v63 = vld [vmem:[%s4199_s30 + $0x3a] sm:$0xff] }
 0x1d4   : > { %2413 = vmatpush.msra.mxu2 %v2163_v52 }
 0x1d5   : > { %1498 = vmatmul.f32.gmra.mxu2 %v3756_v19  ;;  %v1003_v18 = vadd.f32 %v4946_v24, %v890_v3  ;;  %v3758_v24 = vld [vmem:[%s4199_s30 + $0x1a0] sm:$0xff] }
 0x1d6   : > { %v1112_v2 = vpop.f32.mrf.mxu3  ;;  %2414 = vmatpush.msra.mxu2 %v2162_v1  ;;  %v7251_v1 = vld [vmem:[#allocation55_spill] sm:$0xff] }
 0x1d7   : > { %v1113_v54 = vadd.f32 %v1112_v2, %v1000_v32  ;;  %v899_v32 = vadd.f32 %v4988_v37, %v786_v26  ;;  %v3761_v37 = vld [vmem:[%s4199_s30 + $0x49] sm:$0xff] }
 0x1d8   : > { %v1228_v61 = vpop.f32.mrf.mxu0  ;;  %1385 = vmatmul.f32.gmra.mxu1 %v3724_v20 }
 0x1d9   : > { %v5316_v8 = vadd.f32 %v1225_v0, %v1113_v54  ;;  %v1012_v2 = vadd.f32 %v4995_v35, %v899_v32  ;;  %v5360_v54 = vpop.f32.mrf.mxu2  ;;  %v7248_v32 = vld [vmem:[#allocation51_spill] sm:$0xff] }
 0x1db   : > { %1162 = vmatmul.f32.gmra.mxu3 %v3755_v38  ;;  %1275 = vmatmul.f32.gmra.mxu0 %v3693_v46  ;;  %v1006_v38 = vadd.f32 %v4963_v28, %v893_v59  ;;  %v1009_v28 = vadd.f32 %v4979_v30, %v896_v14  ;;  %v789_v30 = vadd.f32 %v4828_v49, %v4993_v27  ;;  %v3919_v49 = vld [vmem:[%s7117_s2] ss:$0 sm:$0xff]  ;;  %v3794_v59 = vld [vmem:[%s4199_s30 + $0x52] sm:$0xff] }
 0x1dc   : > { %v792_v27 = vadd.f32 %v3919_v49, %v5009_v57  ;;  %v2146_v57 = vld [vmem:[%s7118_s3 + $0x20] sm:$0xff]  ;;  %v795_v6 = vadd.f32 %v3919_v49, %v5025_v17  ;;  %v798_v26 = vadd.f32 %v3919_v49, %v5044_v58  ;;  %v2145_v58 = vld [vmem:[%s7118_s3 + $0x18] sm:$0xff]  ;;  %v801_v43 = vadd.f32 %v3919_v49, %v7248_v32 }
 0x1dd   : > { %1501 = vmatmul.f32.gmra.mxu2 %v3757_v56  ;;  %v3793_v56 = vld [vmem:[%s4199_s30 + $0x4a] sm:$0xff]  ;;  %v902_v9 = vadd.f32 %v5004_v41, %v789_v30  ;;  %2301 = vmatpush.msra.mxu1 %v2146_v57  ;;  %v7249_v30 = vld [vmem:[#allocation52_spill] sm:$0xff] }
 0x1de   : > { %v1115_v60 = vpop.f32.mrf.mxu3 }
 0x1df   : > { %v1116_v15 = vadd.f32 %v1115_v60, %v1003_v18  ;;  %v1015_v35 = vadd.f32 %v5011_v40, %v902_v9  ;;  %2302 = vmatpush.msra.mxu1 %v2145_v58  ;;  %v7250_v9 = vld [vmem:[#allocation53_spill] sm:$0xff]  ;;  %v2159_v58 = vld [vmem:[%s7118_s3 + $0x88] sm:$0xff] }
 0x1e0   : > { %v1231_v13 = vpop.f32.mrf.mxu0  ;;  %1388 = vmatmul.f32.gmra.mxu1 %v3725_v7  ;;  %v5367_v7 = vpop.f32.mrf.mxu1 }
 0x1e1   : > { %v5328_v21 = vadd.f32 %v1228_v61, %v1116_v15  ;;  %v5377_v15 = vpop.f32.mrf.mxu2 }
 0x1e3   : > { %1165 = vmatmul.f32.gmra.mxu3 %v3756_v19  ;;  %1278 = vmatmul.f32.gmra.mxu0 %v3694_v36  ;;  %v3762_v36 = vld [vmem:[%s4199_s30 + $0x51] sm:$0xff] }
 0x1e5   : > { %1504 = vmatmul.f32.gmra.mxu2 %v3758_v24  ;;  %v905_v24 = vadd.f32 %v5020_v48, %v792_v27  ;;  %v3763_v48 = vld [vmem:[%s4199_s30 + $0x61] sm:$0xff]  ;;  %v914_v27 = vadd.f32 %v7250_v9, %v801_v43 }
 0x1e6   : > { %v1118_v16 = vpop.f32.mrf.mxu3  ;;  %v7256_v43 = vld [vmem:[#allocation45_spill] sm:$0xff] }
 0x1e7   : > { %v1119_v55 = vadd.f32 %v1118_v16, %v1006_v38  ;;  %v1018_v38 = vadd.f32 %v5027_v44, %v905_v24  ;;  %v2161_v44 = vld [vmem:[%s7118_s3 + $0x98] sm:$0xff] }
 0x1e8   : > { %v1234_v23 = vpop.f32.mrf.mxu0  ;;  %1391 = vmatmul.f32.gmra.mxu1 %v3726_v11  ;;  %v5387_v40 = vpop.f32.mrf.mxu1  ;;  %2415 = vmatpush.msra.mxu2 %v2161_v44 }
 0x1e9   : > { %v5341_v0 = vadd.f32 %v1231_v13, %v1119_v55  ;;  %v5396_v14 = vpop.f32.mrf.mxu2 }
 0x1eb   : > { %1524 = vmatmul.f32.vlgmr.msra.gmra.mxu3 %v3759_v31  ;;  %1637 = vmatmul.f32.vlgmr.msra.gmra.mxu0 %v3791_v62  ;;  %v908_v31 = vadd.f32 %v5039_v53, %v795_v6 }
 0x1ed   : > { %v1021_v17 = vadd.f32 %v5046_v10, %v908_v31  ;;  %v7254_v31 = vld [vmem:[#allocation57_spill] sm:$0xff] }
 0x1ee   : > { %v1121_v42 = vpop.f32.mrf.mxu3 }
 0x1ef   : > { %v1122_v19 = vadd.f32 %v1121_v42, %v1009_v28 }
 0x1f0   : > { %v1237_v4 = vpop.f32.mrf.mxu0  ;;  %v5403_v28 = vpop.f32.mrf.mxu1 }
 0x1f1   : > { %v5352_v20 = vadd.f32 %v1234_v23, %v1122_v19  ;;  %v3795_v23 = vld [vmem:[%s4199_s30 + $0x62] sm:$0xff]  ;;  %v5413_v10 = vpop.f32.mrf.mxu2 }
 0x1f2   : > { %v3764_v19 = vld [vmem:[%s4199_s30 + $0x69] sm:$0xff] }
 0x1f3   : > { %1527 = vmatmul.f32.gmra.mxu3 %v3760_v5  ;;  %1640 = vmatmul.f32.gmra.mxu0 %v3792_v63  ;;  %v911_v5 = vadd.f32 %v5058_v29, %v798_v26 }
 0x1f6   : > { %v1124_v61 = vpop.f32.mrf.mxu3 }
 0x1f7   : > { %v1125_v46 = vadd.f32 %v1124_v61, %v1012_v2  ;;  %v1024_v2 = vadd.f32 %v7249_v30, %v911_v5 }
 0x1f8   : > { %v1240_v3 = vpop.f32.mrf.mxu0 }
 0x1f9   : > { %v5365_v18 = vadd.f32 %v1237_v4, %v1125_v46  ;;  %v3796_v4 = vld [vmem:[%s4199_s30 + $0x6a] sm:$0xff] }
 0x1fb   : > { %1530 = vmatmul.f32.gmra.mxu3 %v3761_v37  ;;  %1643 = vmatmul.f32.gmra.mxu0 %v3793_v56  ;;  %v3765_v37 = vld [vmem:[%s4199_s30 + $0x79] sm:$0xff] }
 0x1fc   : > { %v3797_v56 = vld [vmem:[%s4199_s30 + $0x7a] sm:$0xff] }
 0x1fe   : > { %v1127_v60 = vpop.f32.mrf.mxu3 }
 0x1ff   : > { %v1128_v41 = vadd.f32 %v1127_v60, %v1015_v35  ;;  %v804_v60 = vadd.f32 %v3919_v49, %v7251_v1  ;;  %v7258_v1 = vld [vmem:[#allocation46_spill] sm:$0xff] }
 0x200   : > { %v1243_v13 = vpop.f32.mrf.mxu0 }
 0x201   : > { %v5382_v51 = vadd.f32 %v1240_v3, %v1128_v41  ;;  %v5417_v3 = vpop.f32.mrf.mxu1  ;;  %v7252_v41 = vld [vmem:[#allocation56_spill] sm:$0xff] }
 0x203   : > { %1533 = vmatmul.f32.gmra.mxu3 %v3762_v36  ;;  %1646 = vmatmul.f32.gmra.mxu0 %v3794_v59  ;;  %v2160_v36 = vld [vmem:[%s7118_s3 + $0x90] sm:$0xff]  ;;  %v5429_v59 = vpop.f32.mrf.mxu2 }
 0x204   : > { %2416 = vmatpush.msra.mxu2 %v2160_v36  ;;  %v3801_v36 = vld [vmem:[%s4199_s30 + $0xaa] sm:$0xff] }
 0x206   : > { %v1130_v11 = vpop.f32.mrf.mxu3  ;;  %2417 = vmatpush.msra.mxu2 %v2159_v58 }
 0x207   : > { %v1131_v16 = vadd.f32 %v1130_v11, %v1018_v38  ;;  %v3766_v38 = vld [vmem:[%s4199_s30 + $0x81] sm:$0xff] }
 0x208   : > { %v1246_v55 = vpop.f32.mrf.mxu0  ;;  %v3798_v11 = vld [vmem:[%s4199_s30 + $0x82] sm:$0xff] }
 0x209   : > { %v5394_v62 = vadd.f32 %v1243_v13, %v1131_v16  ;;  %v1027_v13 = vadd.f32 %v7252_v41, %v914_v27  ;;  %v7253_v16 = vld [vmem:[#allocation3_spill] sm:$0xff]  ;;  %v5436_v49 = vpop.f32.mrf.mxu1 }
 0x20b   : > { %1536 = vmatmul.f32.gmra.mxu3 %v3763_v48  ;;  %1649 = vmatmul.f32.gmra.mxu0 %v3795_v23  ;;  %v2144_v23 = vld [vmem:[%s7118_s3 + $0x10] sm:$0xff] }
 0x20c   : > { %2303 = vmatpush.msra.mxu1 %v2144_v23 }
 0x20e   : > { %v1133_v52 = vpop.f32.mrf.mxu3 }
 0x20f   : > { %v1134_v42 = vadd.f32 %v1133_v52, %v1021_v17  ;;  %v5442_v52 = vpop.f32.mrf.mxu2 }
 0x210   : > { %v1249_v53 = vpop.f32.mrf.mxu0 }
 0x211   : > { %v5408_v63 = vadd.f32 %v1246_v55, %v1134_v42  ;;  %v917_v55 = vadd.f32 %v7253_v16, %v804_v60  ;;  %v5448_v5 = vpop.f32.mrf.mxu1  ;;  %v7260_v16 = vld [vmem:[#allocation47_spill] sm:$0xff] }
 0x213   : > { %1539 = vmatmul.f32.gmra.mxu3 %v3764_v19  ;;  %1652 = vmatmul.f32.gmra.mxu0 %v3796_v4  ;;  %v1030_v26 = vadd.f32 %v7254_v31, %v917_v55  ;;  %v3799_v19 = vld [vmem:[%s4199_s30 + $0x92] sm:$0xff] }
 0x216   : > { %v1136_v61 = vpop.f32.mrf.mxu3 }
 0x217   : > { %v1137_v46 = vadd.f32 %v1136_v61, %v1024_v2  ;;  %v3768_v61 = vld [vmem:[%s4199_s30 + $0x99] sm:$0xff] }
 0x218   : > { %v1252_v29 = vpop.f32.mrf.mxu0 }
 0x219   : > { %v5422_v35 = vadd.f32 %v1249_v53, %v1137_v46  ;;  %v3767_v53 = vld [vmem:[%s4199_s30 + $0x91] sm:$0xff]  ;;  %v3800_v46 = vld [vmem:[%s4199_s30 + $0x9a] sm:$0xff]  ;;  %v5463_v9 = vpop.f32.mrf.mxu1 }
 0x21b   : > { %1542 = vmatmul.f32.gmra.mxu3 %v3765_v37  ;;  %1655 = vmatmul.f32.gmra.mxu0 %v3797_v56  ;;  %v5458_v37 = vpop.f32.mrf.mxu2  ;;  %v2143_v56 = vld [vmem:[%s7118_s3 + $0x8] sm:$0xff] }
 0x21c   : > { %2304 = vmatpush.msra.mxu1 %v2143_v56 }
 0x21e   : > { %v1139_v24 = vpop.f32.mrf.mxu3 }
 0x21f   : > { %v1140_v57 = vadd.f32 %v1139_v24, %v1027_v13  ;;  %v3769_v13 = vld [vmem:[%s4199_s30 + $0xa9] sm:$0xff] }
 0x220   : > { %v1255_v6 = vpop.f32.mrf.mxu0 }
 0x221   : > { %v5434_v48 = vadd.f32 %v1252_v29, %v1140_v57  ;;  %v5479_v23 = vpop.f32.mrf.mxu1 }
 0x223   : > { %1545 = vmatmul.f32.gmra.mxu3 %v3766_v38  ;;  %1658 = vmatmul.f32.gmra.mxu0 %v3798_v11  ;;  %v5470_v57 = vpop.f32.mrf.mxu2  ;;  %v3930_v38 = vmov 0.0  }
 0x224   : > { %1766 = vst [vmem:[#allocation2] sm:$0xff] %v3930_v38 }
 0x225   : > { %1767 = vst [vmem:[#allocation2 + $0x8] sm:$0xff] %v3930_v38 }
 0x226   : > { %v1142_v17 = vpop.f32.mrf.mxu3  ;;  %1768 = vst [vmem:[#allocation2 + $0x10] sm:$0x3] %v3930_v38 }
 0x227   : > { %v1143_v44 = vadd.f32 %v1142_v17, %v1030_v26  ;;  %v3770_v26 = vld [vmem:[%s4199_s30 + $0xb1] sm:$0xff]  ;;  %1769 = vst [vmem:[#allocation2 + $0x18] sm:$0xff] %v3930_v38 }
 0x228   : > { %v1258_v42 = vpop.f32.mrf.mxu0  ;;  %v3802_v17 = vld [vmem:[%s4199_s30 + $0xb2] sm:$0xff]  ;;  %1770 = vst [vmem:[#allocation2 + $0x20] sm:$0xff] %v3930_v38 }
 0x229   : > { %v5446_v4 = vadd.f32 %v1255_v6, %v1143_v44  ;;  %v2158_v6 = vld [vmem:[%s7118_s3 + $0x80] sm:$0xff]  ;;  %1771 = vst [vmem:[#allocation2 + $0x28] sm:$0x3] %v3930_v38 }
 0x22a   : > { %2418 = vmatpush.msra.mxu2 %v2158_v6  ;;  %1772 = vst [vmem:[#allocation2 + $0x30] sm:$0xff] %v3930_v38 }
 0x22b   : > { %7255 = vst [vmem:[#allocation6_spill] sm:$0xff] %v5446_v4  ;;  %1548 = vmatmul.f32.gmra.mxu3 %v3767_v53  ;;  %1661 = vmatmul.f32.gmra.mxu0 %v3799_v19  ;;  %v5495_v19 = vpop.f32.mrf.mxu2 }
 0x22c   : > { %1773 = vst [vmem:[#allocation2 + $0x38] sm:$0xff] %v3930_v38  ;;  %v1885_v53 = vld [vmem:[#allocation2 + $0x1] sm:$0xff] }
 0x22d   : > { %1774 = vst [vmem:[#allocation2 + $0x40] sm:$0x3] %v3930_v38  ;;  %2419 = vmatmul.f32.vlgmr.msra.gmra.mxu2 %v1885_v53 }
 0x22e   : > { %v1145_v32 = vpop.f32.mrf.mxu3  ;;  %1775 = vst [vmem:[#allocation2 + $0x48] sm:$0xff] %v3930_v38 }
 0x22f   : > { %v1146_v30 = vadd.f32 %v1145_v32, %v7256_v43  ;;  %v7262_v32 = vld [vmem:[#allocation48_spill] sm:$0xff]  ;;  %1776 = vst [vmem:[#allocation2 + $0x50] sm:$0xff] %v3930_v38 }
 0x230   : > { %v1261_v2 = vpop.f32.mrf.mxu0  ;;  %1777 = vst [vmem:[#allocation2 + $0x58] sm:$0x3] %v3930_v38 }
 0x231   : > { %v5456_v29 = vadd.f32 %v1258_v42, %v1146_v30  ;;  %v2142_v42 = vld [vmem:[%s7118_s3] sm:$0xff]  ;;  %1778 = vst [vmem:[#allocation2 + $0x60] sm:$0xff] %v3930_v38 }
 0x232   : > { %2305 = vmatpush.msra.mxu1 %v2142_v42  ;;  %1779 = vst [vmem:[#allocation2 + $0x68] sm:$0xff] %v3930_v38  ;;  %v2221_v42 = vld [vmem:[%s7118_s3 + $0x278] sm:$0xff] }
 0x233   : > { %7257 = vst [vmem:[#allocation21_spill] sm:$0xff] %v5456_v29  ;;  %1551 = vmatmul.f32.gmra.mxu3 %v3768_v61  ;;  %1664 = vmatmul.f32.gmra.mxu0 %v3800_v46  ;;  %v3803_v61 = vld [vmem:[%s4199_s30 + $0xc2] sm:$0xff]  ;;  %v2189_v46 = vld [vmem:[%s7118_s3 + $0x178] sm:$0xff] }
 0x234   : > { %2306 = vmatmul.f32.vlgmr.msra.gmra.mxu1 %v3930_v38  ;;  %2516 = vmatpush.msrb.mxu3 %v2189_v46  ;;  %1780 = vst [vmem:[#allocation2 + $0x70] sm:$0x3] %v3930_v38 }
 0x235   : > { %1781 = vst [vmem:[#allocation2 + $0x78] sm:$0xff] %v3930_v38  ;;  %2742 = vmatpush.msrb.mxu1 %v2221_v42 }
 0x236   : > { %v1148_v27 = vpop.f32.mrf.mxu3  ;;  %1782 = vst [vmem:[#allocation2 + $0x80] sm:$0xff] %v3930_v38 }
 0x237   : > { %v1149_v60 = vadd.f32 %v1148_v27, %v7258_v1  ;;  %v5509_v27 = vpop.f32.mrf.mxu1  ;;  %v1886_v1 = vld [vmem:[#allocation2 + $0x9] sm:$0xff]  ;;  %1783 = vst [vmem:[#allocation2 + $0x88] sm:$0x3] %v3930_v38 }
 0x238   : > { %v1264_v41 = vpop.f32.mrf.mxu0  ;;  %2422 = vmatmul.f32.gmra.mxu2 %v1886_v1  ;;  %1784 = vst [vmem:[#allocation2 + $0x90] sm:$0xff] %v3930_v38  ;;  %v2188_v1 = vld [vmem:[%s7118_s3 + $0x170] sm:$0xff] }
 0x239   : > { %v5468_v24 = vadd.f32 %v1261_v2, %v1149_v60  ;;  %v3771_v2 = vld [vmem:[%s4199_s30 + $0xc1] sm:$0xff]  ;;  %1785 = vst [vmem:[#allocation2 + $0x98] sm:$0xff] %v3930_v38  ;;  %2517 = vmatpush.msrb.mxu3 %v2188_v1 }
 0x23a   : > { %1786 = vst [vmem:[#allocation2 + $0xa0] sm:$0x3] %v3930_v38 }
 0x23b   : > { %7259 = vst [vmem:[#allocation11_spill] sm:$0xff] %v5468_v24  ;;  %1554 = vmatmul.f32.gmra.mxu3 %v3769_v13  ;;  %1667 = vmatmul.f32.gmra.mxu0 %v3801_v36  ;;  %v5519_v36 = vpop.f32.mrf.mxu2 }
 0x23c   : > { %2309 = vmatmul.f32.gmra.mxu1 %v3930_v38  ;;  %1787 = vst [vmem:[#allocation2 + $0xa8] sm:$0xff] %v3930_v38 }
 0x23d   : > { %1788 = vst [vmem:[#allocation2 + $0xb0] sm:$0xff] %v3930_v38 }
 0x23e   : > { %v1151_v11 = vpop.f32.mrf.mxu3  ;;  %1789 = vst [vmem:[#allocation2 + $0xb8] sm:$0x3] %v3930_v38 }
 0x23f   : > { %v1152_v55 = vadd.f32 %v1151_v11, %v7260_v16  ;;  %v3772_v11 = vld [vmem:[%s4199_s30 + $0xc9] sm:$0xff]  ;;  %1790 = vst [vmem:[#allocation2 + $0xc0] sm:$0xff] %v3930_v38 }
 0x240   : > { %v1267_v31 = vpop.f32.mrf.mxu0  ;;  %v3804_v16 = vld [vmem:[%s4199_s30 + $0xca] sm:$0xff]  ;;  %1791 = vst [vmem:[#allocation2 + $0xc8] sm:$0xff] %v3930_v38 }
 0x241   : > { %v5484_v44 = vadd.f32 %v1264_v41, %v1152_v55  ;;  %v7264_v41 = vld [vmem:[#allocation49_spill] sm:$0xff]  ;;  %1792 = vst [vmem:[#allocation2 + $0xd0] sm:$0x3] %v3930_v38 }
 0x242   : > { %1793 = vst [vmem:[#allocation2 + $0xd8] sm:$0xff] %v3930_v38 }
 0x243   : > { %7261 = vst [vmem:[#allocation8_spill] sm:$0xff] %v5484_v44  ;;  %1557 = vmatmul.f32.gmra.mxu3 %v3770_v26  ;;  %1670 = vmatmul.f32.gmra.mxu0 %v3802_v17  ;;  %v5532_v26 = vpop.f32.mrf.mxu1  ;;  %v2205_v17 = vld [vmem:[%s7118_s3 + $0x1f8] sm:$0xff]  ;;  %v5551_v46 = vpop.f32.mrf.mxu2 }
 0x244   : > { %2629 = vmatpush.msrb.mxu0 %v2205_v17  ;;  %1794 = vst [vmem:[#allocation2 + $0xe0] sm:$0xff] %v3930_v38  ;;  %v3806_v17 = vld [vmem:[%s4199_s30 + $0xe2] sm:$0xff] }
 0x245   : > { %1795 = vst [vmem:[#allocation2 + $0xe8] sm:$0x3] %v3930_v38 }
 0x246   : > { %v1154_v58 = vpop.f32.mrf.mxu3  ;;  %1796 = vst [vmem:[#allocation2 + $0xf0] sm:$0xff] %v3930_v38 }
 0x247   : > { %v1155_v43 = vadd.f32 %v1154_v58, %v7262_v32  ;;  %v7266_v58 = vld [vmem:[#allocation50_spill] sm:$0xff]  ;;  %1797 = vst [vmem:[#allocation2 + $0xf8] sm:$0xff] %v3930_v38 }
 0x248   : > { %v1270_v30 = vpop.f32.mrf.mxu0  ;;  %1798 = vst [vmem:[#allocation2 + $0x100] sm:$0x3] %v3930_v38 }
 0x249   : > { %v5506_v56 = vadd.f32 %v1267_v31, %v1155_v43  ;;  %v2237_v31 = vld [vmem:[%s7118_s3 + $0x2f8] sm:$0xff]  ;;  %1799 = vst [vmem:[#allocation2 + $0x108] sm:$0xff] %v3930_v38 }
 0x24a   : > { %2855 = vmatpush.msrb.mxu2 %v2237_v31  ;;  %1800 = vst [vmem:[#allocation2 + $0x110] sm:$0xff] %v3930_v38  ;;  %v3774_v31 = vld [vmem:[%s4199_s30 + $0xe1] sm:$0xff] }
 0x24b   : > { %7263 = vst [vmem:[#allocation19_spill] sm:$0xff] %v5506_v56  ;;  %1560 = vmatmul.f32.gmra.mxu3 %v3771_v2  ;;  %1673 = vmatmul.f32.gmra.mxu0 %v3803_v61  ;;  %v3805_v2 = vld [vmem:[%s4199_s30 + $0xda] sm:$0xff] }
 0x24c   : > { %1801 = vst [vmem:[#allocation2 + $0x118] sm:$0x3] %v3930_v38 }
 0x24d   : > { %1802 = vst [vmem:[#allocation2 + $0x120] sm:$0xff] %v3930_v38 }
 0x24e   : > { %v1157_v60 = vpop.f32.mrf.mxu3  ;;  %1803 = vst [vmem:[#allocation2 + $0x128] sm:$0xff] %v3930_v38 }
 0x24f   : > { %v1158_v13 = vadd.f32 %v1157_v60, %v7264_v41  ;;  %v2236_v60 = vld [vmem:[%s7118_s3 + $0x2f0] sm:$0xff]  ;;  %v5563_v41 = vpop.f32.mrf.mxu1  ;;  %1804 = vst [vmem:[#allocation2 + $0x130] sm:$0x3] %v3930_v38 }
 0x250   : > { %v1273_v6 = vpop.f32.mrf.mxu0  ;;  %2856 = vmatpush.msrb.mxu2 %v2236_v60  ;;  %1805 = vst [vmem:[#allocation2 + $0x138] sm:$0xff] %v3930_v38 }
 0x251   : > { %v5524_v55 = vadd.f32 %v1270_v30, %v1158_v13  ;;  %v3773_v30 = vld [vmem:[%s4199_s30 + $0xd9] sm:$0xff]  ;;  %1806 = vst [vmem:[#allocation2 + $0x140] sm:$0xff] %v3930_v38 }
 0x252   : > { %1807 = vst [vmem:[#allocation2 + $0x148] sm:$0x3] %v3930_v38 }
 0x253   : > { %7265 = vst [vmem:[#allocation9_spill] sm:$0xff] %v5524_v55  ;;  %1563 = vmatmul.f32.gmra.mxu3 %v3772_v11  ;;  %1676 = vmatmul.f32.gmra.mxu0 %v3804_v16 }
 0x254   : > { %1808 = vst [vmem:[#allocation2 + $0x150] sm:$0xff] %v3930_v38 }
 0x255   : > { %1809 = vst [vmem:[#allocation2 + $0x158] sm:$0xff] %v3930_v38 }
 0x256   : > { %v1160_v53 = vpop.f32.mrf.mxu3  ;;  %1810 = vst [vmem:[#allocation2 + $0x160] sm:$0x3] %v3930_v38 }
 0x257   : > { %v1161_v32 = vadd.f32 %v1160_v53, %v7266_v58  ;;  %v5576_v53 = vpop.f32.mrf.mxu2  ;;  %v2204_v58 = vld [vmem:[%s7118_s3 + $0x1f0] sm:$0xff]  ;;  %v5589_v1 = vpop.f32.mrf.mxu1  ;;  %1811 = vst [vmem:[#allocation2 + $0x168] sm:$0xff] %v3930_v38 }
 0x258   : > { %v1276_v43 = vpop.f32.mrf.mxu0  ;;  %2630 = vmatpush.msrb.mxu0 %v2204_v58  ;;  %1812 = vst [vmem:[#allocation2 + $0x170] sm:$0xff] %v3930_v38 }
 0x259   : > { %v5548_v61 = vadd.f32 %v1273_v6, %v1161_v32  ;;  %v7268_v6 = vld [vmem:[#allocation54_spill] sm:$0xff]  ;;  %v2220_v32 = vld [vmem:[%s7118_s3 + $0x270] sm:$0xff]  ;;  %1813 = vst [vmem:[#allocation2 + $0x178] sm:$0x3] %v3930_v38 }
 0x25a   : > { %2743 = vmatpush.msrb.mxu1 %v2220_v32  ;;  %1814 = vst [vmem:[#allocation2 + $0x180] sm:$0xff] %v3930_v38  ;;  %v7272_v32 = vld [vmem:[#allocation7_spill] sm:$0xff] }
 0x25b   : > { %7267 = vst [vmem:[#allocation10_spill] sm:$0xff] %v5548_v61  ;;  %1566 = vmatmul.f32.gmra.mxu3 %v3773_v30  ;;  %1679 = vmatmul.f32.gmra.mxu0 %v3805_v2  ;;  %v7270_v30 = vld [vmem:[#allocation15_spill] sm:$0xff] }
 0x25c   : > { %1815 = vst [vmem:[#allocation2 + $0x188] sm:$0xff] %v3930_v38 }
 0x25d   : > { %1816 = vst [vmem:[#allocation2 + $0x190] sm:$0x3] %v3930_v38 }
 0x25e   : > { %v1163_v13 = vpop.f32.mrf.mxu3  ;;  %1817 = vst [vmem:[#allocation2 + $0x198] sm:$0xff] %v3930_v38 }
 0x25f   : > { %v1164_v11 = vadd.f32 %v1163_v13, %v7268_v6  ;;  %v3775_v13 = vld [vmem:[%s4199_s30 + $0xf1] sm:$0xff]  ;;  %1818 = vst [vmem:[#allocation2 + $0x1a0] sm:$0xff] %v3930_v38 }
 0x260   : > { %v1279_v16 = vpop.f32.mrf.mxu0  ;;  %v3807_v6 = vld [vmem:[%s4199_s30 + $0xf2] sm:$0xff]  ;;  %1819 = vst [vmem:[#allocation2 + $0x1a8] sm:$0x3] %v3930_v38 }
 0x261   : > { %v5571_v42 = vadd.f32 %v1276_v43, %v1164_v11 }
 0x263   : > { %7269 = vst [vmem:[#allocation27_spill] sm:$0xff] %v5571_v42  ;;  %1569 = vmatmul.f32.gmra.mxu3 %v3774_v31  ;;  %1682 = vmatmul.f32.gmra.mxu0 %v3806_v17  ;;  %v2187_v31 = vld [vmem:[%s7118_s3 + $0x168] sm:$0xff]  ;;  %v5607_v17 = vpop.f32.mrf.mxu2 }
 0x264   : > { %2518 = vmatpush.msrb.mxu3 %v2187_v31 }
 0x266   : > { %v1166_v43 = vpop.f32.mrf.mxu3 }
 0x267   : > { %v1167_v2 = vadd.f32 %v1166_v43, %v7270_v30 }
 0x268   : > { %v1638_v60 = vpop.f32.mrf.mxu0 }
 0x269   : > { %v5594_v11 = vadd.f32 %v1279_v16, %v1167_v2  ;;  %v2235_v16 = vld [vmem:[%s7118_s3 + $0x2e8] sm:$0xff]  ;;  %v3776_v2 = vld [vmem:[%s4199_s30 + $0xf9] sm:$0xff] }
 0x26a   : > { %2857 = vmatpush.msrb.mxu2 %v2235_v16  ;;  %v2203_v16 = vld [vmem:[%s7118_s3 + $0x1e8] sm:$0xff] }
 0x26b   : > { %7271 = vst [vmem:[#allocation17_spill] sm:$0xff] %v5594_v11  ;;  %1572 = vmatmul.f32.gmra.mxu3 %v3775_v13  ;;  %1685 = vmatmul.f32.gmra.mxu0 %v3807_v6  ;;  %v3808_v13 = vld [vmem:[%s4199_s30 + $0xfa] sm:$0xff]  ;;  %v5616_v11 = vpop.f32.mrf.mxu1  ;;  %v5626_v42 = vpop.f32.mrf.mxu2 }
 0x26c   : > { %2631 = vmatpush.msrb.mxu0 %v2203_v16  ;;  %v2186_v16 = vld [vmem:[%s7118_s3 + $0x160] sm:$0xff] }
 0x26d   : > { %2519 = vmatpush.msrb.mxu3 %v2186_v16  ;;  %v2202_v16 = vld [vmem:[%s7118_s3 + $0x1e0] sm:$0xff] }
 0x26e   : > { %v1525_v58 = vpop.f32.mrf.mxu3  ;;  %2632 = vmatpush.msrb.mxu0 %v2202_v16  ;;  %v2185_v16 = vld [vmem:[%s7118_s3 + $0x158] sm:$0xff] }
 0x26f   : > { %v1526_v43 = vadd.f32 %v1525_v58, %v7272_v32  ;;  %v2219_v58 = vld [vmem:[%s7118_s3 + $0x268] sm:$0xff]  ;;  %v7273_v32 = vld [vmem:[#allocation4_spill] sm:$0xff]  ;;  %2520 = vmatpush.msrb.mxu3 %v2185_v16 }
 0x270   : > { %v1641_v30 = vpop.f32.mrf.mxu0  ;;  %2744 = vmatpush.msrb.mxu1 %v2219_v58  ;;  %v2217_v16 = vld [vmem:[%s7118_s3 + $0x258] sm:$0xff] }
 0x271   : > { %v1639_v6 = vadd.f32 %v1638_v60, %v1526_v43 }
 0x273   : > { %v1734_v31 = vmax.f32 %v1639_v6, 0.0  ;;  %1575 = vmatmul.f32.gmra.mxu3 %v3776_v2  ;;  %1688 = vmatmul.f32.gmra.mxu0 %v3808_v13  ;;  %v3777_v2 = vld [vmem:[%s4199_s30 + $0x109] sm:$0xff]  ;;  %v5630_v61 = vpop.f32.mrf.mxu1  ;;  %v5644_v56 = vpop.f32.mrf.mxu2 }
 0x274   : > { %v3809_v13 = vld [vmem:[%s4199_s30 + $0x10a] sm:$0xff]  ;;  %7275 = vst [vmem:[#allocation12_spill] sm:$0xff] %v5644_v56 }
 0x275   : > { %1821 = vst [vmem:[#allocation2 + $0x19] sm:$0xff] %v1734_v31  ;;  %2425 = vmatmul.f32.gmra.mxu2 %v1734_v31 }
 0x276   : > { %v1528_v60 = vpop.f32.mrf.mxu3 }
 0x277   : > { %v1529_v43 = vadd.f32 %v1528_v60, %v7273_v32  ;;  %v7274_v60 = vld [vmem:[#allocation13_spill] sm:$0xff] }
 0x278   : > { %v1644_v38 = vpop.f32.mrf.mxu0 }
 0x279   : > { %v1642_v6 = vadd.f32 %v1641_v30, %v1529_v43  ;;  %v2234_v30 = vld [vmem:[%s7118_s3 + $0x2e0] sm:$0xff] }
 0x27a   : > { %2858 = vmatpush.msrb.mxu2 %v2234_v30 }
 0x27b   : > { %v1735_v31 = vmax.f32 %v1642_v6, 0.0  ;;  %1578 = vmatmul.f32.gmra.mxu3 %v3777_v2  ;;  %1691 = vmatmul.f32.gmra.mxu0 %v3809_v13  ;;  %v3778_v2 = vld [vmem:[%s4199_s30 + $0x111] sm:$0xff]  ;;  %v5655_v30 = vpop.f32.mrf.mxu1  ;;  %v5660_v29 = vpop.f32.mrf.mxu2 }
 0x27c   : > { %v5632_v55 = vld [vmem:[#allocation2 + $0x18] sm:$0xff]  ;;  %7277 = vst [vmem:[#allocation25_spill] sm:$0xff] %v5660_v29 }
 0x27d   : > { %1822 = vst [vmem:[#allocation2 + $0x21] sm:$0xff] %v1735_v31  ;;  %2312 = vmatmul.f32.gmra.mxu1 %v5632_v55  ;;  %2428 = vmatmul.f32.gmra.mxu2 %v1735_v31  ;;  %v3810_v13 = vld [vmem:[%s4199_s30 + $0x112] sm:$0xff] }
 0x27e   : > { %v1531_v58 = vpop.f32.mrf.mxu3 }
 0x27f   : > { %v1532_v32 = vadd.f32 %v1531_v58, %v7274_v60  ;;  %v7276_v60 = vld [vmem:[#allocation5_spill] sm:$0xff] }
 0x280   : > { %v1647_v43 = vpop.f32.mrf.mxu0 }
 0x281   : > { %v1645_v6 = vadd.f32 %v1644_v38, %v1532_v32  ;;  %v2218_v38 = vld [vmem:[%s7118_s3 + $0x260] sm:$0xff] }
 0x282   : > { %2745 = vmatpush.msrb.mxu1 %v2218_v38 }
 0x283   : > { %v1736_v31 = vmax.f32 %v1645_v6, 0.0  ;;  %1581 = vmatmul.f32.gmra.mxu3 %v3778_v2  ;;  %1694 = vmatmul.f32.gmra.mxu0 %v3810_v13  ;;  %v3779_v13 = vld [vmem:[%s4199_s30 + $0x121] sm:$0xff] }
 0x284   : > { %v5646_v44 = vld [vmem:[#allocation2 + $0x20] sm:$0xff]  ;;  %2746 = vmatpush.msrb.mxu1 %v2217_v16 }
 0x285   : > { %1823 = vst [vmem:[#allocation2 + $0x31] sm:$0xff] %v1736_v31  ;;  %2315 = vmatmul.f32.gmra.mxu1 %v5646_v44  ;;  %2431 = vmatmul.f32.gmra.mxu2 %v1736_v31  ;;  %v3811_v6 = vld [vmem:[%s4199_s30 + $0x122] sm:$0xff] }
 0x286   : > { %v1534_v58 = vpop.f32.mrf.mxu3 }
 0x287   : > { %v1535_v32 = vadd.f32 %v1534_v58, %v7276_v60  ;;  %v5672_v58 = vpop.f32.mrf.mxu1 }
 0x288   : > { %v1650_v2 = vpop.f32.mrf.mxu0  ;;  %7278 = vst [vmem:[#allocation14_spill] sm:$0xff] %v5672_v58 }
 0x289   : > { %v1648_v24 = vadd.f32 %v1647_v43, %v1535_v32  ;;  %v3780_v32 = vld [vmem:[%s4199_s30 + $0x129] sm:$0xff] }
 0x28b   : > { %v1737_v31 = vmax.f32 %v1648_v24, 0.0  ;;  %1584 = vmatmul.f32.gmra.mxu3 %v3779_v13  ;;  %1697 = vmatmul.f32.gmra.mxu0 %v3811_v6  ;;  %v2233_v24 = vld [vmem:[%s7118_s3 + $0x2d8] sm:$0xff]  ;;  %v3812_v13 = vld [vmem:[%s4199_s30 + $0x12a] sm:$0xff] }
 0x28c   : > { %v5662_v4 = vld [vmem:[#allocation2 + $0x30] sm:$0xff]  ;;  %2859 = vmatpush.msrb.mxu2 %v2233_v24 }
 0x28d   : > { %1824 = vst [vmem:[#allocation2 + $0x39] sm:$0xff] %v1737_v31  ;;  %2318 = vmatmul.f32.gmra.mxu1 %v5662_v4  ;;  %2434 = vmatmul.f32.gmra.mxu2 %v1737_v31 }
 0x28e   : > { %v1537_v43 = vpop.f32.mrf.mxu3 }
 0x28f   : > { %v1538_v38 = vadd.f32 %v1537_v43, %v5197_v39  ;;  %v2201_v39 = vld [vmem:[%s7118_s3 + $0x1d8] sm:$0xff] }
 0x290   : > { %v1653_v60 = vpop.f32.mrf.mxu0  ;;  %2633 = vmatpush.msrb.mxu0 %v2201_v39 }
 0x291   : > { %v1651_v6 = vadd.f32 %v1650_v2, %v1538_v38  ;;  %v5685_v2 = vpop.f32.mrf.mxu2 }
 0x292   : > { %7279 = vst [vmem:[#allocation16_spill] sm:$0xff] %v5685_v2 }
 0x293   : > { %v1738_v31 = vmax.f32 %v1651_v6, 0.0  ;;  %1587 = vmatmul.f32.gmra.mxu3 %v3780_v32  ;;  %1700 = vmatmul.f32.gmra.mxu0 %v3812_v13  ;;  %v3781_v32 = vld [vmem:[%s4199_s30 + $0x139] sm:$0xff] }
 0x294   : > { %v5676_v29 = vld [vmem:[#allocation2 + $0x38] sm:$0xff] }
 0x295   : > { %1825 = vst [vmem:[#allocation2 + $0x49] sm:$0xff] %v1738_v31  ;;  %2321 = vmatmul.f32.gmra.mxu1 %v5676_v29  ;;  %2437 = vmatmul.f32.gmra.mxu2 %v1738_v31  ;;  %v3813_v13 = vld [vmem:[%s4199_s30 + $0x13a] sm:$0xff]  ;;  %v5690_v31 = vpop.f32.mrf.mxu1 }
 0x296   : > { %v1540_v24 = vpop.f32.mrf.mxu3  ;;  %7280 = vst [vmem:[#allocation33_spill] sm:$0xff] %v5690_v31 }
 0x297   : > { %v1541_v43 = vadd.f32 %v1540_v24, %v5209_v50  ;;  %v2184_v50 = vld [vmem:[%s7118_s3 + $0x150] sm:$0xff] }
 0x298   : > { %v1656_v38 = vpop.f32.mrf.mxu0  ;;  %2521 = vmatpush.msrb.mxu3 %v2184_v50 }
 0x299   : > { %v1654_v6 = vadd.f32 %v1653_v60, %v1541_v43  ;;  %v2232_v60 = vld [vmem:[%s7118_s3 + $0x2d0] sm:$0xff]  ;;  %v5702_v24 = vpop.f32.mrf.mxu2 }
 0x29a   : > { %2860 = vmatpush.msrb.mxu2 %v2232_v60  ;;  %7281 = vst [vmem:[#allocation23_spill] sm:$0xff] %v5702_v24 }
 0x29b   : > { %v1739_v58 = vmax.f32 %v1654_v6, 0.0  ;;  %1590 = vmatmul.f32.gmra.mxu3 %v3781_v32  ;;  %1703 = vmatmul.f32.gmra.mxu0 %v3813_v13  ;;  %v3782_v32 = vld [vmem:[%s4199_s30 + $0x141] sm:$0xff] }
 0x29c   : > { %v5692_v56 = vld [vmem:[#allocation2 + $0x48] sm:$0xff] }
 0x29d   : > { %1826 = vst [vmem:[#allocation2 + $0x51] sm:$0xff] %v1739_v58  ;;  %2324 = vmatmul.f32.gmra.mxu1 %v5692_v56  ;;  %2440 = vmatmul.f32.gmra.mxu2 %v1739_v58  ;;  %v3814_v13 = vld [vmem:[%s4199_s30 + $0x142] sm:$0xff]  ;;  %v5706_v2 = vpop.f32.mrf.mxu1 }
 0x29e   : > { %v1543_v39 = vpop.f32.mrf.mxu3  ;;  %7282 = vst [vmem:[#allocation18_spill] sm:$0xff] %v5706_v2 }
 0x29f   : > { %v1544_v16 = vadd.f32 %v1543_v39, %v5227_v22  ;;  %v2200_v22 = vld [vmem:[%s7118_s3 + $0x1d0] sm:$0xff] }
 0x2a0   : > { %v1659_v43 = vpop.f32.mrf.mxu0  ;;  %2634 = vmatpush.msrb.mxu0 %v2200_v22 }
 0x2a1   : > { %v1657_v6 = vadd.f32 %v1656_v38, %v1544_v16  ;;  %v2216_v38 = vld [vmem:[%s7118_s3 + $0x250] sm:$0xff] }
 0x2a2   : > { %2747 = vmatpush.msrb.mxu1 %v2216_v38  ;;  %v3783_v16 = vld [vmem:[%s4199_s30 + $0x151] sm:$0xff] }
 0x2a3   : > { %v1740_v58 = vmax.f32 %v1657_v6, 0.0  ;;  %1593 = vmatmul.f32.gmra.mxu3 %v3782_v32  ;;  %1706 = vmatmul.f32.gmra.mxu0 %v3814_v13  ;;  %v3815_v32 = vld [vmem:[%s4199_s30 + $0x152] sm:$0xff]  ;;  %v1324_v13 = vadd.f32 %v5367_v7, %v5247_v34  ;;  %v2231_v34 = vld [vmem:[%s7118_s3 + $0x2c8] sm:$0xff] }
 0x2a4   : > { %v5708_v31 = vld [vmem:[#allocation2 + $0x50] sm:$0xff]  ;;  %2861 = vmatpush.msrb.mxu2 %v2231_v34 }
 0x2a5   : > { %1827 = vst [vmem:[#allocation2 + $0x61] sm:$0xff] %v1740_v58  ;;  %2327 = vmatmul.f32.gmra.mxu1 %v5708_v31  ;;  %2443 = vmatmul.f32.gmra.mxu2 %v1740_v58  ;;  %v5722_v58 = vpop.f32.mrf.mxu2  ;;  %v1437_v22 = vadd.f32 %v5360_v54, %v1324_v13  ;;  %v5734_v7 = vpop.f32.mrf.mxu1  ;;  %v3784_v54 = vld [vmem:[%s4199_s30 + $0x159] sm:$0xff] }
 0x2a6   : > { %v1546_v50 = vpop.f32.mrf.mxu3 }
 0x2a7   : > { %v1547_v60 = vadd.f32 %v1546_v50, %v5239_v33  ;;  %v2183_v33 = vld [vmem:[%s7118_s3 + $0x148] sm:$0xff] }
 0x2a8   : > { %v1662_v39 = vpop.f32.mrf.mxu0  ;;  %2522 = vmatpush.msrb.mxu3 %v2183_v33 }
 0x2a9   : > { %v1660_v6 = vadd.f32 %v1659_v43, %v1547_v60  ;;  %v3816_v60 = vld [vmem:[%s4199_s30 + $0x15a] sm:$0xff] }
 0x2ab   : > { %v1741_v24 = vmax.f32 %v1660_v6, 0.0  ;;  %1596 = vmatmul.f32.gmra.mxu3 %v3783_v16  ;;  %1709 = vmatmul.f32.gmra.mxu0 %v3815_v32 }
 0x2ac   : > { %v5724_v2 = vld [vmem:[#allocation2 + $0x60] sm:$0xff] }
 0x2ad   : > { %1828 = vst [vmem:[#allocation2 + $0x69] sm:$0xff] %v1741_v24  ;;  %2330 = vmatmul.f32.gmra.mxu1 %v5724_v2  ;;  %2446 = vmatmul.f32.gmra.mxu2 %v1741_v24  ;;  %v1327_v24 = vadd.f32 %v5387_v40, %v5262_v25  ;;  %v5740_v13 = vpop.f32.mrf.mxu2  ;;  %v2199_v25 = vld [vmem:[%s7118_s3 + $0x1c8] sm:$0xff]  ;;  %v5752_v34 = vpop.f32.mrf.mxu1 }
 0x2ae   : > { %v1549_v43 = vpop.f32.mrf.mxu3  ;;  %v2215_v40 = vld [vmem:[%s7118_s3 + $0x248] sm:$0xff]  ;;  %2635 = vmatpush.msrb.mxu0 %v2199_v25  ;;  %v2230_v25 = vld [vmem:[%s7118_s3 + $0x2c0] sm:$0xff] }
 0x2af   : > { %v1550_v38 = vadd.f32 %v1549_v43, %v1437_v22  ;;  %v1440_v33 = vadd.f32 %v5377_v15, %v1327_v24  ;;  %2748 = vmatpush.msrb.mxu1 %v2215_v40  ;;  %v3785_v15 = vld [vmem:[%s4199_s30 + $0x169] sm:$0xff]  ;;  %v2182_v24 = vld [vmem:[%s7118_s3 + $0x140] sm:$0xff]  ;;  %2862 = vmatpush.msrb.mxu2 %v2230_v25 }
 0x2b0   : > { %v1665_v50 = vpop.f32.mrf.mxu0  ;;  %2523 = vmatpush.msrb.mxu3 %v2182_v24  ;;  %v2180_v40 = vld [vmem:[%s7118_s3 + $0x130] sm:$0xff] }
 0x2b1   : > { %v1663_v16 = vadd.f32 %v1662_v39, %v1550_v38  ;;  %v3817_v38 = vld [vmem:[%s4199_s30 + $0x16a] sm:$0xff] }
 0x2b2   : > { %v3786_v24 = vld [vmem:[%s4199_s30 + $0x171] sm:$0xff] }
 0x2b3   : > { %v1742_v32 = vmax.f32 %v1663_v16, 0.0  ;;  %1599 = vmatmul.f32.gmra.mxu3 %v3784_v54  ;;  %1712 = vmatmul.f32.gmra.mxu0 %v3816_v60  ;;  %v1330_v54 = vadd.f32 %v5403_v28, %v5277_v45  ;;  %v2198_v16 = vld [vmem:[%s7118_s3 + $0x1c0] sm:$0xff]  ;;  %v2197_v45 = vld [vmem:[%s7118_s3 + $0x1b8] sm:$0xff] }
 0x2b4   : > { %v5742_v6 = vld [vmem:[#allocation2 + $0x68] sm:$0xff]  ;;  %2636 = vmatpush.msrb.mxu0 %v2198_v16  ;;  %v3818_v16 = vld [vmem:[%s4199_s30 + $0x172] sm:$0xff] }
 0x2b5   : > { %1829 = vst [vmem:[#allocation2 + $0x79] sm:$0xff] %v1742_v32  ;;  %2333 = vmatmul.f32.gmra.mxu1 %v5742_v6  ;;  %2449 = vmatmul.f32.gmra.mxu2 %v1742_v32  ;;  %v5801_v25 = vpop.f32.mrf.mxu1 }
 0x2b6   : > { %v1552_v39 = vpop.f32.mrf.mxu3  ;;  %2637 = vmatpush.msrb.mxu0 %v2197_v45  ;;  %v2178_v45 = vld [vmem:[%s7118_s3 + $0x120] sm:$0xff] }
 0x2b7   : > { %v1553_v22 = vadd.f32 %v1552_v39, %v1440_v33  ;;  %v2181_v33 = vld [vmem:[%s7118_s3 + $0x138] sm:$0xff]  ;;  %v2196_v39 = vld [vmem:[%s7118_s3 + $0x1b0] sm:$0xff] }
 0x2b8   : > { %v1668_v43 = vpop.f32.mrf.mxu0  ;;  %2524 = vmatpush.msrb.mxu3 %v2181_v33  ;;  %2638 = vmatpush.msrb.mxu0 %v2196_v39 }
 0x2b9   : > { %v1666_v60 = vadd.f32 %v1665_v50, %v1553_v22  ;;  %v1443_v50 = vadd.f32 %v5396_v14, %v1330_v54  ;;  %v5783_v22 = vpop.f32.mrf.mxu2  ;;  %v2195_v54 = vld [vmem:[%s7118_s3 + $0x1a8] sm:$0xff] }
 0x2ba   : > { %2525 = vmatpush.msrb.mxu3 %v2180_v40  ;;  %2639 = vmatpush.msrb.mxu0 %v2195_v54 }
 0x2bb   : > { %v1743_v32 = vmax.f32 %v1666_v60, 0.0  ;;  %1602 = vmatmul.f32.gmra.mxu3 %v3785_v15  ;;  %1715 = vmatmul.f32.gmra.mxu0 %v3817_v38  ;;  %v2179_v38 = vld [vmem:[%s7118_s3 + $0x128] sm:$0xff] }
 0x2bc   : > { %v5770_v28 = vld [vmem:[#allocation2 + $0x78] sm:$0xff]  ;;  %2526 = vmatpush.msrb.mxu3 %v2179_v38  ;;  %v2192_v38 = vld [vmem:[%s7118_s3 + $0x190] sm:$0xff] }
 0x2bd   : > { %1830 = vst [vmem:[#allocation2 + $0x81] sm:$0xff] %v1743_v32  ;;  %2336 = vmatmul.f32.gmra.mxu1 %v5770_v28  ;;  %2452 = vmatmul.f32.gmra.mxu2 %v1743_v32  ;;  %v1333_v32 = vadd.f32 %v5417_v3, %v5292_v47  ;;  %v2177_v47 = vld [vmem:[%s7118_s3 + $0x118] sm:$0xff] }
 0x2be   : > { %v1555_v14 = vpop.f32.mrf.mxu3  ;;  %2527 = vmatpush.msrb.mxu3 %v2178_v45  ;;  %v2193_v3 = vld [vmem:[%s7118_s3 + $0x198] sm:$0xff]  ;;  %v3787_v45 = vld [vmem:[%s4199_s30 + $0x181] sm:$0xff] }
 0x2bf   : > { %v1556_v15 = vadd.f32 %v1555_v14, %v1443_v50  ;;  %v2194_v50 = vld [vmem:[%s7118_s3 + $0x1a0] sm:$0xff]  ;;  %v1446_v39 = vadd.f32 %v5413_v10, %v1333_v32 }
 0x2c0   : > { %v1671_v60 = vpop.f32.mrf.mxu0  ;;  %2640 = vmatpush.msrb.mxu0 %v2194_v50  ;;  %2528 = vmatpush.msrb.mxu3 %v2177_v47  ;;  %v2214_v14 = vld [vmem:[%s7118_s3 + $0x240] sm:$0xff] }
 0x2c1   : > { %v1669_v33 = vadd.f32 %v1668_v43, %v1556_v15  ;;  %v2176_v15 = vld [vmem:[%s7118_s3 + $0x110] sm:$0xff]  ;;  %2749 = vmatpush.msrb.mxu1 %v2214_v14  ;;  %v5828_v32 = vpop.f32.mrf.mxu2  ;;  %v3819_v50 = vld [vmem:[%s4199_s30 + $0x182] sm:$0xff] }
 0x2c2   : > { %2641 = vmatpush.msrb.mxu0 %v2193_v3  ;;  %2529 = vmatpush.msrb.mxu3 %v2176_v15  ;;  %v2174_v3 = vld [vmem:[%s7118_s3 + $0x100] sm:$0xff]  ;;  %v5840_v15 = vpop.f32.mrf.mxu1 }
 0x2c3   : > { %v1744_v40 = vmax.f32 %v1669_v33, 0.0  ;;  %1605 = vmatmul.f32.gmra.mxu3 %v3786_v24  ;;  %1718 = vmatmul.f32.gmra.mxu0 %v3818_v16  ;;  %v2175_v24 = vld [vmem:[%s7118_s3 + $0x108] sm:$0xff] }
 0x2c4   : > { %v5809_v43 = vld [vmem:[#allocation2 + $0x80] sm:$0xff]  ;;  %v2191_v16 = vld [vmem:[%s7118_s3 + $0x188] sm:$0xff]  ;;  %2642 = vmatpush.msrb.mxu0 %v2192_v38  ;;  %2530 = vmatpush.msrb.mxu3 %v2175_v24 }
 0x2c5   : > { %1831 = vst [vmem:[#allocation2 + $0x91] sm:$0xff] %v1744_v40  ;;  %2339 = vmatmul.f32.gmra.mxu1 %v5809_v43  ;;  %2455 = vmatmul.f32.gmra.mxu2 %v1744_v40  ;;  %v1336_v40 = vadd.f32 %v5436_v49, %v5304_v12  ;;  %v2229_v49 = vld [vmem:[%s7118_s3 + $0x2b8] sm:$0xff]  ;;  %v3788_v24 = vld [vmem:[%s4199_s30 + $0x189] sm:$0xff] }
 0x2c6   : > { %v1558_v54 = vpop.f32.mrf.mxu3  ;;  %2643 = vmatpush.msrb.mxu0 %v2191_v16  ;;  %2531 = vmatpush.msrb.mxu3 %v2174_v3  ;;  %v3820_v16 = vld [vmem:[%s4199_s30 + $0x18a] sm:$0xff] }
 0x2c7   : > { %v1559_v10 = vadd.f32 %v1558_v54, %v1446_v39  ;;  %v2190_v39 = vld [vmem:[%s7118_s3 + $0x180] sm:$0xff]  ;;  %v1449_v12 = vadd.f32 %v5429_v59, %v1336_v40  ;;  %2863 = vmatpush.msrb.mxu2 %v2229_v49 }
 0x2c8   : > { %v1674_v33 = vpop.f32.mrf.mxu0  ;;  %2644 = vmatpush.msrb.mxu0 %v2190_v39  ;;  %v3821_v49 = vld [vmem:[%s4199_s30 + $0x19a] sm:$0xff] }
 0x2c9   : > { %v1672_v47 = vadd.f32 %v1671_v60, %v1559_v10  ;;  %v5853_v59 = vpop.f32.mrf.mxu2 }
 0x2cb   : > { %v1745_v14 = vmax.f32 %v1672_v47, 0.0  ;;  %1608 = vmatmul.f32.gmra.mxu3 %v3787_v45  ;;  %1721 = vmatmul.f32.gmra.mxu0 %v3819_v50  ;;  %v1339_v45 = vadd.f32 %v5448_v5, %v5316_v8  ;;  %v2213_v8 = vld [vmem:[%s7118_s3 + $0x238] sm:$0xff]  ;;  %v5862_v5 = vpop.f32.mrf.mxu1 }
 0x2cc   : > { %v5842_v38 = vld [vmem:[#allocation2 + $0x90] sm:$0xff]  ;;  %2750 = vmatpush.msrb.mxu1 %v2213_v8  ;;  %v3822_v8 = vld [vmem:[%s4199_s30 + $0x1a2] sm:$0xff] }
 0x2cd   : > { %1832 = vst [vmem:[#allocation2 + $0x99] sm:$0xff] %v1745_v14  ;;  %2342 = vmatmul.f32.gmra.mxu1 %v5842_v38  ;;  %2458 = vmatmul.f32.gmra.mxu2 %v1745_v14  ;;  %v1452_v3 = vadd.f32 %v5442_v52, %v1339_v45 }
 0x2ce   : > { %v1561_v60 = vpop.f32.mrf.mxu3 }
 0x2cf   : > { %v1562_v54 = vadd.f32 %v1561_v60, %v1449_v12  ;;  %v3789_v12 = vld [vmem:[%s4199_s30 + $0x199] sm:$0xff]  ;;  %v1342_v60 = vadd.f32 %v5463_v9, %v5328_v21  ;;  %v2228_v21 = vld [vmem:[%s7118_s3 + $0x2b0] sm:$0xff] }
 0x2d0   : > { %v1677_v10 = vpop.f32.mrf.mxu0  ;;  %2864 = vmatpush.msrb.mxu2 %v2228_v21  ;;  %v1348_v21 = vadd.f32 %v5509_v27, %v5352_v20 }
 0x2d1   : > { %v1675_v50 = vadd.f32 %v1674_v33, %v1562_v54  ;;  %v1455_v45 = vadd.f32 %v5458_v37, %v1342_v60 }
 0x2d3   : > { %v1746_v40 = vmax.f32 %v1675_v50, 0.0  ;;  %1611 = vmatmul.f32.gmra.mxu3 %v3788_v24  ;;  %1724 = vmatmul.f32.gmra.mxu0 %v3820_v16  ;;  %v5868_v24 = vpop.f32.mrf.mxu2  ;;  %v5877_v50 = vpop.f32.mrf.mxu1 }
 0x2d4   : > { %v5855_v47 = vld [vmem:[#allocation2 + $0x98] sm:$0xff] }
 0x2d5   : > { %1833 = vst [vmem:[#allocation2 + $0xa9] sm:$0xff] %v1746_v40  ;;  %2345 = vmatmul.f32.gmra.mxu1 %v5855_v47  ;;  %2461 = vmatmul.f32.gmra.mxu2 %v1746_v40 }
 0x2d6   : > { %v1564_v33 = vpop.f32.mrf.mxu3 }
 0x2d7   : > { %v1565_v39 = vadd.f32 %v1564_v33, %v1452_v3  ;;  %v3790_v3 = vld [vmem:[%s4199_s30 + $0x1a1] sm:$0xff]  ;;  %v1345_v33 = vadd.f32 %v5479_v23, %v5341_v0 }
 0x2d8   : > { %v1680_v14 = vpop.f32.mrf.mxu0 }
 0x2d9   : > { %v1678_v52 = vadd.f32 %v1677_v10, %v1565_v39  ;;  %v1458_v60 = vadd.f32 %v5470_v57, %v1345_v33 }
 0x2db   : > { %v1747_v54 = vmax.f32 %v1678_v52, 0.0  ;;  %1614 = vmatmul.f32.gmra.mxu3 %v3789_v12  ;;  %1727 = vmatmul.f32.gmra.mxu0 %v3821_v49  ;;  %v5885_v49 = vpop.f32.mrf.mxu2  ;;  %v2212_v52 = vld [vmem:[%s7118_s3 + $0x230] sm:$0xff] }
 0x2dc   : > { %v5870_v16 = vld [vmem:[#allocation2 + $0xa8] sm:$0xff]  ;;  %2751 = vmatpush.msrb.mxu1 %v2212_v52 }
 0x2dd   : > { %1834 = vst [vmem:[#allocation2 + $0xb1] sm:$0xff] %v1747_v54  ;;  %2348 = vmatmul.f32.gmra.mxu1 %v5870_v16  ;;  %2464 = vmatmul.f32.gmra.mxu2 %v1747_v54 }
 0x2de   : > { %v1567_v9 = vpop.f32.mrf.mxu3 }
 0x2df   : > { %v1568_v10 = vadd.f32 %v1567_v9, %v1455_v45  ;;  %v1917_v45 = vld [vmem:[#allocation2 + $0x2] sm:$0xff] }
 0x2e0   : > { %v1683_v40 = vpop.f32.mrf.mxu0 }
 0x2e1   : > { %v1681_v37 = vadd.f32 %v1680_v14, %v1568_v10  ;;  %v5892_v14 = vpop.f32.mrf.mxu1 }
 0x2e3   : > { %v1748_v39 = vmax.f32 %v1681_v37, 0.0  ;;  %1617 = vmatmul.f32.gmra.mxu3 %v3790_v3  ;;  %1730 = vmatmul.f32.gmra.mxu0 %v3822_v8  ;;  %v1461_v3 = vadd.f32 %v5495_v19, %v1348_v21  ;;  %v2227_v8 = vld [vmem:[%s7118_s3 + $0x2a8] sm:$0xff]  ;;  %v5904_v37 = vpop.f32.mrf.mxu2 }
 0x2e4   : > { %v5883_v12 = vld [vmem:[#allocation2 + $0xb0] sm:$0xff]  ;;  %2865 = vmatpush.msrb.mxu2 %v2227_v8 }
 0x2e5   : > { %1835 = vst [vmem:[#allocation2 + $0xc1] sm:$0xff] %v1748_v39  ;;  %2351 = vmatmul.f32.gmra.mxu1 %v5883_v12  ;;  %2467 = vmatmul.f32.gmra.mxu2 %v1748_v39 }
 0x2e6   : > { %v1570_v54 = vpop.f32.mrf.mxu3 }
 0x2e7   : > { %v1571_v0 = vadd.f32 %v1570_v54, %v1458_v60 }
 0x2e8   : > { %v1686_v23 = vpop.f32.mrf.mxu0 }
 0x2e9   : > { %v1684_v9 = vadd.f32 %v1683_v40, %v1571_v0  ;;  %v1918_v40 = vld [vmem:[#allocation2 + $0xa] sm:$0xff]  ;;  %v5908_v19 = vpop.f32.mrf.mxu1 }
 0x2ea   : > { %v2211_v0 = vld [vmem:[%s7118_s3 + $0x228] sm:$0xff] }
 0x2eb   : > { %v1749_v57 = vmax.f32 %v1684_v9, 0.0  ;;  %2532 = vmatmul.f32.vlgmr.msrb.gmra.mxu3 %v1917_v45  ;;  %2645 = vmatmul.f32.vlgmr.msrb.gmra.mxu0 %v5632_v55  ;;  %v1351_v55 = vadd.f32 %v5532_v26, %v5365_v18 }
 0x2ec   : > { %v5897_v10 = vld [vmem:[#allocation2 + $0xc0] sm:$0xff]  ;;  %2752 = vmatpush.msrb.mxu1 %v2211_v0 }
 0x2ed   : > { %1836 = vst [vmem:[#allocation2 + $0xc9] sm:$0xff] %v1749_v57  ;;  %2354 = vmatmul.f32.gmra.mxu1 %v5897_v10  ;;  %2470 = vmatmul.f32.gmra.mxu2 %v1749_v57  ;;  %v1464_v54 = vadd.f32 %v5519_v36, %v1351_v55  ;;  %v5924_v36 = vld [vmem:[#allocation2 + $0x1a] sm:$0xff] }
 0x2ee   : > { %v1573_v33 = vpop.f32.mrf.mxu3 }
 0x2ef   : > { %v1574_v20 = vadd.f32 %v1573_v33, %v1461_v3 }
 0x2f0   : > { %v1689_v27 = vpop.f32.mrf.mxu0 }
 0x2f1   : > { %v1687_v39 = vadd.f32 %v1686_v23, %v1574_v20 }
 0x2f3   : > { %v1750_v60 = vmax.f32 %v1687_v39, 0.0  ;;  %2535 = vmatmul.f32.gmra.mxu3 %v1918_v40  ;;  %2648 = vmatmul.f32.gmra.mxu0 %v5646_v44  ;;  %v1354_v44 = vadd.f32 %v5563_v41, %v5382_v51  ;;  %v2226_v51 = vld [vmem:[%s7118_s3 + $0x2a0] sm:$0xff] }
 0x2f4   : > { %v5911_v52 = vld [vmem:[#allocation2 + $0xc8] sm:$0xff]  ;;  %2866 = vmatpush.msrb.mxu2 %v2226_v51 }
 0x2f5   : > { %1837 = vst [vmem:[#allocation2 + $0xd9] sm:$0xff] %v1750_v60  ;;  %2357 = vmatmul.f32.gmra.mxu1 %v5911_v52  ;;  %2473 = vmatmul.f32.gmra.mxu2 %v1750_v60  ;;  %v1467_v8 = vadd.f32 %v5551_v46, %v1354_v44  ;;  %v5941_v46 = vld [vmem:[#allocation2 + $0x22] sm:$0xff] }
 0x2f6   : > { %v1576_v18 = vpop.f32.mrf.mxu3 }
 0x2f7   : > { %v1577_v26 = vadd.f32 %v1576_v18, %v1464_v54 }
 0x2f8   : > { %v1692_v23 = vpop.f32.mrf.mxu0  ;;  %v5918_v45 = vpop.f32.mrf.mxu2 }
 0x2f9   : > { %v1690_v21 = vadd.f32 %v1689_v27, %v1577_v26 }
 0x2fa   : > { %v5922_v9 = vpop.f32.mrf.mxu1 }
 0x2fb   : > { %v1751_v57 = vmax.f32 %v1690_v21, 0.0  ;;  %2538 = vmatmul.f32.gmra.mxu3 %v5924_v36  ;;  %2651 = vmatmul.f32.gmra.mxu0 %v5662_v4  ;;  %v1357_v4 = vadd.f32 %v5589_v1, %v5394_v62  ;;  %v2210_v62 = vld [vmem:[%s7118_s3 + $0x220] sm:$0xff] }
 0x2fc   : > { %v5928_v3 = vld [vmem:[#allocation2 + $0xd8] sm:$0xff]  ;;  %2753 = vmatpush.msrb.mxu1 %v2210_v62 }
 0x2fd   : > { %1838 = vst [vmem:[#allocation2 + $0xe1] sm:$0xff] %v1751_v57  ;;  %2360 = vmatmul.f32.gmra.mxu1 %v5928_v3  ;;  %2476 = vmatmul.f32.gmra.mxu2 %v1751_v57  ;;  %v1470_v54 = vadd.f32 %v5576_v53, %v1357_v4  ;;  %v5958_v53 = vld [vmem:[#allocation2 + $0x32] sm:$0xff] }
 0x2fe   : > { %v1579_v41 = vpop.f32.mrf.mxu3 }
 0x2ff   : > { %v1580_v33 = vadd.f32 %v1579_v41, %v1467_v8 }
 0x300   : > { %v1695_v20 = vpop.f32.mrf.mxu0  ;;  %v5935_v27 = vpop.f32.mrf.mxu2 }
 0x301   : > { %v1693_v40 = vadd.f32 %v1692_v23, %v1580_v33 }
 0x302   : > { %v5939_v55 = vpop.f32.mrf.mxu1 }
 0x303   : > { %v1752_v39 = vmax.f32 %v1693_v40, 0.0  ;;  %2541 = vmatmul.f32.gmra.mxu3 %v5941_v46  ;;  %2654 = vmatmul.f32.gmra.mxu0 %v5676_v29  ;;  %v1360_v29 = vadd.f32 %v5616_v11, %v5408_v63  ;;  %v2225_v63 = vld [vmem:[%s7118_s3 + $0x298] sm:$0xff] }
 0x304   : > { %v5945_v60 = vld [vmem:[#allocation2 + $0xe0] sm:$0xff]  ;;  %2867 = vmatpush.msrb.mxu2 %v2225_v63 }
 0x305   : > { %1839 = vst [vmem:[#allocation2 + $0xf1] sm:$0xff] %v1752_v39  ;;  %2363 = vmatmul.f32.gmra.mxu1 %v5945_v60  ;;  %2479 = vmatmul.f32.gmra.mxu2 %v1752_v39  ;;  %v1473_v8 = vadd.f32 %v5607_v17, %v1360_v29  ;;  %v5975_v17 = vld [vmem:[#allocation2 + $0x3a] sm:$0xff] }
 0x306   : > { %v1582_v1 = vpop.f32.mrf.mxu3 }
 0x307   : > { %v1583_v0 = vadd.f32 %v1582_v1, %v1470_v54 }
 0x308   : > { %v1698_v18 = vpop.f32.mrf.mxu0  ;;  %v5952_v26 = vpop.f32.mrf.mxu2 }
 0x309   : > { %v1696_v23 = vadd.f32 %v1695_v20, %v1583_v0 }
 0x30a   : > { %v5956_v44 = vpop.f32.mrf.mxu1 }
 0x30b   : > { %v1753_v21 = vmax.f32 %v1696_v23, 0.0  ;;  %2544 = vmatmul.f32.gmra.mxu3 %v5958_v53  ;;  %2657 = vmatmul.f32.gmra.mxu0 %v5692_v56  ;;  %v1363_v56 = vadd.f32 %v5630_v61, %v5422_v35  ;;  %v2209_v35 = vld [vmem:[%s7118_s3 + $0x218] sm:$0xff] }
 0x30c   : > { %v5962_v57 = vld [vmem:[#allocation2 + $0xf0] sm:$0xff]  ;;  %2754 = vmatpush.msrb.mxu1 %v2209_v35 }
 0x30d   : > { %1840 = vst [vmem:[#allocation2 + $0xf9] sm:$0xff] %v1753_v21  ;;  %2366 = vmatmul.f32.gmra.mxu1 %v5962_v57  ;;  %2482 = vmatmul.f32.gmra.mxu2 %v1753_v21  ;;  %v1476_v54 = vadd.f32 %v5626_v42, %v1363_v56  ;;  %v5992_v42 = vld [vmem:[#allocation2 + $0x4a] sm:$0xff]  ;;  %v6009_v35 = vld [vmem:[#allocation2 + $0x52] sm:$0xff] }
 0x30e   : > { %v1585_v11 = vpop.f32.mrf.mxu3  ;;  %v7284_v56 = vld [vmem:[#allocation6_spill] sm:$0xff] }
 0x30f   : > { %v1586_v51 = vadd.f32 %v1585_v11, %v1473_v8  ;;  %v7283_v8 = vld [vmem:[#allocation12_spill] sm:$0xff] }
 0x310   : > { %v1701_v41 = vpop.f32.mrf.mxu0  ;;  %v5969_v33 = vpop.f32.mrf.mxu2 }
 0x311   : > { %v1699_v20 = vadd.f32 %v1698_v18, %v1586_v51 }
 0x312   : > { %v5973_v4 = vpop.f32.mrf.mxu1 }
 0x313   : > { %v1754_v40 = vmax.f32 %v1699_v20, 0.0  ;;  %2547 = vmatmul.f32.gmra.mxu3 %v5975_v17  ;;  %2660 = vmatmul.f32.gmra.mxu0 %v5708_v31  ;;  %v1366_v31 = vadd.f32 %v5655_v30, %v5434_v48  ;;  %v2224_v48 = vld [vmem:[%s7118_s3 + $0x290] sm:$0xff] }
 0x314   : > { %v5979_v39 = vld [vmem:[#allocation2 + $0xf8] sm:$0xff]  ;;  %2868 = vmatpush.msrb.mxu2 %v2224_v48 }
 0x315   : > { %1841 = vst [vmem:[#allocation2 + $0x109] sm:$0xff] %v1754_v40  ;;  %2369 = vmatmul.f32.gmra.mxu1 %v5979_v39  ;;  %2485 = vmatmul.f32.gmra.mxu2 %v1754_v40  ;;  %v1479_v63 = vadd.f32 %v7283_v8, %v1366_v31  ;;  %v7286_v31 = vld [vmem:[#allocation25_spill] sm:$0xff] }
 0x316   : > { %v1588_v61 = vpop.f32.mrf.mxu3 }
 0x317   : > { %v1589_v62 = vadd.f32 %v1588_v61, %v1476_v54 }
 0x318   : > { %v1704_v1 = vpop.f32.mrf.mxu0  ;;  %v5986_v0 = vpop.f32.mrf.mxu2 }
 0x319   : > { %v1702_v18 = vadd.f32 %v1701_v41, %v1589_v62 }
 0x31a   : > { %v5990_v29 = vpop.f32.mrf.mxu1 }
 0x31b   : > { %v1755_v23 = vmax.f32 %v1702_v18, 0.0  ;;  %2550 = vmatmul.f32.gmra.mxu3 %v5992_v42  ;;  %2663 = vmatmul.f32.gmra.mxu0 %v5724_v2  ;;  %v7285_v2 = vld [vmem:[#allocation14_spill] sm:$0xff] }
 0x31c   : > { %v5996_v21 = vld [vmem:[#allocation2 + $0x108] sm:$0xff]  ;;  %v1369_v20 = vadd.f32 %v7285_v2, %v7284_v56 }
 0x31d   : > { %1842 = vst [vmem:[#allocation2 + $0x111] sm:$0xff] %v1755_v23  ;;  %2372 = vmatmul.f32.gmra.mxu1 %v5996_v21  ;;  %2488 = vmatmul.f32.gmra.mxu2 %v1755_v23 }
 0x31e   : > { %v1591_v30 = vpop.f32.mrf.mxu3  ;;  %v1482_v18 = vadd.f32 %v7286_v31, %v1369_v20  ;;  %v6026_v20 = vld [vmem:[#allocation2 + $0x62] sm:$0xff]  ;;  %v7291_v31 = vld [vmem:[#allocation16_spill] sm:$0xff] }
 0x31f   : > { %v1592_v11 = vadd.f32 %v1591_v30, %v1479_v63  ;;  %v7288_v30 = vld [vmem:[#allocation21_spill] sm:$0xff] }
 0x320   : > { %v1707_v51 = vpop.f32.mrf.mxu0  ;;  %v6003_v41 = vpop.f32.mrf.mxu2 }
 0x321   : > { %v1705_v40 = vadd.f32 %v1704_v1, %v1592_v11  ;;  %v2208_v1 = vld [vmem:[%s7118_s3 + $0x210] sm:$0xff] }
 0x322   : > { %v6007_v54 = vpop.f32.mrf.mxu1  ;;  %2755 = vmatpush.msrb.mxu1 %v2208_v1 }
 0x323   : > { %v1756_v61 = vmax.f32 %v1705_v40, 0.0  ;;  %2553 = vmatmul.f32.gmra.mxu3 %v6009_v35  ;;  %2666 = vmatmul.f32.gmra.mxu0 %v5742_v6  ;;  %v7289_v6 = vld [vmem:[#allocation33_spill] sm:$0xff] }
 0x324   : > { %v6013_v62 = vld [vmem:[#allocation2 + $0x110] sm:$0xff]  ;;  %v1372_v11 = vadd.f32 %v7289_v6, %v7288_v30 }
 0x325   : > { %1843 = vst [vmem:[#allocation2 + $0x121] sm:$0xff] %v1756_v61  ;;  %2375 = vmatmul.f32.gmra.mxu1 %v6013_v62  ;;  %2491 = vmatmul.f32.gmra.mxu2 %v1756_v61  ;;  %v7293_v6 = vld [vmem:[#allocation11_spill] sm:$0xff] }
 0x326   : > { %v1594_v23 = vpop.f32.mrf.mxu3 }
 0x327   : > { %v1595_v8 = vadd.f32 %v1594_v23, %v1482_v18  ;;  %v1485_v18 = vadd.f32 %v7291_v31, %v1372_v11  ;;  %v6043_v11 = vld [vmem:[#allocation2 + $0x6a] sm:$0xff] }
 0x328   : > { %v1710_v63 = vpop.f32.mrf.mxu0  ;;  %v6020_v48 = vpop.f32.mrf.mxu2 }
 0x329   : > { %7287 = vst [vmem:[#allocation31_spill] sm:$0xff] %v6020_v48  ;;  %v1708_v56 = vadd.f32 %v1707_v51, %v1595_v8  ;;  %v2223_v51 = vld [vmem:[%s7118_s3 + $0x288] sm:$0xff] }
 0x32a   : > { %v6024_v2 = vpop.f32.mrf.mxu1  ;;  %2869 = vmatpush.msrb.mxu2 %v2223_v51  ;;  %v7296_v51 = vld [vmem:[#allocation23_spill] sm:$0xff] }
 0x32b   : > { %7290 = vst [vmem:[#allocation20_spill] sm:$0xff] %v6024_v2  ;;  %v1757_v40 = vmax.f32 %v1708_v56, 0.0  ;;  %2556 = vmatmul.f32.gmra.mxu3 %v6026_v20  ;;  %2669 = vmatmul.f32.gmra.mxu0 %v5770_v28  ;;  %v7294_v28 = vld [vmem:[#allocation18_spill] sm:$0xff] }
 0x32c   : > { %v6030_v61 = vld [vmem:[#allocation2 + $0x120] sm:$0xff]  ;;  %v1375_v56 = vadd.f32 %v7294_v28, %v7293_v6  ;;  %v7298_v28 = vld [vmem:[#allocation8_spill] sm:$0xff] }
 0x32d   : > { %1844 = vst [vmem:[#allocation2 + $0x129] sm:$0xff] %v1757_v40  ;;  %2378 = vmatmul.f32.gmra.mxu1 %v6030_v61  ;;  %2494 = vmatmul.f32.gmra.mxu2 %v1757_v40 }
 0x32e   : > { %v1597_v1 = vpop.f32.mrf.mxu3 }
 0x32f   : > { %v1598_v23 = vadd.f32 %v1597_v1, %v1485_v18  ;;  %v1488_v18 = vadd.f32 %v7296_v51, %v1375_v56  ;;  %v6060_v56 = vld [vmem:[#allocation2 + $0x7a] sm:$0xff] }
 0x330   : > { %v1713_v8 = vpop.f32.mrf.mxu0  ;;  %v6037_v30 = vpop.f32.mrf.mxu2 }
 0x331   : > { %7292 = vst [vmem:[#allocation22_spill] sm:$0xff] %v6037_v30  ;;  %v1711_v48 = vadd.f32 %v1710_v63, %v1598_v23  ;;  %v2207_v63 = vld [vmem:[%s7118_s3 + $0x208] sm:$0xff] }
 0x332   : > { %v6041_v2 = vpop.f32.mrf.mxu1  ;;  %2756 = vmatpush.msrb.mxu1 %v2207_v63 }
 0x333   : > { %7295 = vst [vmem:[#allocation29_spill] sm:$0xff] %v6041_v2  ;;  %v1758_v31 = vmax.f32 %v1711_v48, 0.0  ;;  %2559 = vmatmul.f32.gmra.mxu3 %v6043_v11  ;;  %2672 = vmatmul.f32.gmra.mxu0 %v5809_v43  ;;  %v1378_v43 = vadd.f32 %v5734_v7, %v7298_v28  ;;  %v2222_v7 = vld [vmem:[%s7118_s3 + $0x280] sm:$0xff] }
 0x334   : > { %v6047_v40 = vld [vmem:[#allocation2 + $0x128] sm:$0xff]  ;;  %2870 = vmatpush.msrb.mxu2 %v2222_v7 }
 0x335   : > { %1845 = vst [vmem:[#allocation2 + $0x139] sm:$0xff] %v1758_v31  ;;  %2381 = vmatmul.f32.gmra.mxu1 %v6047_v40  ;;  %2497 = vmatmul.f32.gmra.mxu2 %v1758_v31 }
 0x336   : > { %v1600_v1 = vpop.f32.mrf.mxu3 }
 0x337   : > { %v1601_v23 = vadd.f32 %v1600_v1, %v1488_v18  ;;  %v1491_v18 = vadd.f32 %v5722_v58, %v1378_v43  ;;  %v6077_v58 = vld [vmem:[#allocation2 + $0x82] sm:$0xff] }
 0x338   : > { %v1716_v48 = vpop.f32.mrf.mxu0  ;;  %v6054_v6 = vpop.f32.mrf.mxu2 }
 0x339   : > { %7297 = vst [vmem:[#allocation24_spill] sm:$0xff] %v6054_v6  ;;  %v1714_v30 = vadd.f32 %v1713_v8, %v1601_v23  ;;  %v7300_v23 = vld [vmem:[#allocation19_spill] sm:$0xff] }
 0x33a   : > { %v6058_v2 = vpop.f32.mrf.mxu1 }
 0x33b   : > { %v1759_v51 = vmax.f32 %v1714_v30, 0.0  ;;  %2562 = vmatmul.f32.gmra.mxu3 %v6060_v56  ;;  %2675 = vmatmul.f32.gmra.mxu0 %v5842_v38  ;;  %v1381_v38 = vadd.f32 %v5752_v34, %v7300_v23  ;;  %v2206_v34 = vld [vmem:[%s7118_s3 + $0x200] sm:$0xff] }
 0x33c   : > { %v6064_v31 = vld [vmem:[#allocation2 + $0x138] sm:$0xff]  ;;  %2757 = vmatpush.msrb.mxu1 %v2206_v34  ;;  %v7302_v23 = vld [vmem:[#allocation9_spill] sm:$0xff] }
 0x33d   : > { %1846 = vst [vmem:[#allocation2 + $0x141] sm:$0xff] %v1759_v51  ;;  %2384 = vmatmul.f32.gmra.mxu1 %v6064_v31  ;;  %2500 = vmatmul.f32.gmra.mxu2 %v1759_v51 }
 0x33e   : > { %v1603_v8 = vpop.f32.mrf.mxu3 }
 0x33f   : > { %v1604_v63 = vadd.f32 %v1603_v8, %v1491_v18  ;;  %v1494_v18 = vadd.f32 %v5740_v13, %v1381_v38  ;;  %v6094_v13 = vld [vmem:[#allocation2 + $0x92] sm:$0xff] }
 0x340   : > { %v1719_v30 = vpop.f32.mrf.mxu0  ;;  %v6071_v1 = vpop.f32.mrf.mxu2 }
 0x341   : > { %7299 = vst [vmem:[#allocation37_spill] sm:$0xff] %v6071_v1  ;;  %v1717_v28 = vadd.f32 %v1716_v48, %v1604_v63 }
 0x342   : > { %v6075_v6 = vpop.f32.mrf.mxu1 }
 0x343   : > { %v1760_v43 = vmax.f32 %v1717_v28, 0.0  ;;  %2565 = vmatmul.f32.gmra.mxu3 %v6077_v58  ;;  %2678 = vmatmul.f32.gmra.mxu0 %v5855_v47  ;;  %v1384_v47 = vadd.f32 %v5801_v25, %v7302_v23  ;;  %v2253_v25 = vld [vmem:[%s7118_s3 + $0x378] sm:$0xff]  ;;  %v7304_v23 = vld [vmem:[#allocation10_spill] sm:$0xff] }
 0x344   : > { %v6081_v51 = vld [vmem:[#allocation2 + $0x140] sm:$0xff]  ;;  %2968 = vmatpush.msra.mxu3 %v2253_v25 }
 0x345   : > { %1847 = vst [vmem:[#allocation2 + $0x151] sm:$0xff] %v1760_v43  ;;  %2387 = vmatmul.f32.gmra.mxu1 %v6081_v51  ;;  %2503 = vmatmul.f32.gmra.mxu2 %v1760_v43 }
 0x346   : > { %v1606_v48 = vpop.f32.mrf.mxu3 }
 0x347   : > { %v1607_v7 = vadd.f32 %v1606_v48, %v1494_v18  ;;  %v1497_v18 = vadd.f32 %v5783_v22, %v1384_v47  ;;  %v2269_v22 = vld [vmem:[%s7118_s3 + $0x3f8] sm:$0xff]  ;;  %v1387_v47 = vadd.f32 %v5840_v15, %v7304_v23 }
 0x348   : > { %v1722_v8 = vpop.f32.mrf.mxu0  ;;  %v6088_v63 = vpop.f32.mrf.mxu2  ;;  %3081 = vmatpush.msra.mxu0 %v2269_v22  ;;  %v7306_v22 = vld [vmem:[#allocation27_spill] sm:$0xff] }
 0x349   : > { %7301 = vst [vmem:[#allocation26_spill] sm:$0xff] %v6088_v63  ;;  %v1720_v28 = vadd.f32 %v1719_v30, %v1607_v7  ;;  %v3354_v30 = vld [vmem:[%s7120_s5 + $0x78] sm:$0xff]  ;;  %v1500_v15 = vadd.f32 %v5828_v32, %v1387_v47  ;;  %v1390_v23 = vadd.f32 %v5862_v5, %v7306_v22  ;;  %v6137_v32 = vld [vmem:[#allocation2 + $0xaa] sm:$0xff]  ;;  %v7307_v22 = vld [vmem:[#allocation17_spill] sm:$0xff] }
 0x34a   : > { %v6092_v1 = vpop.f32.mrf.mxu1  ;;  %3359 = vmatpush.msra.mxu2 %v3354_v30  ;;  %v6117_v63 = vld [vmem:[#allocation2 + $0x9a] sm:$0xff]  ;;  %v3353_v5 = vld [vmem:[%s7120_s5 + $0x70] sm:$0xff] }
 0x34b   : > { %7303 = vst [vmem:[#allocation28_spill] sm:$0xff] %v6092_v1  ;;  %v1761_v38 = vmax.f32 %v1720_v28, 0.0  ;;  %2568 = vmatmul.f32.gmra.mxu3 %v6094_v13  ;;  %2681 = vmatmul.f32.gmra.mxu0 %v5870_v16 }
 0x34c   : > { %v6098_v43 = vld [vmem:[#allocation2 + $0x150] sm:$0xff]  ;;  %3360 = vmatpush.msra.mxu2 %v3353_v5 }
 0x34d   : > { %1848 = vst [vmem:[#allocation2 + $0x159] sm:$0xff] %v1761_v38  ;;  %2390 = vmatmul.f32.gmra.mxu1 %v6098_v43  ;;  %2506 = vmatmul.f32.gmra.mxu2 %v1761_v38 }
 0x34e   : > { %v1609_v34 = vpop.f32.mrf.mxu3 }
 0x34f   : > { %v1610_v16 = vadd.f32 %v1609_v34, %v1497_v18  ;;  %v2285_v18 = vld [vmem:[%s7118_s3 + $0x478] sm:$0xff] }
 0x350   : > { %v1725_v48 = vpop.f32.mrf.mxu0  ;;  %v6108_v7 = vpop.f32.mrf.mxu2  ;;  %3194 = vmatpush.msra.mxu1 %v2285_v18 }
 0x351   : > { %v1723_v28 = vadd.f32 %v1722_v8, %v1610_v16 }
 0x352   : > { %v6115_v38 = vpop.f32.mrf.mxu1 }
 0x353   : > { %v1762_v1 = vmax.f32 %v1723_v28, 0.0  ;;  %2571 = vmatmul.f32.gmra.mxu3 %v6117_v63  ;;  %2684 = vmatmul.f32.gmra.mxu0 %v5883_v12  ;;  %v2252_v12 = vld [vmem:[%s7118_s3 + $0x370] sm:$0xff] }
 0x354   : > { %v6124_v25 = vld [vmem:[#allocation2 + $0x158] sm:$0xff]  ;;  %2969 = vmatpush.msra.mxu3 %v2252_v12 }
 0x355   : > { %1849 = vst [vmem:[#allocation2 + $0x169] sm:$0xff] %v1762_v1  ;;  %2393 = vmatmul.f32.gmra.mxu1 %v6124_v25  ;;  %2509 = vmatmul.f32.gmra.mxu2 %v1762_v1 }
 0x356   : > { %v1612_v8 = vpop.f32.mrf.mxu3 }
 0x357   : > { %v1613_v30 = vadd.f32 %v1612_v8, %v1500_v15  ;;  %v1503_v15 = vadd.f32 %v5853_v59, %v1390_v23  ;;  %v1393_v59 = vadd.f32 %v5877_v50, %v7307_v22  ;;  %v2251_v22 = vld [vmem:[%s7118_s3 + $0x368] sm:$0xff] }
 0x358   : > { %v1728_v34 = vpop.f32.mrf.mxu0  ;;  %v6128_v16 = vpop.f32.mrf.mxu2  ;;  %2970 = vmatpush.msra.mxu3 %v2251_v22 }
 0x359   : > { %7305 = vst [vmem:[#allocation35_spill] sm:$0xff] %v6128_v16  ;;  %v1726_v28 = vadd.f32 %v1725_v48, %v1613_v30  ;;  %v1506_v50 = vadd.f32 %v5868_v24, %v1393_v59 }
 0x35a   : > { %v6135_v18 = vpop.f32.mrf.mxu1 }
 0x35b   : > { %v1763_v47 = vmax.f32 %v1726_v28, 0.0  ;;  %2574 = vmatmul.f32.gmra.mxu3 %v6137_v32  ;;  %2687 = vmatmul.f32.gmra.mxu0 %v5897_v10  ;;  %v2268_v10 = vld [vmem:[%s7118_s3 + $0x3f0] sm:$0xff] }
 0x35c   : > { %v6141_v1 = vld [vmem:[#allocation2 + $0x168] sm:$0xff]  ;;  %3082 = vmatpush.msra.mxu0 %v2268_v10 }
 0x35d   : > { %1850 = vst [vmem:[#allocation2 + $0x171] sm:$0xff] %v1763_v47  ;;  %2396 = vmatmul.f32.gmra.mxu1 %v6141_v1  ;;  %2512 = vmatmul.f32.gmra.mxu2 %v1763_v47  ;;  %v6157_v47 = vld [vmem:[#allocation2 + $0xb2] sm:$0xff] }
 0x35e   : > { %v1615_v48 = vpop.f32.mrf.mxu3 }
 0x35f   : > { %v1616_v8 = vadd.f32 %v1615_v48, %v1503_v15  ;;  %v2284_v15 = vld [vmem:[%s7118_s3 + $0x470] sm:$0xff] }
 0x360   : > { %v1731_v30 = vpop.f32.mrf.mxu0  ;;  %v6148_v12 = vpop.f32.mrf.mxu2  ;;  %3195 = vmatpush.msra.mxu1 %v2284_v15 }
 0x361   : > { %v1729_v23 = vadd.f32 %v1728_v34, %v1616_v8  ;;  %v6170_v34 = vld [vmem:[%s7119_s4] ss:$0 sm:$0xff] }
 0x362   : > { %v6155_v28 = vpop.f32.mrf.mxu1  ;;  %v2308_v24 = vadd.f32 %v6170_v34, %v5892_v14  ;;  %v3352_v14 = vld [vmem:[%s7120_s5 + $0x68] sm:$0xff] }
 0x363   : > { %v1764_v16 = vmax.f32 %v1729_v23, 0.0  ;;  %2577 = vmatmul.f32.gmra.mxu3 %v6157_v47  ;;  %2690 = vmatmul.f32.gmra.mxu0 %v5911_v52 }
 0x364   : > { %v6164_v5 = vld [vmem:[#allocation2 + $0x170] sm:$0xff]  ;;  %3361 = vmatpush.msra.mxu2 %v3352_v14 }
 0x365   : > { %1851 = vst [vmem:[#allocation2 + $0x181] sm:$0xff] %v1764_v16  ;;  %2399 = vmatmul.f32.gmra.mxu1 %v6164_v5  ;;  %2871 = vmatmul.f32.vlgmr.msrb.gmra.mxu2 %v5924_v36  ;;  %v6183_v16 = vld [vmem:[#allocation2 + $0xc2] sm:$0xff]  ;;  %v1981_v36 = vld [vmem:[#allocation2 + $0x19] sm:$0xff] }
 0x366   : > { %v1618_v52 = vpop.f32.mrf.mxu3 }
 0x367   : > { %v1619_v48 = vadd.f32 %v1618_v52, %v1506_v50  ;;  %v2421_v50 = vadd.f32 %v5885_v49, %v2308_v24  ;;  %v2311_v49 = vadd.f32 %v6170_v34, %v5908_v19 }
 0x368   : > { %v2646_v8 = vpop.f32.mrf.mxu0  ;;  %v6174_v10 = vpop.f32.mrf.mxu2 }
 0x369   : > { %v1732_v59 = vadd.f32 %v1731_v30, %v1619_v48 }
 0x36a   : > { %v6181_v23 = vpop.f32.mrf.mxu1 }
 0x36b   : > { %v1765_v15 = vmax.f32 %v1732_v59, 0.0  ;;  %2580 = vmatmul.f32.gmra.mxu3 %v6183_v16  ;;  %2693 = vmatmul.f32.gmra.mxu0 %v5928_v3  ;;  %v2267_v3 = vld [vmem:[%s7118_s3 + $0x3e8] sm:$0xff] }
 0x36c   : > { %3083 = vmatpush.msra.mxu0 %v2267_v3  ;;  %v6203_v59 = vld [vmem:[#allocation2 + $0xca] sm:$0xff] }
 0x36d   : > { %1852 = vst [vmem:[#allocation2 + $0x189] sm:$0xff] %v1765_v15  ;;  %2758 = vmatmul.f32.vlgmr.msrb.gmra.mxu1 %v1981_v36  ;;  %2874 = vmatmul.f32.gmra.mxu2 %v5941_v46  ;;  %v2283_v15 = vld [vmem:[%s7118_s3 + $0x468] sm:$0xff] }
 0x36e   : > { %v2533_v30 = vpop.f32.mrf.mxu3  ;;  %v1982_v36 = vld [vmem:[#allocation2 + $0x21] sm:$0xff]  ;;  %3196 = vmatpush.msra.mxu1 %v2283_v15 }
 0x36f   : > { %v2534_v52 = vadd.f32 %v2533_v30, %v2421_v50  ;;  %v2424_v50 = vadd.f32 %v5904_v37, %v2311_v49  ;;  %v6223_v37 = vld [vmem:[#allocation2 + $0xda] sm:$0xff] }
 0x370   : > { %v2649_v48 = vpop.f32.mrf.mxu0  ;;  %v6192_v22 = vpop.f32.mrf.mxu2 }
 0x371   : > { %v6199_v24 = vadd.f32 %v2646_v8, %v2534_v52  ;;  %v2314_v52 = vadd.f32 %v6170_v34, %v5922_v9  ;;  %v3351_v9 = vld [vmem:[%s7120_s5 + $0x60] sm:$0xff] }
 0x372   : > { %v6201_v46 = vpop.f32.mrf.mxu1  ;;  %3362 = vmatpush.msra.mxu2 %v3351_v9 }
 0x373   : > { %2583 = vmatmul.f32.gmra.mxu3 %v6203_v59  ;;  %2696 = vmatmul.f32.gmra.mxu0 %v5945_v60  ;;  %v2250_v60 = vld [vmem:[%s7118_s3 + $0x360] sm:$0xff]  ;;  %v2427_v49 = vadd.f32 %v5918_v45, %v2314_v52  ;;  %v2317_v45 = vadd.f32 %v6170_v34, %v5939_v55 }
 0x374   : > { %2971 = vmatpush.msra.mxu3 %v2250_v60  ;;  %v6246_v60 = vld [vmem:[#allocation2 + $0xe2] sm:$0xff] }
 0x375   : > { %2761 = vmatmul.f32.gmra.mxu1 %v1982_v36  ;;  %2877 = vmatmul.f32.gmra.mxu2 %v5958_v53  ;;  %v6227_v53 = vld [vmem:[#allocation2 + $0x31] sm:$0xff]  ;;  %v2282_v52 = vld [vmem:[%s7118_s3 + $0x460] sm:$0xff]  ;;  %v2430_v55 = vadd.f32 %v5935_v27, %v2317_v45 }
 0x376   : > { %v2536_v19 = vpop.f32.mrf.mxu3  ;;  %3197 = vmatpush.msra.mxu1 %v2282_v52  ;;  %v6269_v45 = vld [vmem:[#allocation2 + $0xf2] sm:$0xff] }
 0x377   : > { %v2537_v8 = vadd.f32 %v2536_v19, %v2424_v50 }
 0x378   : > { %v2652_v14 = vpop.f32.mrf.mxu0  ;;  %v6212_v30 = vpop.f32.mrf.mxu2 }
 0x379   : > { %v6219_v3 = vadd.f32 %v2649_v48, %v2537_v8 }
 0x37a   : > { %v6221_v15 = vpop.f32.mrf.mxu1 }
 0x37b   : > { %2586 = vmatmul.f32.gmra.mxu3 %v6223_v37  ;;  %2699 = vmatmul.f32.gmra.mxu0 %v5962_v57  ;;  %v2266_v57 = vld [vmem:[%s7118_s3 + $0x3e0] sm:$0xff] }
 0x37c   : > { %3084 = vmatpush.msra.mxu0 %v2266_v57  ;;  %v2320_v57 = vadd.f32 %v6170_v34, %v5956_v44  ;;  %v3350_v44 = vld [vmem:[%s7120_s5 + $0x58] sm:$0xff] }
 0x37d   : > { %2764 = vmatmul.f32.gmra.mxu1 %v6227_v53  ;;  %2880 = vmatmul.f32.gmra.mxu2 %v5975_v17 }
 0x37e   : > { %v2539_v48 = vpop.f32.mrf.mxu3  ;;  %3363 = vmatpush.msra.mxu2 %v3350_v44  ;;  %v6299_v44 = vld [vmem:[#allocation2 + $0x51] sm:$0xff] }
 0x37f   : > { %v2540_v36 = vadd.f32 %v2539_v48, %v2427_v49  ;;  %v6253_v49 = vld [vmem:[#allocation2 + $0x39] sm:$0xff] }
 0x380   : > { %v2655_v50 = vpop.f32.mrf.mxu0  ;;  %v6235_v19 = vpop.f32.mrf.mxu2 }
 0x381   : > { %v6242_v8 = vadd.f32 %v2652_v14, %v2540_v36 }
 0x382   : > { %v6244_v17 = vpop.f32.mrf.mxu1 }
 0x383   : > { %2589 = vmatmul.f32.gmra.mxu3 %v6246_v60  ;;  %2702 = vmatmul.f32.gmra.mxu0 %v5979_v39  ;;  %v2249_v39 = vld [vmem:[%s7118_s3 + $0x358] sm:$0xff] }
 0x384   : > { %2972 = vmatpush.msra.mxu3 %v2249_v39 }
 0x385   : > { %2767 = vmatmul.f32.gmra.mxu1 %v6253_v49  ;;  %2883 = vmatmul.f32.gmra.mxu2 %v5992_v42  ;;  %v6273_v42 = vld [vmem:[#allocation2 + $0x49] sm:$0xff] }
 0x386   : > { %v2542_v14 = vpop.f32.mrf.mxu3 }
 0x387   : > { %v2543_v9 = vadd.f32 %v2542_v14, %v2430_v55  ;;  %v2433_v55 = vadd.f32 %v5952_v26, %v2320_v57  ;;  %v2323_v26 = vadd.f32 %v6170_v34, %v5973_v4 }
 0x388   : > { %v2658_v48 = vpop.f32.mrf.mxu0  ;;  %v6258_v36 = vpop.f32.mrf.mxu2 }
 0x389   : > { %7308 = vst [vmem:[#allocation30_spill] sm:$0xff] %v6258_v36  ;;  %v6265_v52 = vadd.f32 %v2655_v50, %v2543_v9  ;;  %v6292_v36 = vld [vmem:[#allocation2 + $0xfa] sm:$0xff]  ;;  %v2436_v4 = vadd.f32 %v5969_v33, %v2323_v26  ;;  %v6315_v26 = vld [vmem:[#allocation2 + $0x10a] sm:$0xff] }
 0x38a   : > { %v6267_v27 = vpop.f32.mrf.mxu1 }
 0x38b   : > { %2592 = vmatmul.f32.gmra.mxu3 %v6269_v45  ;;  %2705 = vmatmul.f32.gmra.mxu0 %v5996_v21  ;;  %v2265_v21 = vld [vmem:[%s7118_s3 + $0x3d8] sm:$0xff] }
 0x38c   : > { %3085 = vmatpush.msra.mxu0 %v2265_v21 }
 0x38d   : > { %2770 = vmatmul.f32.gmra.mxu1 %v6273_v42  ;;  %2886 = vmatmul.f32.gmra.mxu2 %v6009_v35 }
 0x38e   : > { %v2545_v50 = vpop.f32.mrf.mxu3 }
 0x38f   : > { %v2546_v14 = vadd.f32 %v2545_v50, %v2433_v55  ;;  %v2281_v55 = vld [vmem:[%s7118_s3 + $0x458] sm:$0xff] }
 0x390   : > { %v2661_v9 = vpop.f32.mrf.mxu0  ;;  %v6281_v39 = vpop.f32.mrf.mxu2  ;;  %3198 = vmatpush.msra.mxu1 %v2281_v55 }
 0x391   : > { %7309 = vst [vmem:[#allocation42_spill] sm:$0xff] %v6281_v39  ;;  %v6288_v57 = vadd.f32 %v2658_v48, %v2546_v14  ;;  %v2326_v39 = vadd.f32 %v6170_v34, %v5990_v29  ;;  %v3349_v29 = vld [vmem:[%s7120_s5 + $0x50] sm:$0xff] }
 0x392   : > { %v6290_v35 = vpop.f32.mrf.mxu1  ;;  %3364 = vmatpush.msra.mxu2 %v3349_v29  ;;  %v6345_v29 = vld [vmem:[#allocation2 + $0x69] sm:$0xff] }
 0x393   : > { %2595 = vmatmul.f32.gmra.mxu3 %v6292_v36  ;;  %2708 = vmatmul.f32.gmra.mxu0 %v6013_v62  ;;  %v2248_v62 = vld [vmem:[%s7118_s3 + $0x350] sm:$0xff] }
 0x394   : > { %2973 = vmatpush.msra.mxu3 %v2248_v62 }
 0x395   : > { %2773 = vmatmul.f32.gmra.mxu1 %v6299_v44  ;;  %2889 = vmatmul.f32.gmra.mxu2 %v6026_v20  ;;  %v6319_v20 = vld [vmem:[#allocation2 + $0x61] sm:$0xff] }
 0x396   : > { %v2548_v48 = vpop.f32.mrf.mxu3 }
 0x397   : > { %v2549_v50 = vadd.f32 %v2548_v48, %v2436_v4  ;;  %v2439_v4 = vadd.f32 %v5986_v0, %v2326_v39  ;;  %v2329_v0 = vadd.f32 %v6170_v34, %v6007_v54 }
 0x398   : > { %v2664_v14 = vpop.f32.mrf.mxu0  ;;  %v6304_v21 = vpop.f32.mrf.mxu2 }
 0x399   : > { %7310 = vst [vmem:[#allocation32_spill] sm:$0xff] %v6304_v21  ;;  %v6311_v55 = vadd.f32 %v2661_v9, %v2549_v50  ;;  %v6338_v21 = vld [vmem:[#allocation2 + $0x112] sm:$0xff]  ;;  %v2442_v54 = vadd.f32 %v6003_v41, %v2329_v0  ;;  %v6361_v0 = vld [vmem:[#allocation2 + $0x122] sm:$0xff] }
 0x39a   : > { %v6313_v33 = vpop.f32.mrf.mxu1 }
 0x39b   : > { %2598 = vmatmul.f32.gmra.mxu3 %v6315_v26  ;;  %2711 = vmatmul.f32.gmra.mxu0 %v6030_v61  ;;  %v2264_v61 = vld [vmem:[%s7118_s3 + $0x3d0] sm:$0xff] }
 0x39c   : > { %3086 = vmatpush.msra.mxu0 %v2264_v61 }
 0x39d   : > { %2776 = vmatmul.f32.gmra.mxu1 %v6319_v20  ;;  %2892 = vmatmul.f32.gmra.mxu2 %v6043_v11 }
 0x39e   : > { %v2551_v9 = vpop.f32.mrf.mxu3 }
 0x39f   : > { %v2552_v48 = vadd.f32 %v2551_v9, %v2439_v4  ;;  %v2280_v4 = vld [vmem:[%s7118_s3 + $0x450] sm:$0xff] }
 0x3a0   : > { %v2667_v50 = vpop.f32.mrf.mxu0  ;;  %v6327_v62 = vpop.f32.mrf.mxu2  ;;  %3199 = vmatpush.msra.mxu1 %v2280_v4 }
 0x3a1   : > { %7311 = vst [vmem:[#allocation34_spill] sm:$0xff] %v6327_v62  ;;  %v6334_v39 = vadd.f32 %v2664_v14, %v2552_v48  ;;  %v7314_v62 = vld [vmem:[#allocation20_spill] sm:$0xff] }
 0x3a2   : > { %v6336_v11 = vpop.f32.mrf.mxu1 }
 0x3a3   : > { %7312 = vst [vmem:[#allocation40_spill] sm:$0xff] %v6336_v11  ;;  %2601 = vmatmul.f32.gmra.mxu3 %v6338_v21  ;;  %2714 = vmatmul.f32.gmra.mxu0 %v6047_v40  ;;  %v2247_v40 = vld [vmem:[%s7118_s3 + $0x348] sm:$0xff]  ;;  %v2332_v11 = vadd.f32 %v6170_v34, %v7314_v62 }
 0x3a4   : > { %2974 = vmatpush.msra.mxu3 %v2247_v40 }
 0x3a5   : > { %2779 = vmatmul.f32.gmra.mxu1 %v6345_v29  ;;  %2895 = vmatmul.f32.gmra.mxu2 %v6060_v56  ;;  %v6365_v56 = vld [vmem:[#allocation2 + $0x79] sm:$0xff] }
 0x3a6   : > { %v2554_v14 = vpop.f32.mrf.mxu3 }
 0x3a7   : > { %v2555_v9 = vadd.f32 %v2554_v14, %v2442_v54  ;;  %v7317_v54 = vld [vmem:[#allocation31_spill] sm:$0xff] }
 0x3a8   : > { %v2670_v48 = vpop.f32.mrf.mxu0  ;;  %v6350_v61 = vpop.f32.mrf.mxu2  ;;  %v2445_v14 = vadd.f32 %v7317_v54, %v2332_v11 }
 0x3a9   : > { %7313 = vst [vmem:[#allocation36_spill] sm:$0xff] %v6350_v61  ;;  %v6357_v4 = vadd.f32 %v2667_v50, %v2555_v9  ;;  %v3348_v50 = vld [vmem:[%s7120_s5 + $0x48] sm:$0xff] }
 0x3aa   : > { %v6359_v41 = vpop.f32.mrf.mxu1  ;;  %3365 = vmatpush.msra.mxu2 %v3348_v50  ;;  %v6391_v50 = vld [vmem:[#allocation2 + $0x81] sm:$0xff] }
 0x3ab   : > { %7315 = vst [vmem:[#allocation38_spill] sm:$0xff] %v6357_v4  ;;  %2604 = vmatmul.f32.gmra.mxu3 %v6361_v0  ;;  %2717 = vmatmul.f32.gmra.mxu0 %v6064_v31  ;;  %v2263_v31 = vld [vmem:[%s7118_s3 + $0x3c8] sm:$0xff] }
 0x3ac   : > { %7316 = vst [vmem:[#allocation39_spill] sm:$0xff] %v6359_v41  ;;  %v7319_v41 = vld [vmem:[#allocation29_spill] sm:$0xff]  ;;  %3087 = vmatpush.msra.mxu0 %v2263_v31  ;;  %v6384_v4 = vld [vmem:[#allocation2 + $0x12a] sm:$0xff] }
 0x3ad   : > { %2782 = vmatmul.f32.gmra.mxu1 %v6365_v56  ;;  %2898 = vmatmul.f32.gmra.mxu2 %v6077_v58  ;;  %v2335_v11 = vadd.f32 %v6170_v34, %v7319_v41 }
 0x3ae   : > { %v2557_v62 = vpop.f32.mrf.mxu3 }
 0x3af   : > { %v2558_v9 = vadd.f32 %v2557_v62, %v2445_v14  ;;  %v2279_v14 = vld [vmem:[%s7118_s3 + $0x448] sm:$0xff] }
 0x3b0   : > { %v2673_v40 = vpop.f32.mrf.mxu0  ;;  %v6373_v61 = vpop.f32.mrf.mxu2  ;;  %3200 = vmatpush.msra.mxu1 %v2279_v14  ;;  %v7321_v62 = vld [vmem:[#allocation22_spill] sm:$0xff] }
 0x3b1   : > { %7318 = vst [vmem:[#allocation41_spill] sm:$0xff] %v6373_v61  ;;  %v6380_v54 = vadd.f32 %v2670_v48, %v2558_v9  ;;  %v2448_v41 = vadd.f32 %v7321_v62, %v2335_v11  ;;  %v6407_v62 = vld [vmem:[#allocation2 + $0x13a] sm:$0xff] }
 0x3b2   : > { %v6382_v58 = vpop.f32.mrf.mxu1 }
 0x3b3   : > { %7320 = vst [vmem:[#allocation43_spill] sm:$0xff] %v6382_v58  ;;  %2607 = vmatmul.f32.gmra.mxu3 %v6384_v4  ;;  %2720 = vmatmul.f32.gmra.mxu0 %v6081_v51  ;;  %v2246_v51 = vld [vmem:[%s7118_s3 + $0x340] sm:$0xff]  ;;  %v2338_v58 = vadd.f32 %v6170_v34, %v6058_v2  ;;  %v2261_v2 = vld [vmem:[%s7118_s3 + $0x3b8] sm:$0xff] }
 0x3b4   : > { %2975 = vmatpush.msra.mxu3 %v2246_v51 }
 0x3b5   : > { %2785 = vmatmul.f32.gmra.mxu1 %v6391_v50  ;;  %2901 = vmatmul.f32.gmra.mxu2 %v6094_v13  ;;  %v2262_v13 = vld [vmem:[%s7118_s3 + $0x3c0] sm:$0xff] }
 0x3b6   : > { %v2560_v48 = vpop.f32.mrf.mxu3  ;;  %3088 = vmatpush.msra.mxu0 %v2262_v13 }
 0x3b7   : > { %v2561_v9 = vadd.f32 %v2560_v48, %v2448_v41  ;;  %v2245_v41 = vld [vmem:[%s7118_s3 + $0x338] sm:$0xff] }
 0x3b8   : > { %v2676_v31 = vpop.f32.mrf.mxu0  ;;  %v6396_v61 = vpop.f32.mrf.mxu2  ;;  %2976 = vmatpush.msra.mxu3 %v2245_v41  ;;  %v7325_v48 = vld [vmem:[#allocation24_spill] sm:$0xff]  ;;  %3089 = vmatpush.msra.mxu0 %v2261_v2  ;;  %v2259_v2 = vld [vmem:[%s7118_s3 + $0x3a8] sm:$0xff] }
 0x3b9   : > { %7322 = vst [vmem:[#allocation44_spill] sm:$0xff] %v6396_v61  ;;  %v6403_v14 = vadd.f32 %v2673_v40, %v2561_v9  ;;  %v6420_v40 = vld [vmem:[#allocation2 + $0x91] sm:$0xff]  ;;  %v2451_v9 = vadd.f32 %v7325_v48, %v2338_v58  ;;  %v2341_v48 = vadd.f32 %v6170_v34, %v6075_v6  ;;  %v2258_v6 = vld [vmem:[%s7118_s3 + $0x3a0] sm:$0xff] }
 0x3ba   : > { %v6405_v11 = vpop.f32.mrf.mxu1  ;;  %v2260_v58 = vld [vmem:[%s7118_s3 + $0x3b0] sm:$0xff] }
 0x3bb   : > { %7323 = vst [vmem:[#allocation51_spill] sm:$0xff] %v6403_v14  ;;  %2610 = vmatmul.f32.gmra.mxu3 %v6407_v62  ;;  %2723 = vmatmul.f32.gmra.mxu0 %v6098_v43  ;;  %v3347_v43 = vld [vmem:[%s7120_s5 + $0x40] sm:$0xff] }
 0x3bc   : > { %7324 = vst [vmem:[#allocation52_spill] sm:$0xff] %v6405_v11  ;;  %3366 = vmatpush.msra.mxu2 %v3347_v43  ;;  %v2244_v11 = vld [vmem:[%s7118_s3 + $0x330] sm:$0xff]  ;;  %3090 = vmatpush.msra.mxu0 %v2260_v58  ;;  %v2257_v58 = vld [vmem:[%s7118_s3 + $0x398] sm:$0xff] }
 0x3bd   : > { %2788 = vmatmul.f32.gmra.mxu1 %v6420_v40  ;;  %2904 = vmatmul.f32.gmra.mxu2 %v6117_v63  ;;  %v2243_v63 = vld [vmem:[%s7118_s3 + $0x328] sm:$0xff] }
 0x3be   : > { %v2563_v51 = vpop.f32.mrf.mxu3  ;;  %2977 = vmatpush.msra.mxu3 %v2244_v11  ;;  %3091 = vmatpush.msra.mxu0 %v2259_v2  ;;  %v2242_v11 = vld [vmem:[%s7118_s3 + $0x320] sm:$0xff] }
 0x3bf   : > { %v2564_v61 = vadd.f32 %v2563_v51, %v2451_v9  ;;  %v6448_v51 = vld [vmem:[#allocation2 + $0x142] sm:$0xff] }
 0x3c0   : > { %v2679_v13 = vpop.f32.mrf.mxu0  ;;  %v6434_v41 = vpop.f32.mrf.mxu2  ;;  %2978 = vmatpush.msra.mxu3 %v2243_v63  ;;  %3092 = vmatpush.msra.mxu0 %v2258_v6  ;;  %v7329_v63 = vld [vmem:[#allocation37_spill] sm:$0xff]  ;;  %v2256_v6 = vld [vmem:[%s7118_s3 + $0x390] sm:$0xff] }
 0x3c1   : > { %7326 = vst [vmem:[#allocation53_spill] sm:$0xff] %v6434_v41  ;;  %v6444_v9 = vadd.f32 %v2676_v31, %v2564_v61  ;;  %v2278_v61 = vld [vmem:[%s7118_s3 + $0x440] sm:$0xff]  ;;  %v2454_v2 = vadd.f32 %v7329_v63, %v2341_v48  ;;  %v7331_v48 = vld [vmem:[#allocation28_spill] sm:$0xff] }
 0x3c2   : > { %v6446_v43 = vpop.f32.mrf.mxu1  ;;  %v6461_v31 = vld [vmem:[#allocation2 + $0x99] sm:$0xff]  ;;  %2979 = vmatpush.msra.mxu3 %v2242_v11  ;;  %3201 = vmatpush.msra.mxu1 %v2278_v61  ;;  %v2240_v11 = vld [vmem:[%s7118_s3 + $0x310] sm:$0xff]  ;;  %v2255_v61 = vld [vmem:[%s7118_s3 + $0x388] sm:$0xff] }
 0x3c3   : > { %7327 = vst [vmem:[#allocation55_spill] sm:$0xff] %v6444_v9  ;;  %2613 = vmatmul.f32.gmra.mxu3 %v6448_v51  ;;  %2726 = vmatmul.f32.gmra.mxu0 %v6124_v25  ;;  %v2241_v25 = vld [vmem:[%s7118_s3 + $0x318] sm:$0xff] }
 0x3c4   : > { %7328 = vst [vmem:[#allocation56_spill] sm:$0xff] %v6446_v43  ;;  %2980 = vmatpush.msra.mxu3 %v2241_v25  ;;  %3093 = vmatpush.msra.mxu0 %v2257_v58  ;;  %v6492_v63 = vld [vmem:[#allocation2 + $0x152] sm:$0xff] }
 0x3c5   : > { %2791 = vmatmul.f32.gmra.mxu1 %v6461_v31  ;;  %2907 = vmatmul.f32.gmra.mxu2 %v6137_v32  ;;  %v2239_v32 = vld [vmem:[%s7118_s3 + $0x308] sm:$0xff] }
 0x3c6   : > { %v2566_v41 = vpop.f32.mrf.mxu3  ;;  %2981 = vmatpush.msra.mxu3 %v2240_v11  ;;  %3094 = vmatpush.msra.mxu0 %v2256_v6  ;;  %v2254_v11 = vld [vmem:[%s7118_s3 + $0x380] sm:$0xff]  ;;  %v6502_v6 = vld [vmem:[#allocation2 + $0xa9] sm:$0xff] }
 0x3c7   : > { %v2567_v43 = vadd.f32 %v2566_v41, %v2454_v2  ;;  %v2344_v41 = vadd.f32 %v6170_v34, %v7331_v48  ;;  %v2238_v2 = vld [vmem:[%s7118_s3 + $0x300] sm:$0xff] }
 0x3c8   : > { %v2682_v9 = vpop.f32.mrf.mxu0  ;;  %v6478_v14 = vpop.f32.mrf.mxu2  ;;  %2982 = vmatpush.msra.mxu3 %v2239_v32  ;;  %3095 = vmatpush.msra.mxu0 %v2255_v61  ;;  %v2347_v61 = vadd.f32 %v6170_v34, %v6115_v38 }
 0x3c9   : > { %7330 = vst [vmem:[#allocation3_spill] sm:$0xff] %v6478_v14  ;;  %v6488_v25 = vadd.f32 %v2679_v13, %v2567_v43  ;;  %v7333_v13 = vld [vmem:[#allocation26_spill] sm:$0xff] }
 0x3ca   : > { %v6490_v58 = vpop.f32.mrf.mxu1  ;;  %2983 = vmatpush.msra.mxu3 %v2238_v2  ;;  %v2457_v43 = vadd.f32 %v7333_v13, %v2344_v41  ;;  %3096 = vmatpush.msra.mxu0 %v2254_v11  ;;  %v6518_v13 = vld [vmem:[#allocation2 + $0x15a] sm:$0xff]  ;;  %v6525_v11 = vld [vmem:[#allocation2 + $0xb1] sm:$0xff] }
 0x3cb   : > { %7332 = vst [vmem:[#allocation57_spill] sm:$0xff] %v6490_v58  ;;  %2616 = vmatmul.f32.gmra.mxu3 %v6492_v63  ;;  %2729 = vmatmul.f32.gmra.mxu0 %v6141_v1  ;;  %v3346_v1 = vld [vmem:[%s7120_s5 + $0x38] sm:$0xff] }
 0x3cc   : > { %3367 = vmatpush.msra.mxu2 %v3346_v1 }
 0x3cd   : > { %2794 = vmatmul.f32.gmra.mxu1 %v6502_v6  ;;  %2910 = vmatmul.f32.gmra.mxu2 %v6157_v47  ;;  %v2277_v47 = vld [vmem:[%s7118_s3 + $0x438] sm:$0xff] }
 0x3ce   : > { %v2569_v32 = vpop.f32.mrf.mxu3  ;;  %3202 = vmatpush.msra.mxu1 %v2277_v47  ;;  %v1979_v47 = vld [vmem:[#allocation2 + $0x180] sm:$0xff] }
 0x3cf   : > { %v2570_v48 = vadd.f32 %v2569_v32, %v2457_v43  ;;  %v2460_v43 = vadd.f32 %v6108_v7, %v2347_v61  ;;  %v6541_v7 = vld [vmem:[#allocation2 + $0xc1] sm:$0xff] }
 0x3d0   : > { %v2685_v14 = vpop.f32.mrf.mxu0  ;;  %v6510_v58 = vpop.f32.mrf.mxu2 }
 0x3d1   : > { %7334 = vst [vmem:[#allocation45_spill] sm:$0xff] %v6510_v58  ;;  %v6514_v2 = vadd.f32 %v2682_v9, %v2570_v48 }
 0x3d2   : > { %v6516_v41 = vpop.f32.mrf.mxu1 }
 0x3d3   : > { %7335 = vst [vmem:[#allocation46_spill] sm:$0xff] %v6516_v41  ;;  %2619 = vmatmul.f32.gmra.mxu3 %v6518_v13  ;;  %2732 = vmatmul.f32.gmra.mxu0 %v6164_v5  ;;  %v2350_v5 = vadd.f32 %v6170_v34, %v6135_v18  ;;  %v6538_v41 = vld [vmem:[#allocation2 + $0x16a] sm:$0xff] }
 0x3d4   : > { %v3345_v18 = vld [vmem:[%s7120_s5 + $0x30] sm:$0xff] }
 0x3d5   : > { %2797 = vmatmul.f32.gmra.mxu1 %v6525_v11  ;;  %2913 = vmatmul.f32.gmra.mxu2 %v6183_v16  ;;  %v7339_v16 = vld [vmem:[#allocation35_spill] sm:$0xff] }
 0x3d6   : > { %v2572_v38 = vpop.f32.mrf.mxu3  ;;  %v2463_v61 = vadd.f32 %v7339_v16, %v2350_v5  ;;  %3368 = vmatpush.msra.mxu2 %v3345_v18  ;;  %v6557_v16 = vld [vmem:[#allocation2 + $0x172] sm:$0xff]  ;;  %v6563_v18 = vld [vmem:[#allocation2 + $0xc9] sm:$0xff] }
 0x3d7   : > { %v2573_v9 = vadd.f32 %v2572_v38, %v2460_v43 }
 0x3d8   : > { %v2688_v1 = vpop.f32.mrf.mxu0  ;;  %v6530_v32 = vpop.f32.mrf.mxu2 }
 0x3d9   : > { %7336 = vst [vmem:[#allocation47_spill] sm:$0xff] %v6530_v32  ;;  %v6534_v48 = vadd.f32 %v2685_v14, %v2573_v9 }
 0x3da   : > { %v6536_v58 = vpop.f32.mrf.mxu1 }
 0x3db   : > { %7337 = vst [vmem:[#allocation48_spill] sm:$0xff] %v6534_v48  ;;  %2622 = vmatmul.f32.gmra.mxu3 %v6538_v41  ;;  %2735 = vmatmul.f32.gmra.mxu0 %v1979_v47  ;;  %v2353_v47 = vadd.f32 %v6170_v34, %v6155_v28 }
 0x3dc   : > { %7338 = vst [vmem:[#allocation49_spill] sm:$0xff] %v6536_v58  ;;  %v2046_v58 = vld [vmem:[#allocation2 + $0x30] sm:$0xff] }
 0x3dd   : > { %2800 = vmatmul.f32.gmra.mxu1 %v6541_v7  ;;  %2916 = vmatmul.f32.gmra.mxu2 %v6203_v59  ;;  %v1980_v59 = vld [vmem:[#allocation2 + $0x188] sm:$0xff] }
 0x3de   : > { %v2575_v14 = vpop.f32.mrf.mxu3 }
 0x3df   : > { %v2576_v43 = vadd.f32 %v2575_v14, %v2463_v61  ;;  %v2276_v61 = vld [vmem:[%s7118_s3 + $0x430] sm:$0xff]  ;;  %v2466_v14 = vadd.f32 %v6148_v12, %v2353_v47  ;;  %v6574_v12 = vld [vmem:[#allocation2 + $0xd9] sm:$0xff] }
 0x3e0   : > { %v2691_v38 = vpop.f32.mrf.mxu0  ;;  %v6549_v9 = vpop.f32.mrf.mxu2  ;;  %3203 = vmatpush.msra.mxu1 %v2276_v61 }
 0x3e1   : > { %7340 = vst [vmem:[#allocation50_spill] sm:$0xff] %v6549_v9  ;;  %v6553_v32 = vadd.f32 %v2688_v1, %v2576_v43 }
 0x3e2   : > { %v6555_v5 = vpop.f32.mrf.mxu1 }
 0x3e3   : > { %7341 = vst [vmem:[#allocation54_spill] sm:$0xff] %v6553_v32  ;;  %2625 = vmatmul.f32.gmra.mxu3 %v6557_v16  ;;  %2738 = vmatmul.f32.gmra.mxu0 %v1980_v59  ;;  %v2356_v59 = vadd.f32 %v6170_v34, %v6181_v23  ;;  %v3344_v23 = vld [vmem:[%s7120_s5 + $0x28] sm:$0xff] }
 0x3e4   : > { %7342 = vst [vmem:[#allocation15_spill] sm:$0xff] %v6555_v5  ;;  %3369 = vmatpush.msra.mxu2 %v3344_v23 }
 0x3e5   : > { %2803 = vmatmul.f32.gmra.mxu1 %v6563_v18  ;;  %2919 = vmatmul.f32.gmra.mxu2 %v6223_v37  ;;  %v2469_v37 = vadd.f32 %v6174_v10, %v2356_v59 }
 0x3e6   : > { %v2578_v28 = vpop.f32.mrf.mxu3 }
 0x3e7   : > { %v2579_v1 = vadd.f32 %v2578_v28, %v2466_v14  ;;  %v2047_v14 = vld [vmem:[#allocation2 + $0x38] sm:$0xff] }
 0x3e8   : > { %v2694_v43 = vpop.f32.mrf.mxu0  ;;  %v2872_v9 = vpop.f32.mrf.mxu2 }
 0x3e9   : > { %v6570_v5 = vadd.f32 %v2691_v38, %v2579_v1 }
 0x3ea   : > { %v2759_v32 = vpop.f32.mrf.mxu1 }
 0x3eb   : > { %v2760_v48 = vadd.f32 %v2759_v32, %v6199_v24  ;;  %2984 = vmatmul.f32.vlgmr.msra.gmra.mxu3 %v2046_v58  ;;  %3097 = vmatmul.f32.vlgmr.msra.gmra.mxu0 %v6227_v53  ;;  %v2359_v53 = vadd.f32 %v6170_v34, %v6201_v46 }
 0x3ed   : > { %2806 = vmatmul.f32.gmra.mxu1 %v6574_v12  ;;  %v6578_v47 = vadd.f32 %v2872_v9, %v2760_v48  ;;  %2922 = vmatmul.f32.gmra.mxu2 %v6246_v60  ;;  %v2275_v60 = vld [vmem:[%s7118_s3 + $0x428] sm:$0xff]  ;;  %v2472_v28 = vadd.f32 %v6192_v22, %v2359_v53  ;;  %v6606_v22 = vld [vmem:[#allocation2 + $0xf1] sm:$0xff] }
 0x3ee   : > { %v2581_v38 = vpop.f32.mrf.mxu3  ;;  %v6593_v9 = vld [vmem:[#allocation2 + $0xe1] sm:$0xff]  ;;  %3204 = vmatpush.msra.mxu1 %v2275_v60 }
 0x3ef   : > { %v2582_v24 = vadd.f32 %v2581_v38, %v2469_v37  ;;  %v2048_v38 = vld [vmem:[#allocation2 + $0x48] sm:$0xff] }
 0x3f0   : > { %v2697_v58 = vpop.f32.mrf.mxu0  ;;  %v2875_v32 = vpop.f32.mrf.mxu2 }
 0x3f1   : > { %v6586_v61 = vadd.f32 %v2694_v43, %v2582_v24 }
 0x3f2   : > { %v2762_v10 = vpop.f32.mrf.mxu1 }
 0x3f3   : > { %v2763_v48 = vadd.f32 %v2762_v10, %v6219_v3  ;;  %2987 = vmatmul.f32.gmra.mxu3 %v2047_v14  ;;  %3100 = vmatmul.f32.gmra.mxu0 %v6253_v49  ;;  %v2362_v49 = vadd.f32 %v6170_v34, %v6221_v15  ;;  %v3343_v15 = vld [vmem:[%s7120_s5 + $0x20] sm:$0xff] }
 0x3f4   : > { %3370 = vmatpush.msra.mxu2 %v3343_v15 }
 0x3f5   : > { %2809 = vmatmul.f32.gmra.mxu1 %v6593_v9  ;;  %v6597_v46 = vadd.f32 %v2875_v32, %v2763_v48  ;;  %2925 = vmatmul.f32.gmra.mxu2 %v6269_v45  ;;  %v2475_v45 = vadd.f32 %v6212_v30, %v2362_v49  ;;  %v2049_v48 = vld [vmem:[#allocation2 + $0x50] sm:$0xff] }
 0x3f6   : > { %v2584_v1 = vpop.f32.mrf.mxu3 }
 0x3f7   : > { %v2585_v3 = vadd.f32 %v2584_v1, %v2472_v28  ;;  %v6625_v28 = vld [vmem:[#allocation2 + $0xf9] sm:$0xff] }
 0x3f8   : > { %v2700_v43 = vpop.f32.mrf.mxu0  ;;  %v2878_v59 = vpop.f32.mrf.mxu2 }
 0x3f9   : > { %v6602_v37 = vadd.f32 %v2697_v58, %v2585_v3 }
 0x3fa   : > { %v2765_v23 = vpop.f32.mrf.mxu1 }
 0x3fb   : > { %v2766_v24 = vadd.f32 %v2765_v23, %v6242_v8  ;;  %2990 = vmatmul.f32.gmra.mxu3 %v2048_v38  ;;  %3103 = vmatmul.f32.gmra.mxu0 %v6273_v42  ;;  %v2365_v42 = vadd.f32 %v6170_v34, %v6244_v17  ;;  %v2050_v38 = vld [vmem:[#allocation2 + $0x60] sm:$0xff] }
 0x3fd   : > { %2812 = vmatmul.f32.gmra.mxu1 %v6606_v22  ;;  %v6610_v32 = vadd.f32 %v2878_v59, %v2766_v24  ;;  %2928 = vmatmul.f32.gmra.mxu2 %v6292_v36  ;;  %v2274_v36 = vld [vmem:[%s7118_s3 + $0x420] sm:$0xff]  ;;  %v2478_v1 = vadd.f32 %v6235_v19, %v2365_v42  ;;  %v6638_v19 = vld [vmem:[#allocation2 + $0x109] sm:$0xff] }
 0x3fe   : > { %v2587_v58 = vpop.f32.mrf.mxu3  ;;  %3205 = vmatpush.msra.mxu1 %v2274_v36  ;;  %v7344_v36 = vld [vmem:[#allocation42_spill] sm:$0xff] }
 0x3ff   : > { %v2588_v8 = vadd.f32 %v2587_v58, %v2475_v45  ;;  %v7343_v45 = vld [vmem:[#allocation30_spill] sm:$0xff] }
 0x400   : > { %v2703_v53 = vpop.f32.mrf.mxu0  ;;  %v2881_v10 = vpop.f32.mrf.mxu2 }
 0x401   : > { %v6618_v14 = vadd.f32 %v2700_v43, %v2588_v8 }
 0x402   : > { %v2768_v30 = vpop.f32.mrf.mxu1 }
 0x403   : > { %v2769_v60 = vadd.f32 %v2768_v30, %v6265_v52  ;;  %2993 = vmatmul.f32.gmra.mxu3 %v2049_v48  ;;  %3106 = vmatmul.f32.gmra.mxu0 %v6299_v44  ;;  %v2368_v44 = vadd.f32 %v6170_v34, %v6267_v27  ;;  %v3342_v27 = vld [vmem:[%s7120_s5 + $0x18] sm:$0xff]  ;;  %v2051_v30 = vld [vmem:[#allocation2 + $0x68] sm:$0xff] }
 0x404   : > { %3371 = vmatpush.msra.mxu2 %v3342_v27 }
 0x405   : > { %2815 = vmatmul.f32.gmra.mxu1 %v6625_v28  ;;  %v6629_v17 = vadd.f32 %v2881_v10, %v2769_v60  ;;  %2931 = vmatmul.f32.gmra.mxu2 %v6315_v26  ;;  %v2481_v26 = vadd.f32 %v7343_v45, %v2368_v44  ;;  %v6657_v60 = vld [vmem:[#allocation2 + $0x111] sm:$0xff] }
 0x406   : > { %v2590_v3 = vpop.f32.mrf.mxu3  ;;  %v7345_v45 = vld [vmem:[#allocation32_spill] sm:$0xff] }
 0x407   : > { %v2591_v52 = vadd.f32 %v2590_v3, %v2478_v1 }
 0x408   : > { %v2706_v43 = vpop.f32.mrf.mxu0  ;;  %v2884_v59 = vpop.f32.mrf.mxu2 }
 0x409   : > { %v6634_v49 = vadd.f32 %v2703_v53, %v2591_v52 }
 0x40a   : > { %v2771_v23 = vpop.f32.mrf.mxu1 }
 0x40b   : > { %v2772_v24 = vadd.f32 %v2771_v23, %v6288_v57  ;;  %2996 = vmatmul.f32.gmra.mxu3 %v2050_v38  ;;  %3109 = vmatmul.f32.gmra.mxu0 %v6319_v20  ;;  %v2371_v20 = vadd.f32 %v6170_v34, %v6290_v35  ;;  %v2052_v23 = vld [vmem:[#allocation2 + $0x78] sm:$0xff] }
 0x40d   : > { %2818 = vmatmul.f32.gmra.mxu1 %v6638_v19  ;;  %v6642_v15 = vadd.f32 %v2884_v59, %v2772_v24  ;;  %2934 = vmatmul.f32.gmra.mxu2 %v6338_v21  ;;  %v2273_v21 = vld [vmem:[%s7118_s3 + $0x418] sm:$0xff]  ;;  %v2484_v1 = vadd.f32 %v7344_v36, %v2371_v20  ;;  %v6670_v24 = vld [vmem:[#allocation2 + $0x121] sm:$0xff] }
 0x40e   : > { %v2593_v58 = vpop.f32.mrf.mxu3  ;;  %3206 = vmatpush.msra.mxu1 %v2273_v21  ;;  %v6689_v21 = vld [vmem:[#allocation2 + $0x129] sm:$0xff] }
 0x40f   : > { %v2594_v57 = vadd.f32 %v2593_v58, %v2481_v26  ;;  %v7348_v36 = vld [vmem:[#allocation34_spill] sm:$0xff] }
 0x410   : > { %v2709_v8 = vpop.f32.mrf.mxu0  ;;  %v2887_v53 = vpop.f32.mrf.mxu2 }
 0x411   : > { %v6650_v10 = vadd.f32 %v2706_v43, %v2594_v57 }
 0x412   : > { %v2774_v42 = vpop.f32.mrf.mxu1 }
 0x413   : > { %v2775_v48 = vadd.f32 %v2774_v42, %v6311_v55  ;;  %2999 = vmatmul.f32.gmra.mxu3 %v2051_v30  ;;  %3112 = vmatmul.f32.gmra.mxu0 %v6345_v29  ;;  %v2374_v29 = vadd.f32 %v6170_v34, %v6313_v33  ;;  %v3341_v33 = vld [vmem:[%s7120_s5 + $0x10] sm:$0xff]  ;;  %v2053_v42 = vld [vmem:[#allocation2 + $0x80] sm:$0xff]  ;;  %v7347_v30 = vld [vmem:[#allocation38_spill] sm:$0xff] }
 0x414   : > { %3372 = vmatpush.msra.mxu2 %v3341_v33  ;;  %v6702_v33 = vld [vmem:[#allocation2 + $0x139] sm:$0xff] }
 0x415   : > { %2821 = vmatmul.f32.gmra.mxu1 %v6657_v60  ;;  %v6661_v35 = vadd.f32 %v2887_v53, %v2775_v48  ;;  %2937 = vmatmul.f32.gmra.mxu2 %v6361_v0  ;;  %v2487_v0 = vadd.f32 %v7345_v45, %v2374_v29  ;;  %v2054_v45 = vld [vmem:[#allocation2 + $0x90] sm:$0xff] }
 0x416   : > { %v2596_v3 = vpop.f32.mrf.mxu3 }
 0x417   : > { %v2597_v55 = vadd.f32 %v2596_v3, %v2484_v1 }
 0x418   : > { %v2712_v52 = vpop.f32.mrf.mxu0  ;;  %v2890_v43 = vpop.f32.mrf.mxu2 }
 0x419   : > { %v6666_v59 = vadd.f32 %v2709_v8, %v2597_v55 }
 0x41a   : > { %v2777_v44 = vpop.f32.mrf.mxu1 }
 0x41b   : > { %v2778_v38 = vadd.f32 %v2777_v44, %v6334_v39  ;;  %3002 = vmatmul.f32.gmra.mxu3 %v2052_v23  ;;  %3115 = vmatmul.f32.gmra.mxu0 %v6365_v56  ;;  %v7346_v56 = vld [vmem:[#allocation40_spill] sm:$0xff] }
 0x41c   : > { %v2377_v8 = vadd.f32 %v6170_v34, %v7346_v56 }
 0x41d   : > { %2824 = vmatmul.f32.gmra.mxu1 %v6670_v24  ;;  %v6674_v26 = vadd.f32 %v2890_v43, %v2778_v38  ;;  %2940 = vmatmul.f32.gmra.mxu2 %v6384_v4  ;;  %v2272_v4 = vld [vmem:[%s7118_s3 + $0x410] sm:$0xff] }
 0x41e   : > { %v2599_v27 = vpop.f32.mrf.mxu3  ;;  %3207 = vmatpush.msra.mxu1 %v2272_v4  ;;  %v2490_v1 = vadd.f32 %v7348_v36, %v2377_v8  ;;  %v7352_v4 = vld [vmem:[#allocation51_spill] sm:$0xff] }
 0x41f   : > { %v2600_v39 = vadd.f32 %v2599_v27, %v2487_v0  ;;  %v7350_v27 = vld [vmem:[#allocation36_spill] sm:$0xff] }
 0x420   : > { %v2715_v58 = vpop.f32.mrf.mxu0  ;;  %v2893_v57 = vpop.f32.mrf.mxu2 }
 0x421   : > { %v6682_v53 = vadd.f32 %v2712_v52, %v2600_v39 }
 0x422   : > { %v2780_v20 = vpop.f32.mrf.mxu1 }
 0x423   : > { %v2781_v48 = vadd.f32 %v2780_v20, %v7347_v30  ;;  %3005 = vmatmul.f32.gmra.mxu3 %v2053_v42  ;;  %3118 = vmatmul.f32.gmra.mxu0 %v6391_v50  ;;  %v7349_v50 = vld [vmem:[#allocation39_spill] sm:$0xff] }
 0x424   : > { %v2380_v44 = vadd.f32 %v6170_v34, %v7349_v50 }
 0x425   : > { %2827 = vmatmul.f32.gmra.mxu1 %v6689_v21  ;;  %v6693_v3 = vadd.f32 %v2893_v57, %v2781_v48  ;;  %2943 = vmatmul.f32.gmra.mxu2 %v6407_v62  ;;  %v2055_v48 = vld [vmem:[#allocation2 + $0x98] sm:$0xff] }
 0x426   : > { %v2602_v55 = vpop.f32.mrf.mxu3  ;;  %v2493_v62 = vadd.f32 %v7350_v27, %v2380_v44 }
 0x427   : > { %v2603_v52 = vadd.f32 %v2602_v55, %v2490_v1  ;;  %v6721_v1 = vld [vmem:[#allocation2 + $0x141] sm:$0xff] }
 0x428   : > { %v2718_v43 = vpop.f32.mrf.mxu0  ;;  %v2896_v29 = vpop.f32.mrf.mxu2  ;;  %v7353_v55 = vld [vmem:[#allocation41_spill] sm:$0xff] }
 0x429   : > { %v6698_v23 = vadd.f32 %v2715_v58, %v2603_v52  ;;  %v3340_v58 = vld [vmem:[%s7120_s5 + $0x8] sm:$0xff] }
 0x42a   : > { %v2783_v38 = vpop.f32.mrf.mxu1  ;;  %3373 = vmatpush.msra.mxu2 %v3340_v58  ;;  %v7355_v58 = vld [vmem:[#allocation55_spill] sm:$0xff] }
 0x42b   : > { %v2784_v0 = vadd.f32 %v2783_v38, %v6380_v54  ;;  %3008 = vmatmul.f32.gmra.mxu3 %v2054_v45  ;;  %3121 = vmatmul.f32.gmra.mxu0 %v6420_v40  ;;  %v7351_v40 = vld [vmem:[#allocation43_spill] sm:$0xff] }
 0x42c   : > { %v2383_v20 = vadd.f32 %v6170_v34, %v7351_v40 }
 0x42d   : > { %2830 = vmatmul.f32.gmra.mxu1 %v6702_v33  ;;  %v6706_v39 = vadd.f32 %v2896_v29, %v2784_v0  ;;  %2946 = vmatmul.f32.gmra.mxu2 %v6448_v51  ;;  %v2271_v51 = vld [vmem:[%s7118_s3 + $0x408] sm:$0xff] }
 0x42e   : > { %v2605_v57 = vpop.f32.mrf.mxu3  ;;  %3208 = vmatpush.msra.mxu1 %v2271_v51  ;;  %v2496_v52 = vadd.f32 %v7353_v55, %v2383_v20  ;;  %v2057_v55 = vld [vmem:[#allocation2 + $0xb0] sm:$0xff] }
 0x42f   : > { %v2606_v54 = vadd.f32 %v2605_v57, %v2493_v62  ;;  %v2056_v62 = vld [vmem:[#allocation2 + $0xa8] sm:$0xff] }
 0x430   : > { %v2721_v56 = vpop.f32.mrf.mxu0  ;;  %v2899_v8 = vpop.f32.mrf.mxu2 }
 0x431   : > { %v6714_v42 = vadd.f32 %v2718_v43, %v2606_v54  ;;  %v6734_v54 = vld [vmem:[#allocation2 + $0x151] sm:$0xff] }
 0x432   : > { %v2786_v30 = vpop.f32.mrf.mxu1 }
 0x433   : > { %v2787_v36 = vadd.f32 %v2786_v30, %v7352_v4  ;;  %3011 = vmatmul.f32.gmra.mxu3 %v2055_v48  ;;  %3124 = vmatmul.f32.gmra.mxu0 %v6461_v31  ;;  %v7354_v31 = vld [vmem:[#allocation52_spill] sm:$0xff] }
 0x434   : > { %v2386_v45 = vadd.f32 %v6170_v34, %v7354_v31  ;;  %v3339_v34 = vld [vmem:[%s7120_s5] sm:$0xff]  ;;  %v7357_v4 = vld [vmem:[#allocation56_spill] sm:$0xff] }
 0x435   : > { %2833 = vmatmul.f32.gmra.mxu1 %v6721_v1  ;;  %v6725_v43 = vadd.f32 %v2899_v8, %v2787_v36  ;;  %2949 = vmatmul.f32.gmra.mxu2 %v6492_v63  ;;  %v7356_v8 = vld [vmem:[#allocation44_spill] sm:$0xff] }
 0x436   : > { %v2608_v29 = vpop.f32.mrf.mxu3  ;;  %v2499_v63 = vadd.f32 %v7356_v8, %v2386_v45  ;;  %3374 = vmatpush.msra.mxu2 %v3339_v34 }
 0x437   : > { %v2609_v50 = vadd.f32 %v2608_v29, %v2496_v52  ;;  %v2270_v29 = vld [vmem:[%s7118_s3 + $0x400] sm:$0xff] }
 0x438   : > { %v2724_v44 = vpop.f32.mrf.mxu0  ;;  %v2902_v38 = vpop.f32.mrf.mxu2  ;;  %3209 = vmatpush.msra.mxu1 %v2270_v29  ;;  %v7362_v29 = vld [vmem:[#allocation48_spill] sm:$0xff] }
 0x439   : > { %v6730_v0 = vadd.f32 %v2721_v56, %v2609_v50  ;;  %v6758_v50 = vld [vmem:[#allocation2 + $0x159] sm:$0xff] }
 0x43a   : > { %v2789_v27 = vpop.f32.mrf.mxu1 }
 0x43b   : > { %v2790_v57 = vadd.f32 %v2789_v27, %v7355_v58  ;;  %3014 = vmatmul.f32.gmra.mxu3 %v2056_v62  ;;  %3127 = vmatmul.f32.gmra.mxu0 %v6502_v6  ;;  %v6747_v6 = vld [vmem:[%s7119_s4] ss:$0 sm:$0xff] }
 0x43c   : > { %v2389_v36 = vadd.f32 %v6747_v6, %v7357_v4  ;;  %v7359_v62 = vld [vmem:[#allocation57_spill] sm:$0xff] }
 0x43d   : > { %2836 = vmatmul.f32.gmra.mxu1 %v6734_v54  ;;  %v6738_v40 = vadd.f32 %v2902_v38, %v2790_v57  ;;  %2952 = vmatmul.f32.gmra.mxu2 %v6518_v13  ;;  %v7358_v38 = vld [vmem:[#allocation53_spill] sm:$0xff] }
 0x43e   : > { %v2611_v56 = vpop.f32.mrf.mxu3  ;;  %v2502_v31 = vadd.f32 %v7358_v38, %v2389_v36 }
 0x43f   : > { %v2612_v20 = vadd.f32 %v2611_v56, %v2499_v63  ;;  %v2058_v63 = vld [vmem:[#allocation2 + $0xc0] sm:$0xff]  ;;  %v6771_v56 = vld [vmem:[#allocation2 + $0x169] sm:$0xff] }
 0x440   : > { %v2727_v30 = vpop.f32.mrf.mxu0  ;;  %v2905_v48 = vpop.f32.mrf.mxu2 }
 0x441   : > { %v6751_v51 = vadd.f32 %v2724_v44, %v2612_v20  ;;  %v7360_v20 = vld [vmem:[#allocation3_spill] sm:$0xff] }
 0x442   : > { %v2792_v13 = vpop.f32.mrf.mxu1 }
 0x443   : > { %v2793_v52 = vadd.f32 %v2792_v13, %v6488_v25  ;;  %3017 = vmatmul.f32.gmra.mxu3 %v2057_v55  ;;  %3130 = vmatmul.f32.gmra.mxu0 %v6525_v11  ;;  %v2392_v11 = vadd.f32 %v6747_v6, %v7359_v62  ;;  %v7361_v13 = vld [vmem:[#allocation46_spill] sm:$0xff] }
 0x444   : > { %v2395_v55 = vadd.f32 %v6747_v6, %v7361_v13  ;;  %v6801_v13 = vld [vmem:[#allocation2 + $0x18a] sm:$0xff] }
 0x445   : > { %2839 = vmatmul.f32.gmra.mxu1 %v6758_v50  ;;  %v6762_v44 = vadd.f32 %v2905_v48, %v2793_v52  ;;  %2955 = vmatmul.f32.gmra.mxu2 %v6538_v41  ;;  %v2505_v41 = vadd.f32 %v7360_v20, %v2392_v11 }
 0x446   : > { %v2614_v45 = vpop.f32.mrf.mxu3 }
 0x447   : > { %v2615_v25 = vadd.f32 %v2614_v45, %v2502_v31  ;;  %v6784_v45 = vld [vmem:[#allocation2 + $0x171] sm:$0xff] }
 0x448   : > { %v2908_v27 = vpop.f32.mrf.mxu2  ;;  %v2730_v57 = vpop.f32.mrf.mxu0 }
 0x449   : > { %v6767_v58 = vadd.f32 %v2727_v30, %v2615_v25  ;;  %v6786_v25 = vld [vmem:[#allocation2 + $0x182] sm:$0xff] }
 0x44a   : > { %v2795_v8 = vpop.f32.mrf.mxu1 }
 0x44b   : > { %v2796_v34 = vadd.f32 %v2795_v8, %v6514_v2  ;;  %3020 = vmatmul.f32.gmra.mxu3 %v2058_v63  ;;  %3133 = vmatmul.f32.gmra.mxu0 %v6541_v7  ;;  %v2059_v7 = vld [vmem:[#allocation2 + $0xc8] sm:$0xff]  ;;  %v7364_v63 = vld [vmem:[#allocation49_spill] sm:$0xff] }
 0x44d   : > { %2842 = vmatmul.f32.gmra.mxu1 %v6771_v56  ;;  %v6775_v48 = vadd.f32 %v2908_v27, %v2796_v34  ;;  %2958 = vmatmul.f32.gmra.mxu2 %v6557_v16  ;;  %v7363_v16 = vld [vmem:[#allocation45_spill] sm:$0xff]  ;;  %v2398_v34 = vadd.f32 %v6747_v6, %v7364_v63 }
 0x44e   : > { %v2617_v30 = vpop.f32.mrf.mxu3  ;;  %v2508_v27 = vadd.f32 %v7363_v16, %v2395_v55  ;;  %v7366_v55 = vld [vmem:[#allocation47_spill] sm:$0xff]  ;;  %v2061_v63 = vld [vmem:[#allocation2 + $0xe0] sm:$0xff] }
 0x44f   : > { %v2618_v4 = vadd.f32 %v2617_v30, %v2505_v41  ;;  %v2060_v41 = vld [vmem:[#allocation2 + $0xd8] sm:$0xff]  ;;  %v7365_v30 = vld [vmem:[#allocation54_spill] sm:$0xff] }
 0x450   : > { %v2911_v36 = vpop.f32.mrf.mxu2  ;;  %v2733_v31 = vpop.f32.mrf.mxu0 }
 0x451   : > { %v6780_v2 = vadd.f32 %v2730_v57, %v2618_v4 }
 0x452   : > { %v2798_v52 = vpop.f32.mrf.mxu1 }
 0x453   : > { %v2799_v38 = vadd.f32 %v2798_v52, %v7362_v29  ;;  %3023 = vmatmul.f32.gmra.mxu3 %v2059_v7  ;;  %3136 = vmatmul.f32.gmra.mxu0 %v6563_v18  ;;  %v2511_v52 = vadd.f32 %v7366_v55, %v2398_v34 }
 0x455   : > { %2845 = vmatmul.f32.gmra.mxu1 %v6784_v45  ;;  %v6790_v62 = vadd.f32 %v2911_v36, %v2799_v38  ;;  %2961 = vmatmul.f32.gmra.mxu2 %v6786_v25  ;;  %v6799_v36 = vld [vmem:[#allocation2 + $0x181] sm:$0xff] }
 0x456   : > { %v2620_v11 = vpop.f32.mrf.mxu3 }
 0x457   : > { %v2621_v57 = vadd.f32 %v2620_v11, %v2508_v27  ;;  %v7367_v27 = vld [vmem:[#allocation15_spill] sm:$0xff] }
 0x458   : > { %v2914_v8 = vpop.f32.mrf.mxu2  ;;  %v2736_v29 = vpop.f32.mrf.mxu0  ;;  %v2401_v11 = vadd.f32 %v6747_v6, %v7367_v27  ;;  %v3824_v27 = vld [vmem:[%s4199_s30 + $0x21] sm:$0xff] }
 0x459   : > { %v6795_v18 = vadd.f32 %v2733_v31, %v2621_v57 }
 0x45a   : > { %v2801_v20 = vpop.f32.mrf.mxu1 }
 0x45b   : > { %v2802_v4 = vadd.f32 %v2801_v20, %v7365_v30  ;;  %3026 = vmatmul.f32.gmra.mxu3 %v2060_v41  ;;  %3139 = vmatmul.f32.gmra.mxu0 %v6574_v12  ;;  %v3823_v20 = vld [vmem:[%s4199_s30 + $0x19] sm:$0xff]  ;;  %v7368_v41 = vld [vmem:[#allocation50_spill] sm:$0xff] }
 0x45c   : > { %v2514_v30 = vadd.f32 %v7368_v41, %v2401_v11  ;;  %v2110_v11 = vld [vmem:[#allocation2 + $0x32] sm:$0xff] }
 0x45d   : > { %2848 = vmatmul.f32.gmra.mxu1 %v6799_v36  ;;  %v6805_v7 = vadd.f32 %v2914_v8, %v2802_v4  ;;  %2964 = vmatmul.f32.gmra.mxu2 %v6801_v13  ;;  %v6815_v8 = vld [vmem:[#allocation2 + $0x189] sm:$0xff] }
 0x45e   : > { %v2623_v38 = vpop.f32.mrf.mxu3 }
 0x45f   : > { %v2624_v31 = vadd.f32 %v2623_v38, %v2511_v52 }
 0x460   : > { %v2917_v16 = vpop.f32.mrf.mxu2  ;;  %v2739_v52 = vpop.f32.mrf.mxu0 }
 0x461   : > { %v6810_v12 = vadd.f32 %v2736_v29, %v2624_v31  ;;  %v2062_v31 = vld [vmem:[#allocation2 + $0xf0] sm:$0xff] }
 0x462   : > { %v2804_v57 = vpop.f32.mrf.mxu1 }
 0x463   : > { %v2805_v34 = vadd.f32 %v2804_v57, %v6570_v5  ;;  %3029 = vmatmul.f32.gmra.mxu3 %v2061_v63  ;;  %3142 = vmatmul.f32.gmra.mxu0 %v6593_v9 }
 0x465   : > { %2851 = vmatmul.f32.gmra.mxu1 %v6815_v8  ;;  %v6819_v4 = vadd.f32 %v2917_v16, %v2805_v34  ;;  %3375 = vmatmul.f32.vlgmr.msra.gmra.mxu2 %v3823_v20  ;;  %v2063_v20 = vld [vmem:[#allocation2 + $0xf8] sm:$0xff] }
 0x466   : > { %v2626_v6 = vpop.f32.mrf.mxu3  ;;  %v3825_v34 = vld [vmem:[%s4199_s30 + $0x31] sm:$0xff] }
 0x467   : > { %v2627_v55 = vadd.f32 %v2626_v6, %v2514_v30  ;;  %v2111_v30 = vld [vmem:[#allocation2 + $0x3a] sm:$0xff] }
 0x468   : > { %v2920_v29 = vpop.f32.mrf.mxu2 }
 0x469   : > { %v6821_v38 = vadd.f32 %v2739_v52, %v2627_v55  ;;  %v2064_v55 = vld [vmem:[#allocation2 + $0x108] sm:$0xff]  ;;  %v3826_v52 = vld [vmem:[%s4199_s30 + $0x39] sm:$0xff] }
 0x46a   : > { %v2807_v5 = vpop.f32.mrf.mxu1 }
 0x46b   : > { %v2808_v9 = vadd.f32 %v2807_v5, %v6586_v61  ;;  %3032 = vmatmul.f32.gmra.mxu3 %v2062_v31  ;;  %3145 = vmatmul.f32.gmra.mxu0 %v6606_v22  ;;  %v2112_v5 = vld [vmem:[#allocation2 + $0x4a] sm:$0xff] }
 0x46d   : > { %3210 = vmatmul.f32.vlgmr.msra.gmra.mxu1 %v2110_v11  ;;  %v6826_v16 = vadd.f32 %v2920_v29, %v2808_v9  ;;  %3378 = vmatmul.f32.gmra.mxu2 %v3824_v27  ;;  %v2065_v27 = vld [vmem:[#allocation2 + $0x110] sm:$0xff] }
 0x46e   : > { %v3827_v9 = vld [vmem:[%s4199_s30 + $0x49] sm:$0xff] }
 0x470   : > { %v2923_v57 = vpop.f32.mrf.mxu2 }
 0x472   : > { %v2810_v63 = vpop.f32.mrf.mxu1 }
 0x473   : > { %v2811_v41 = vadd.f32 %v2810_v63, %v6602_v37  ;;  %3035 = vmatmul.f32.gmra.mxu3 %v2063_v20  ;;  %3148 = vmatmul.f32.gmra.mxu0 %v6625_v28  ;;  %v2066_v20 = vld [vmem:[#allocation2 + $0x120] sm:$0xff] }
 0x475   : > { %3213 = vmatmul.f32.gmra.mxu1 %v2111_v30  ;;  %v6831_v61 = vadd.f32 %v2923_v57, %v2811_v41  ;;  %3381 = vmatmul.f32.gmra.mxu2 %v3825_v34  ;;  %v2113_v57 = vld [vmem:[#allocation2 + $0x52] sm:$0xff]  ;;  %v2114_v30 = vld [vmem:[#allocation2 + $0x62] sm:$0xff] }
 0x476   : > { %v3828_v34 = vld [vmem:[%s4199_s30 + $0x51] sm:$0xff] }
 0x478   : > { %v2926_v22 = vpop.f32.mrf.mxu2 }
 0x47a   : > { %v2813_v6 = vpop.f32.mrf.mxu1 }
 0x47b   : > { %v2814_v29 = vadd.f32 %v2813_v6, %v6618_v14  ;;  %3038 = vmatmul.f32.gmra.mxu3 %v2064_v55  ;;  %3151 = vmatmul.f32.gmra.mxu0 %v6638_v19  ;;  %v2067_v6 = vld [vmem:[#allocation2 + $0x128] sm:$0xff] }
 0x47c   : > { %v3829_v55 = vld [vmem:[%s4199_s30 + $0x61] sm:$0xff] }
 0x47d   : > { %3216 = vmatmul.f32.gmra.mxu1 %v2112_v5  ;;  %v6836_v37 = vadd.f32 %v2926_v22, %v2814_v29  ;;  %3384 = vmatmul.f32.gmra.mxu2 %v3826_v52  ;;  %v2115_v29 = vld [vmem:[#allocation2 + $0x6a] sm:$0xff] }
 0x480   : > { %v2929_v28 = vpop.f32.mrf.mxu2 }
 0x482   : > { %v2816_v31 = vpop.f32.mrf.mxu1 }
 0x483   : > { %v2817_v11 = vadd.f32 %v2816_v31, %v6634_v49  ;;  %3041 = vmatmul.f32.gmra.mxu3 %v2065_v27  ;;  %3154 = vmatmul.f32.gmra.mxu0 %v6657_v60  ;;  %v3830_v31 = vld [vmem:[%s4199_s30 + $0x69] sm:$0xff] }
 0x485   : > { %3219 = vmatmul.f32.gmra.mxu1 %v2113_v57  ;;  %v6841_v14 = vadd.f32 %v2929_v28, %v2817_v11  ;;  %3387 = vmatmul.f32.gmra.mxu2 %v3827_v9  ;;  %v2068_v28 = vld [vmem:[#allocation2 + $0x138] sm:$0xff]  ;;  %v6858_v11 = vpop.f32.mrf.mxu3 }
 0x486   : > { %v2116_v9 = vld [vmem:[#allocation2 + $0x7a] sm:$0xff] }
 0x488   : > { %v2932_v19 = vpop.f32.mrf.mxu2 }
 0x48a   : > { %v2819_v63 = vpop.f32.mrf.mxu1 }
 0x48b   : > { %v2820_v41 = vadd.f32 %v2819_v63, %v6650_v10  ;;  %3044 = vmatmul.f32.gmra.mxu3 %v2066_v20  ;;  %3157 = vmatmul.f32.gmra.mxu0 %v6670_v24  ;;  %v2069_v63 = vld [vmem:[#allocation2 + $0x140] sm:$0xff] }
 0x48c   : > { %v3831_v20 = vld [vmem:[%s4199_s30 + $0x79] sm:$0xff] }
 0x48d   : > { %3222 = vmatmul.f32.gmra.mxu1 %v2114_v30  ;;  %v6846_v49 = vadd.f32 %v2932_v19, %v2820_v41  ;;  %3390 = vmatmul.f32.gmra.mxu2 %v3828_v34  ;;  %v6869_v30 = vpop.f32.mrf.mxu3 }
 0x490   : > { %v2935_v60 = vpop.f32.mrf.mxu2 }
 0x492   : > { %v2822_v22 = vpop.f32.mrf.mxu1 }
 0x493   : > { %v2823_v52 = vadd.f32 %v2822_v22, %v6666_v59  ;;  %3047 = vmatmul.f32.gmra.mxu3 %v2067_v6  ;;  %3160 = vmatmul.f32.gmra.mxu0 %v6689_v21  ;;  %v6856_v59 = vpop.f32.mrf.mxu0  ;;  %v2070_v6 = vld [vmem:[#allocation2 + $0x150] sm:$0xff] }
 0x495   : > { %3225 = vmatmul.f32.gmra.mxu1 %v2115_v29  ;;  %v6851_v10 = vadd.f32 %v2935_v60, %v2823_v52  ;;  %3393 = vmatmul.f32.gmra.mxu2 %v3829_v55  ;;  %v3832_v55 = vld [vmem:[%s4199_s30 + $0x81] sm:$0xff] }
 0x498   : > { %v2938_v24 = vpop.f32.mrf.mxu2 }
 0x49a   : > { %v2825_v5 = vpop.f32.mrf.mxu1 }
 0x49b   : > { %v2826_v27 = vadd.f32 %v2825_v5, %v6682_v53  ;;  %3050 = vmatmul.f32.gmra.mxu3 %v2068_v28  ;;  %3163 = vmatmul.f32.gmra.mxu0 %v6702_v33  ;;  %v2117_v53 = vld [vmem:[#allocation2 + $0x82] sm:$0xff]  ;;  %v6867_v41 = vpop.f32.mrf.mxu0  ;;  %v6878_v5 = vpop.f32.mrf.mxu3 }
 0x49d   : > { %3228 = vmatmul.f32.gmra.mxu1 %v2116_v9  ;;  %v6860_v21 = vadd.f32 %v2938_v24, %v2826_v27  ;;  %3396 = vmatmul.f32.gmra.mxu2 %v3830_v31  ;;  %v2071_v31 = vld [vmem:[#allocation2 + $0x158] sm:$0xff] }
 0x49e   : > { %v3833_v27 = vld [vmem:[%s4199_s30 + $0x91] sm:$0xff] }
 0x4a0   : > { %v2941_v57 = vpop.f32.mrf.mxu2 }
 0x4a2   : > { %v2828_v19 = vpop.f32.mrf.mxu1 }
 0x4a3   : > { %v2829_v34 = vadd.f32 %v2828_v19, %v6698_v23  ;;  %3053 = vmatmul.f32.gmra.mxu3 %v2069_v63  ;;  %3166 = vmatmul.f32.gmra.mxu0 %v6721_v1  ;;  %v2118_v23 = vld [vmem:[#allocation2 + $0x92] sm:$0xff]  ;;  %v6876_v24 = vpop.f32.mrf.mxu0  ;;  %v2072_v63 = vld [vmem:[#allocation2 + $0x168] sm:$0xff] }
 0x4a5   : > { %3231 = vmatmul.f32.gmra.mxu1 %v2117_v53  ;;  %v6865_v33 = vadd.f32 %v2941_v57, %v2829_v34  ;;  %3399 = vmatmul.f32.gmra.mxu2 %v3831_v20  ;;  %v3834_v20 = vld [vmem:[%s4199_s30 + $0x99] sm:$0xff]  ;;  %v6888_v53 = vpop.f32.mrf.mxu3 }
 0x4a8   : > { %v2944_v60 = vpop.f32.mrf.mxu2 }
 0x4aa   : > { %v2831_v22 = vpop.f32.mrf.mxu1 }
 0x4ab   : > { %v2832_v52 = vadd.f32 %v2831_v22, %v6714_v42  ;;  %3056 = vmatmul.f32.gmra.mxu3 %v2070_v6  ;;  %3169 = vmatmul.f32.gmra.mxu0 %v6734_v54  ;;  %v2119_v42 = vld [vmem:[#allocation2 + $0x9a] sm:$0xff]  ;;  %v6886_v34 = vpop.f32.mrf.mxu0 }
 0x4ad   : > { %3234 = vmatmul.f32.gmra.mxu1 %v2118_v23  ;;  %v6874_v1 = vadd.f32 %v2944_v60, %v2832_v52  ;;  %3402 = vmatmul.f32.gmra.mxu2 %v3832_v55  ;;  %v2073_v55 = vld [vmem:[#allocation2 + $0x170] sm:$0xff] }
 0x4ae   : > { %v3835_v52 = vld [vmem:[%s4199_s30 + $0xa9] sm:$0xff] }
 0x4b0   : > { %v2947_v29 = vpop.f32.mrf.mxu2 }
 0x4b2   : > { %v2834_v28 = vpop.f32.mrf.mxu1 }
 0x4b3   : > { %v2835_v9 = vadd.f32 %v2834_v28, %v6730_v0  ;;  %3059 = vmatmul.f32.gmra.mxu3 %v2071_v31  ;;  %3172 = vmatmul.f32.gmra.mxu0 %v6758_v50  ;;  %v2120_v0 = vld [vmem:[#allocation2 + $0xaa] sm:$0xff]  ;;  %v6899_v28 = vpop.f32.mrf.mxu3 }
 0x4b5   : > { %3237 = vmatmul.f32.gmra.mxu1 %v2119_v42  ;;  %v6883_v54 = vadd.f32 %v2947_v29, %v2835_v9  ;;  %3405 = vmatmul.f32.gmra.mxu2 %v3833_v27  ;;  %v2121_v29 = vld [vmem:[#allocation2 + $0xb2] sm:$0xff]  ;;  %v2074_v9 = vld [vmem:[#allocation2 + $0x180] sm:$0xff] }
 0x4b6   : > { %v3836_v42 = vld [vmem:[%s4199_s30 + $0xb1] sm:$0xff] }
 0x4b8   : > { %v2950_v57 = vpop.f32.mrf.mxu2 }
 0x4ba   : > { %v2837_v19 = vpop.f32.mrf.mxu1 }
 0x4bb   : > { %v2838_v60 = vadd.f32 %v2837_v19, %v6751_v51  ;;  %3062 = vmatmul.f32.gmra.mxu3 %v2072_v63  ;;  %3175 = vmatmul.f32.gmra.mxu0 %v6771_v56  ;;  %v6897_v51 = vpop.f32.mrf.mxu0  ;;  %v6910_v63 = vpop.f32.mrf.mxu3 }
 0x4bd   : > { %3240 = vmatmul.f32.gmra.mxu1 %v2120_v0  ;;  %v6892_v50 = vadd.f32 %v2950_v57, %v2838_v60  ;;  %3408 = vmatmul.f32.gmra.mxu2 %v3834_v20  ;;  %v2075_v0 = vld [vmem:[#allocation2 + $0x188] sm:$0xff] }
 0x4c0   : > { %v2953_v22 = vpop.f32.mrf.mxu2 }
 0x4c2   : > { %v2840_v6 = vpop.f32.mrf.mxu1 }
 0x4c3   : > { %v2841_v23 = vadd.f32 %v2840_v6, %v6767_v58  ;;  %3065 = vmatmul.f32.gmra.mxu3 %v2073_v55  ;;  %3178 = vmatmul.f32.gmra.mxu0 %v6784_v45  ;;  %v2122_v58 = vld [vmem:[#allocation2 + $0xc2] sm:$0xff]  ;;  %v6908_v19 = vpop.f32.mrf.mxu0 }
 0x4c5   : > { %3243 = vmatmul.f32.gmra.mxu1 %v2121_v29  ;;  %v6901_v56 = vadd.f32 %v2953_v22, %v2841_v23  ;;  %3411 = vmatmul.f32.gmra.mxu2 %v3835_v52  ;;  %v3837_v22 = vld [vmem:[%s4199_s30 + $0xc1] sm:$0xff]  ;;  %v2108_v52 = vld [vmem:[#allocation2 + $0x199] sm:$0xff]  ;;  %v6919_v29 = vpop.f32.mrf.mxu3 }
 0x4c8   : > { %v2956_v31 = vpop.f32.mrf.mxu2 }
 0x4ca   : > { %v2843_v27 = vpop.f32.mrf.mxu1 }
 0x4cb   : > { %v2844_v57 = vadd.f32 %v2843_v27, %v6780_v2  ;;  %3068 = vmatmul.f32.gmra.mxu3 %v2074_v9  ;;  %3181 = vmatmul.f32.gmra.mxu0 %v6799_v36  ;;  %v2123_v2 = vld [vmem:[#allocation2 + $0xca] sm:$0xff]  ;;  %v6917_v23 = vpop.f32.mrf.mxu0 }
 0x4cc   : > { %v3838_v27 = vld [vmem:[%s4199_s30 + $0xc9] sm:$0xff] }
 0x4cd   : > { %3246 = vmatmul.f32.gmra.mxu1 %v2122_v58  ;;  %v6906_v45 = vadd.f32 %v2956_v31, %v2844_v57  ;;  %3414 = vmatmul.f32.gmra.mxu2 %v3836_v42  ;;  %v2109_v58 = vld [vmem:[#allocation2 + $0x1a1] sm:$0xff] }
 0x4d0   : > { %v2959_v20 = vpop.f32.mrf.mxu2 }
 0x4d2   : > { %v2846_v60 = vpop.f32.mrf.mxu1 }
 0x4d3   : > { %v2847_v6 = vadd.f32 %v2846_v60, %v6795_v18  ;;  %3071 = vmatmul.f32.gmra.mxu3 %v2075_v0  ;;  %3184 = vmatmul.f32.gmra.mxu0 %v6815_v8  ;;  %v3921_v18 = vld [vmem:[#allocation2] sm:$0xff]  ;;  %v6926_v0 = vpop.f32.mrf.mxu0 }
 0x4d4   : > { %v2124_v8 = vld [vmem:[#allocation2 + $0xda] sm:$0xff] }
 0x4d5   : > { %3249 = vmatmul.f32.gmra.mxu1 %v2123_v2  ;;  %v6915_v36 = vadd.f32 %v2959_v20, %v2847_v6  ;;  %3417 = vmatmul.f32.gmra.mxu2 %v3837_v22  ;;  %v3839_v60 = vld [vmem:[%s4199_s30 + $0xd9] sm:$0xff]  ;;  %v6928_v22 = vpop.f32.mrf.mxu3  ;;  %v2125_v6 = vld [vmem:[#allocation2 + $0xe2] sm:$0xff]  ;;  %v2986_v2 = vadd.f32 %v6858_v11, %v6578_v47  ;;  %v2989_v11 = vadd.f32 %v6869_v30, %v6597_v46  ;;  %v3841_v46 = vld [vmem:[%s4199_s30 + $0xf1] sm:$0xff] }
 0x4d6   : > { %v2126_v47 = vld [vmem:[#allocation2 + $0xf2] sm:$0xff] }
 0x4d8   : > { %v2962_v55 = vpop.f32.mrf.mxu2 }
 0x4da   : > { %v2849_v31 = vpop.f32.mrf.mxu1 }
 0x4db   : > { %v2850_v9 = vadd.f32 %v2849_v31, %v6810_v12  ;;  %3074 = vmatmul.f32.gmra.mxu3 %v3921_v18  ;;  %3187 = vmatmul.f32.gmra.mxu0 %v2108_v52  ;;  %v6938_v52 = vld [vmem:[%s7121_s6] ss:$0 sm:$0xff] }
 0x4dd   : > { %3252 = vmatmul.f32.gmra.mxu1 %v2124_v8  ;;  %v6923_v42 = vadd.f32 %v2962_v55, %v2850_v9  ;;  %3420 = vmatmul.f32.gmra.mxu2 %v3838_v27  ;;  %v3099_v27 = vadd.f32 %v6856_v59, %v2986_v2  ;;  %v2127_v2 = vld [vmem:[#allocation2 + $0xfa] sm:$0xff] }
 0x4e0   : > { %v2965_v57 = vpop.f32.mrf.mxu2 }
 0x4e2   : > { %v2852_v20 = vpop.f32.mrf.mxu1 }
 0x4e3   : > { %v2853_v12 = vadd.f32 %v2852_v20, %v6821_v38  ;;  %3077 = vmatmul.f32.gmra.mxu3 %v3921_v18  ;;  %3190 = vmatmul.f32.gmra.mxu0 %v2109_v58  ;;  %v3840_v18 = vld [vmem:[%s4199_s30 + $0xe1] sm:$0xff]  ;;  %v3102_v20 = vadd.f32 %v6867_v41, %v2989_v11  ;;  %v3842_v11 = vld [vmem:[%s4199_s30 + $0xf9] sm:$0xff] }
 0x4e5   : > { %3255 = vmatmul.f32.gmra.mxu1 %v2125_v6  ;;  %v6933_v55 = vadd.f32 %v2965_v57, %v2853_v12  ;;  %3423 = vmatmul.f32.gmra.mxu2 %v3839_v60  ;;  %v6955_v6 = vpop.f32.mrf.mxu3 }
 0x4e8   : > { %v3376_v31 = vpop.f32.mrf.mxu2 }
 0x4e9   : > { %v3377_v38 = vadd.f32 %v6938_v52, %v3376_v31  ;;  %v2992_v31 = vadd.f32 %v6878_v5, %v6610_v32  ;;  %v2995_v32 = vadd.f32 %v6888_v53, %v6629_v17  ;;  %v2129_v17 = vld [vmem:[#allocation2 + $0x112] sm:$0xff]  ;;  %v2998_v53 = vadd.f32 %v6899_v28, %v6642_v15 }
 0x4ea   : > { %v3211_v9 = vpop.f32.mrf.mxu1  ;;  %v3001_v15 = vadd.f32 %v6910_v63, %v6661_v35  ;;  %v2131_v35 = vld [vmem:[#allocation2 + $0x12a] sm:$0xff]  ;;  %v3004_v63 = vadd.f32 %v6919_v29, %v6674_v26  ;;  %v2132_v26 = vld [vmem:[#allocation2 + $0x13a] sm:$0xff]  ;;  %v3007_v29 = vadd.f32 %v6928_v22, %v6693_v3  ;;  %v3010_v3 = vadd.f32 %v6955_v6, %v6706_v39  ;;  %v2134_v39 = vld [vmem:[#allocation2 + $0x152] sm:$0xff] }
 0x4eb   : > { %v3212_v8 = vadd.f32 %v3211_v9, %v3099_v27  ;;  %v3105_v41 = vadd.f32 %v6876_v24, %v2992_v31  ;;  %v3108_v24 = vadd.f32 %v6886_v34, %v2995_v32 }
 0x4ed   : > { %3258 = vmatmul.f32.gmra.mxu1 %v2126_v47  ;;  %v3472_v57 = vadd.f32 %v3377_v38, %v3212_v8  ;;  %3426 = vmatmul.f32.gmra.mxu2 %v3840_v18  ;;  %v6962_v8 = vpop.f32.mrf.mxu0 }
 0x4ef   : > { %v3504_v59 = vmax.f32 %v3472_v57, 0.0 }
 0x4f0   : > { %v3379_v58 = vpop.f32.mrf.mxu2 }
 0x4f1   : > { %3536 = vst [vmem:[%s6949_s27] sm:$0xff] %v3504_v59  ;;  %v3380_v60 = vadd.f32 %v6938_v52, %v3379_v58  ;;  %v2128_v59 = vld [vmem:[#allocation2 + $0x10a] sm:$0xff]  ;;  %v6967_v58 = vpop.f32.mrf.mxu3 }
 0x4f2   : > { %v3214_v12 = vpop.f32.mrf.mxu1  ;;  %v3013_v6 = vadd.f32 %v6967_v58, %v6725_v43 }
 0x4f3   : > { %v3215_v30 = vadd.f32 %v3214_v12, %v3102_v20 }
 0x4f5   : > { %3261 = vmatmul.f32.gmra.mxu1 %v2127_v2  ;;  %v3473_v27 = vadd.f32 %v3380_v60, %v3215_v30  ;;  %3429 = vmatmul.f32.gmra.mxu2 %v3841_v46  ;;  %v3843_v30 = vld [vmem:[%s4199_s30 + $0x109] sm:$0xff]  ;;  %v6973_v31 = vpop.f32.mrf.mxu0 }
 0x4f7   : > { %v3505_v38 = vmax.f32 %v3473_v27, 0.0 }
 0x4f8   : > { %v3382_v9 = vpop.f32.mrf.mxu2 }
 0x4f9   : > { %3537 = vst [vmem:[%s6949_s27 + $0x8] sm:$0xff] %v3505_v38  ;;  %v3383_v18 = vadd.f32 %v6938_v52, %v3382_v9  ;;  %v6977_v9 = vpop.f32.mrf.mxu3 }
 0x4fa   : > { %v3217_v47 = vpop.f32.mrf.mxu1  ;;  %v3016_v43 = vadd.f32 %v6977_v9, %v6738_v40 }
 0x4fb   : > { %v3218_v57 = vadd.f32 %v3217_v47, %v3105_v41  ;;  %v3111_v41 = vadd.f32 %v6897_v51, %v2998_v53  ;;  %v3114_v51 = vadd.f32 %v6908_v19, %v3001_v15 }
 0x4fd   : > { %3264 = vmatmul.f32.gmra.mxu1 %v2128_v59  ;;  %v3474_v5 = vadd.f32 %v3383_v18, %v3218_v57  ;;  %3432 = vmatmul.f32.gmra.mxu2 %v3842_v11  ;;  %v3844_v11 = vld [vmem:[%s4199_s30 + $0x111] sm:$0xff]  ;;  %v2130_v59 = vld [vmem:[#allocation2 + $0x122] sm:$0xff]  ;;  %v6985_v32 = vpop.f32.mrf.mxu0 }
 0x4ff   : > { %v3506_v20 = vmax.f32 %v3474_v5, 0.0 }
 0x500   : > { %v3385_v60 = vpop.f32.mrf.mxu2 }
 0x501   : > { %3538 = vst [vmem:[%s6949_s27 + $0x10] sm:$0xff] %v3506_v20  ;;  %v3386_v12 = vadd.f32 %v6938_v52, %v3385_v60 }
 0x502   : > { %v3220_v46 = vpop.f32.mrf.mxu1 }
 0x503   : > { %v3221_v2 = vadd.f32 %v3220_v46, %v3108_v24  ;;  %v6990_v24 = vpop.f32.mrf.mxu3  ;;  %v3845_v46 = vld [vmem:[%s4199_s30 + $0x121] sm:$0xff] }
 0x504   : > { %v3019_v40 = vadd.f32 %v6990_v24, %v6762_v44 }
 0x505   : > { %3267 = vmatmul.f32.gmra.mxu1 %v2129_v17  ;;  %v3475_v27 = vadd.f32 %v3386_v12, %v3221_v2  ;;  %3435 = vmatmul.f32.gmra.mxu2 %v3843_v30  ;;  %v6995_v53 = vpop.f32.mrf.mxu0 }
 0x507   : > { %v3507_v38 = vmax.f32 %v3475_v27, 0.0  ;;  %v3117_v27 = vadd.f32 %v6917_v23, %v3004_v63  ;;  %v3120_v23 = vadd.f32 %v6926_v0, %v3007_v29  ;;  %v3123_v0 = vadd.f32 %v6962_v8, %v3010_v3  ;;  %v3849_v29 = vld [vmem:[%s4199_s30 + $0x151] sm:$0xff] }
 0x508   : > { %v3388_v34 = vpop.f32.mrf.mxu2 }
 0x509   : > { %3539 = vst [vmem:[%s6949_s27 + $0x18] sm:$0xff] %v3507_v38  ;;  %v3389_v18 = vadd.f32 %v6938_v52, %v3388_v34 }
 0x50a   : > { %v3223_v47 = vpop.f32.mrf.mxu1 }
 0x50b   : > { %v3224_v57 = vadd.f32 %v3223_v47, %v3111_v41  ;;  %v3846_v41 = vld [vmem:[%s4199_s30 + $0x129] sm:$0xff]  ;;  %v7001_v47 = vpop.f32.mrf.mxu3 }
 0x50c   : > { %v3022_v44 = vadd.f32 %v7001_v47, %v6775_v48 }
 0x50d   : > { %3270 = vmatmul.f32.gmra.mxu1 %v2130_v59  ;;  %v3476_v28 = vadd.f32 %v3389_v18, %v3224_v57  ;;  %3438 = vmatmul.f32.gmra.mxu2 %v3844_v11 }
 0x50f   : > { %v3508_v5 = vmax.f32 %v3476_v28, 0.0  ;;  %v7008_v28 = vpop.f32.mrf.mxu0 }
 0x510   : > { %v3391_v20 = vpop.f32.mrf.mxu2 }
 0x511   : > { %3540 = vst [vmem:[%s6949_s27 + $0x20] sm:$0xff] %v3508_v5  ;;  %v3392_v60 = vadd.f32 %v6938_v52, %v3391_v20  ;;  %v3847_v20 = vld [vmem:[%s4199_s30 + $0x139] sm:$0xff] }
 0x512   : > { %v3226_v12 = vpop.f32.mrf.mxu1 }
 0x513   : > { %v3227_v30 = vadd.f32 %v3226_v12, %v3114_v51  ;;  %v7013_v12 = vpop.f32.mrf.mxu3 }
 0x515   : > { %3273 = vmatmul.f32.gmra.mxu1 %v2131_v35  ;;  %v3477_v2 = vadd.f32 %v3392_v60, %v3227_v30  ;;  %3441 = vmatmul.f32.gmra.mxu2 %v3845_v46  ;;  %v2133_v60 = vld [vmem:[#allocation2 + $0x142] sm:$0xff] }
 0x517   : > { %v3509_v17 = vmax.f32 %v3477_v2, 0.0  ;;  %v3848_v2 = vld [vmem:[%s4199_s30 + $0x141] sm:$0xff] }
 0x518   : > { %v3394_v19 = vpop.f32.mrf.mxu2 }
 0x519   : > { %3541 = vst [vmem:[%s6949_s27 + $0x28] sm:$0xff] %v3509_v17  ;;  %v3395_v38 = vadd.f32 %v6938_v52, %v3394_v19  ;;  %v7019_v19 = vpop.f32.mrf.mxu0 }
 0x51a   : > { %v3229_v34 = vpop.f32.mrf.mxu1 }
 0x51b   : > { %v3230_v18 = vadd.f32 %v3229_v34, %v3117_v27  ;;  %v7023_v34 = vpop.f32.mrf.mxu3 }
 0x51d   : > { %3276 = vmatmul.f32.gmra.mxu1 %v2132_v26  ;;  %v3478_v11 = vadd.f32 %v3395_v38, %v3230_v18  ;;  %3444 = vmatmul.f32.gmra.mxu2 %v3846_v41  ;;  %v3126_v41 = vadd.f32 %v6973_v31, %v3013_v6  ;;  %v3129_v31 = vadd.f32 %v6985_v32, %v3016_v43  ;;  %v2137_v6 = vld [vmem:[#allocation2 + $0x172] sm:$0xff] }
 0x51e   : > { %v3132_v32 = vadd.f32 %v6995_v53, %v3019_v40  ;;  %v3135_v53 = vadd.f32 %v7008_v28, %v3022_v44  ;;  %v2140_v40 = vld [vmem:[#allocation2 + $0x19a] sm:$0xff] }
 0x51f   : > { %v3510_v57 = vmax.f32 %v3478_v11, 0.0 }
 0x520   : > { %v3397_v59 = vpop.f32.mrf.mxu2 }
 0x521   : > { %3542 = vst [vmem:[%s6949_s27 + $0x30] sm:$0xff] %v3510_v57  ;;  %v3398_v15 = vadd.f32 %v6938_v52, %v3397_v59  ;;  %v2135_v57 = vld [vmem:[#allocation2 + $0x15a] sm:$0xff]  ;;  %v3140_v59 = vpop.f32.mrf.mxu0 }
 0x522   : > { %v3232_v5 = vpop.f32.mrf.mxu1 }
 0x523   : > { %v3233_v51 = vadd.f32 %v3232_v5, %v3120_v23 }
 0x525   : > { %3279 = vmatmul.f32.gmra.mxu1 %v2133_v60  ;;  %v3479_v22 = vadd.f32 %v3398_v15, %v3233_v51  ;;  %3447 = vmatmul.f32.gmra.mxu2 %v3847_v20  ;;  %v3030_v20 = vpop.f32.mrf.mxu3  ;;  %v3850_v60 = vld [vmem:[%s4199_s30 + $0x159] sm:$0xff] }
 0x527   : > { %v3511_v46 = vmax.f32 %v3479_v22, 0.0  ;;  %v2136_v22 = vld [vmem:[#allocation2 + $0x16a] sm:$0xff] }
 0x528   : > { %v3400_v30 = vpop.f32.mrf.mxu2 }
 0x529   : > { %3543 = vst [vmem:[%s6949_s27 + $0x38] sm:$0xff] %v3511_v46  ;;  %v3401_v35 = vadd.f32 %v6938_v52, %v3400_v30  ;;  %v3143_v30 = vpop.f32.mrf.mxu0 }
 0x52a   : > { %v3235_v63 = vpop.f32.mrf.mxu1 }
 0x52b   : > { %v3236_v17 = vadd.f32 %v3235_v63, %v3123_v0 }
 0x52d   : > { %3282 = vmatmul.f32.gmra.mxu1 %v2134_v39  ;;  %v3480_v27 = vadd.f32 %v3401_v35, %v3236_v17  ;;  %3450 = vmatmul.f32.gmra.mxu2 %v3848_v2  ;;  %v3851_v2 = vld [vmem:[%s4199_s30 + $0x169] sm:$0xff]  ;;  %v3033_v39 = vpop.f32.mrf.mxu3 }
 0x52e   : > { %v3034_v44 = vadd.f32 %v3033_v39, %v6826_v16 }
 0x52f   : > { %v3512_v38 = vmax.f32 %v3480_v27, 0.0 }
 0x530   : > { %v3403_v8 = vpop.f32.mrf.mxu2 }
 0x531   : > { %3544 = vst [vmem:[%s6949_s27 + $0x40] sm:$0xff] %v3512_v38  ;;  %v3404_v18 = vadd.f32 %v6938_v52, %v3403_v8 }
 0x532   : > { %v3238_v26 = vpop.f32.mrf.mxu1 }
 0x533   : > { %v3239_v11 = vadd.f32 %v3238_v26, %v3126_v41  ;;  %v3146_v41 = vpop.f32.mrf.mxu0  ;;  %v3852_v26 = vld [vmem:[%s4199_s30 + $0x171] sm:$0xff] }
 0x535   : > { %3285 = vmatmul.f32.gmra.mxu1 %v2135_v57  ;;  %v3481_v58 = vadd.f32 %v3404_v18, %v3239_v11  ;;  %3453 = vmatmul.f32.gmra.mxu2 %v3849_v29  ;;  %v3025_v11 = vadd.f32 %v7013_v12, %v6790_v62  ;;  %v3036_v47 = vpop.f32.mrf.mxu3  ;;  %v3028_v62 = vadd.f32 %v7023_v34, %v6805_v7 }
 0x537   : > { %v3513_v23 = vmax.f32 %v3481_v58, 0.0  ;;  %v3138_v28 = vadd.f32 %v7019_v19, %v3025_v11  ;;  %v3141_v19 = vadd.f32 %v3140_v59, %v3028_v62 }
 0x538   : > { %v3406_v15 = vpop.f32.mrf.mxu2 }
 0x539   : > { %3545 = vst [vmem:[%s6949_s27 + $0x48] sm:$0xff] %v3513_v23  ;;  %v3407_v5 = vadd.f32 %v6938_v52, %v3406_v15  ;;  %v3853_v15 = vld [vmem:[%s4199_s30 + $0x181] sm:$0xff] }
 0x53a   : > { %v3241_v51 = vpop.f32.mrf.mxu1 }
 0x53b   : > { %v3242_v3 = vadd.f32 %v3241_v51, %v3129_v31 }
 0x53d   : > { %3288 = vmatmul.f32.gmra.mxu1 %v2136_v22  ;;  %v3482_v9 = vadd.f32 %v3407_v5, %v3242_v3  ;;  %3456 = vmatmul.f32.gmra.mxu2 %v3850_v60  ;;  %v3149_v5 = vpop.f32.mrf.mxu0  ;;  %v3039_v51 = vpop.f32.mrf.mxu3 }
 0x53f   : > { %v3514_v46 = vmax.f32 %v3482_v9, 0.0  ;;  %v3854_v9 = vld [vmem:[%s4199_s30 + $0x189] sm:$0xff] }
 0x540   : > { %v3409_v0 = vpop.f32.mrf.mxu2 }
 0x541   : > { %3546 = vst [vmem:[%s6949_s27 + $0x50] sm:$0xff] %v3514_v46  ;;  %v3410_v35 = vadd.f32 %v6938_v52, %v3409_v0  ;;  %v3031_v0 = vadd.f32 %v3030_v20, %v6819_v4 }
 0x542   : > { %v3244_v63 = vpop.f32.mrf.mxu1 }
 0x543   : > { %v3245_v17 = vadd.f32 %v3244_v63, %v3132_v32 }
 0x545   : > { %3291 = vmatmul.f32.gmra.mxu1 %v2137_v6  ;;  %v3483_v24 = vadd.f32 %v3410_v35, %v3245_v17  ;;  %3459 = vmatmul.f32.gmra.mxu2 %v3851_v2  ;;  %v3144_v35 = vadd.f32 %v3143_v30, %v3031_v0  ;;  %v3042_v59 = vpop.f32.mrf.mxu3  ;;  %v2141_v17 = vld [vmem:[#allocation2 + $0x1a2] sm:$0xff] }
 0x547   : > { %v3515_v27 = vmax.f32 %v3483_v24, 0.0 }
 0x548   : > { %v3412_v38 = vpop.f32.mrf.mxu2 }
 0x549   : > { %3547 = vst [vmem:[%s6949_s27 + $0x58] sm:$0xff] %v3515_v27  ;;  %v3413_v8 = vadd.f32 %v6938_v52, %v3412_v38  ;;  %v3147_v38 = vadd.f32 %v3146_v41, %v3034_v44  ;;  %v3040_v41 = vadd.f32 %v3039_v51, %v6836_v37 }
 0x54a   : > { %v3247_v18 = vpop.f32.mrf.mxu1 }
 0x54b   : > { %v3248_v29 = vadd.f32 %v3247_v18, %v3135_v53 }
 0x54d   : > { %3294 = vmatmul.f32.gmra.mxu1 %v6786_v25  ;;  %v3484_v48 = vadd.f32 %v3413_v8, %v3248_v29  ;;  %3462 = vmatmul.f32.gmra.mxu2 %v3852_v26  ;;  %v3045_v18 = vpop.f32.mrf.mxu3  ;;  %v3037_v26 = vadd.f32 %v3036_v47, %v6831_v61 }
 0x54f   : > { %v3516_v57 = vmax.f32 %v3484_v48, 0.0  ;;  %v3150_v16 = vadd.f32 %v3149_v5, %v3037_v26  ;;  %v3043_v5 = vadd.f32 %v3042_v59, %v6841_v14 }
 0x550   : > { %v3415_v43 = vpop.f32.mrf.mxu2 }
 0x551   : > { %3548 = vst [vmem:[%s6949_s27 + $0x60] sm:$0xff] %v3516_v57  ;;  %v3416_v58 = vadd.f32 %v6938_v52, %v3415_v43 }
 0x552   : > { %v3250_v23 = vpop.f32.mrf.mxu1 }
 0x553   : > { %v3251_v31 = vadd.f32 %v3250_v23, %v3138_v28 }
 0x555   : > { %3297 = vmatmul.f32.gmra.mxu1 %v6801_v13  ;;  %v3485_v25 = vadd.f32 %v3416_v58, %v3251_v31  ;;  %3465 = vmatmul.f32.gmra.mxu2 %v3853_v15  ;;  %v3152_v13 = vpop.f32.mrf.mxu0  ;;  %v3048_v23 = vpop.f32.mrf.mxu3 }
 0x556   : > { %v3153_v62 = vadd.f32 %v3152_v13, %v3040_v41 }
 0x557   : > { %v3517_v12 = vmax.f32 %v3485_v25, 0.0 }
 0x558   : > { %v3418_v60 = vpop.f32.mrf.mxu2 }
 0x559   : > { %3549 = vst [vmem:[%s6949_s27 + $0x68] sm:$0xff] %v3517_v12  ;;  %v3419_v3 = vadd.f32 %v6938_v52, %v3418_v60 }
 0x55a   : > { %v3253_v22 = vpop.f32.mrf.mxu1 }
 0x55b   : > { %v3254_v46 = vadd.f32 %v3253_v22, %v3141_v19 }
 0x55d   : > { %3300 = vmatmul.f32.gmra.mxu1 %v2140_v40  ;;  %v3486_v7 = vadd.f32 %v3419_v3, %v3254_v46  ;;  %3468 = vmatmul.f32.gmra.mxu2 %v3854_v9  ;;  %v3155_v24 = vpop.f32.mrf.mxu0  ;;  %v3051_v3 = vpop.f32.mrf.mxu3  ;;  %v3046_v46 = vadd.f32 %v3045_v18, %v6846_v49 }
 0x55e   : > { %v3156_v37 = vadd.f32 %v3155_v24, %v3043_v5 }
 0x55f   : > { %v3518_v34 = vmax.f32 %v3486_v7, 0.0 }
 0x560   : > { %v3421_v32 = vpop.f32.mrf.mxu2 }
 0x561   : > { %3550 = vst [vmem:[%s6949_s27 + $0x70] sm:$0xff] %v3518_v34  ;;  %v3422_v63 = vadd.f32 %v6938_v52, %v3421_v32 }
 0x562   : > { %v3256_v2 = vpop.f32.mrf.mxu1 }
 0x563   : > { %v3257_v6 = vadd.f32 %v3256_v2, %v3144_v35  ;;  %v3049_v2 = vadd.f32 %v3048_v23, %v6851_v10 }
 0x565   : > { %3303 = vmatmul.f32.gmra.mxu1 %v2141_v17  ;;  %v3487_v4 = vadd.f32 %v3422_v63, %v3257_v6  ;;  %v3158_v57 = vpop.f32.mrf.mxu0  ;;  %v3054_v35 = vpop.f32.mrf.mxu3 }
 0x566   : > { %v3159_v32 = vadd.f32 %v3158_v57, %v3046_v46 }
 0x567   : > { %v3519_v20 = vmax.f32 %v3487_v4, 0.0 }
 0x568   : > { %v3424_v27 = vpop.f32.mrf.mxu2 }
 0x569   : > { %3551 = vst [vmem:[%s6949_s27 + $0x78] sm:$0xff] %v3519_v20  ;;  %v3425_v53 = vadd.f32 %v6938_v52, %v3424_v27 }
 0x56a   : > { %v3259_v8 = vpop.f32.mrf.mxu1 }
 0x56b   : > { %v3260_v30 = vadd.f32 %v3259_v8, %v3147_v38 }
 0x56d   : > { %v3488_v29 = vadd.f32 %v3425_v53, %v3260_v30  ;;  %v3161_v12 = vpop.f32.mrf.mxu0  ;;  %v3057_v38 = vpop.f32.mrf.mxu3  ;;  %v3052_v53 = vadd.f32 %v3051_v3, %v6860_v21 }
 0x56e   : > { %v3162_v49 = vadd.f32 %v3161_v12, %v3049_v2 }
 0x56f   : > { %v3520_v11 = vmax.f32 %v3488_v29, 0.0 }
 0x570   : > { %v3427_v48 = vpop.f32.mrf.mxu2 }
 0x571   : > { %3552 = vst [vmem:[%s6949_s27 + $0x80] sm:$0xff] %v3520_v11  ;;  %v3428_v39 = vadd.f32 %v6938_v52, %v3427_v48 }
 0x572   : > { %v3262_v43 = vpop.f32.mrf.mxu1 }
 0x573   : > { %v3263_v28 = vadd.f32 %v3262_v43, %v3150_v16  ;;  %v3055_v16 = vadd.f32 %v3054_v35, %v6865_v33 }
 0x575   : > { %v3489_v58 = vadd.f32 %v3428_v39, %v3263_v28  ;;  %v3164_v7 = vpop.f32.mrf.mxu0  ;;  %v3060_v57 = vpop.f32.mrf.mxu3 }
 0x576   : > { %v3165_v26 = vadd.f32 %v3164_v7, %v3052_v53 }
 0x577   : > { %v3521_v15 = vmax.f32 %v3489_v58, 0.0 }
 0x578   : > { %v3430_v31 = vpop.f32.mrf.mxu2 }
 0x579   : > { %3553 = vst [vmem:[%s6949_s27 + $0x88] sm:$0xff] %v3521_v15  ;;  %v3431_v61 = vadd.f32 %v6938_v52, %v3430_v31  ;;  %v3058_v31 = vadd.f32 %v3057_v38, %v6874_v1 }
 0x57a   : > { %v3265_v47 = vpop.f32.mrf.mxu1 }
 0x57b   : > { %v3266_v25 = vadd.f32 %v3265_v47, %v3153_v62 }
 0x57d   : > { %v3490_v60 = vadd.f32 %v3431_v61, %v3266_v25  ;;  %v3167_v44 = vpop.f32.mrf.mxu0  ;;  %v3063_v47 = vpop.f32.mrf.mxu3 }
 0x57e   : > { %v3168_v41 = vadd.f32 %v3167_v44, %v3055_v16  ;;  %v3064_v7 = vadd.f32 %v3063_v47, %v6892_v50 }
 0x57f   : > { %v3522_v19 = vmax.f32 %v3490_v60, 0.0 }
 0x580   : > { %v3433_v22 = vpop.f32.mrf.mxu2 }
 0x581   : > { %3554 = vst [vmem:[%s6949_s27 + $0x90] sm:$0xff] %v3522_v19  ;;  %v3434_v51 = vadd.f32 %v6938_v52, %v3433_v22  ;;  %v3061_v19 = vadd.f32 %v3060_v57, %v6883_v54 }
 0x582   : > { %v3268_v40 = vpop.f32.mrf.mxu1 }
 0x583   : > { %v3269_v9 = vadd.f32 %v3268_v40, %v3156_v37 }
 0x585   : > { %v3491_v0 = vadd.f32 %v3434_v51, %v3269_v9  ;;  %v3170_v29 = vpop.f32.mrf.mxu0  ;;  %v3066_v9 = vpop.f32.mrf.mxu3 }
 0x586   : > { %v3171_v33 = vadd.f32 %v3170_v29, %v3058_v31 }
 0x587   : > { %v3523_v13 = vmax.f32 %v3491_v0, 0.0 }
 0x588   : > { %v3436_v34 = vpop.f32.mrf.mxu2 }
 0x589   : > { %3555 = vst [vmem:[%s6949_s27 + $0x98] sm:$0xff] %v3523_v13  ;;  %v3437_v14 = vadd.f32 %v6938_v52, %v3436_v34 }
 0x58a   : > { %v3271_v63 = vpop.f32.mrf.mxu1 }
 0x58b   : > { %v3272_v59 = vadd.f32 %v3271_v63, %v3159_v32 }
 0x58d   : > { %v3492_v17 = vadd.f32 %v3437_v14, %v3272_v59  ;;  %v3173_v15 = vpop.f32.mrf.mxu0  ;;  %v3069_v2 = vpop.f32.mrf.mxu3 }
 0x58e   : > { %v3174_v40 = vadd.f32 %v3173_v15, %v3061_v19  ;;  %v3070_v38 = vadd.f32 %v3069_v2, %v6906_v45 }
 0x58f   : > { %v3524_v6 = vmax.f32 %v3492_v17, 0.0  ;;  %v3067_v17 = vadd.f32 %v3066_v9, %v6901_v56 }
 0x590   : > { %v3439_v4 = vpop.f32.mrf.mxu2 }
 0x591   : > { %3556 = vst [vmem:[%s6949_s27 + $0xa0] sm:$0xff] %v3524_v6  ;;  %v3440_v20 = vadd.f32 %v6938_v52, %v3439_v4 }
 0x592   : > { %v3274_v24 = vpop.f32.mrf.mxu1 }
 0x593   : > { %v3275_v27 = vadd.f32 %v3274_v24, %v3162_v49 }
 0x595   : > { %v3493_v8 = vadd.f32 %v3440_v20, %v3275_v27  ;;  %v3176_v22 = vpop.f32.mrf.mxu0 }
 0x596   : > { %v3177_v54 = vadd.f32 %v3176_v22, %v3064_v7 }
 0x597   : > { %v3525_v30 = vmax.f32 %v3493_v8, 0.0  ;;  %v3072_v8 = vpop.f32.mrf.mxu3 }
 0x598   : > { %v3442_v18 = vpop.f32.mrf.mxu2 }
 0x599   : > { %3557 = vst [vmem:[%s6949_s27 + $0xa8] sm:$0xff] %v3525_v30  ;;  %v3443_v10 = vadd.f32 %v6938_v52, %v3442_v18 }
 0x59a   : > { %v3277_v11 = vpop.f32.mrf.mxu1 }
 0x59b   : > { %v3278_v48 = vadd.f32 %v3277_v11, %v3165_v26 }
 0x59d   : > { %v3494_v39 = vadd.f32 %v3443_v10, %v3278_v48  ;;  %v3179_v32 = vpop.f32.mrf.mxu0  ;;  %v3073_v48 = vadd.f32 %v3072_v8, %v6915_v36 }
 0x59e   : > { %v3180_v49 = vadd.f32 %v3179_v32, %v3067_v17 }
 0x59f   : > { %v3526_v43 = vmax.f32 %v3494_v39, 0.0  ;;  %v3075_v57 = vpop.f32.mrf.mxu3 }
 0x5a0   : > { %v3445_v28 = vpop.f32.mrf.mxu2 }
 0x5a1   : > { %3558 = vst [vmem:[%s6949_s27 + $0xb0] sm:$0xff] %v3526_v43  ;;  %v3446_v21 = vadd.f32 %v6938_v52, %v3445_v28 }
 0x5a2   : > { %v3280_v58 = vpop.f32.mrf.mxu1 }
 0x5a3   : > { %v3281_v23 = vadd.f32 %v3280_v58, %v3168_v41 }
 0x5a5   : > { %v3495_v62 = vadd.f32 %v3446_v21, %v3281_v23  ;;  %v3182_v20 = vpop.f32.mrf.mxu0  ;;  %v3076_v23 = vadd.f32 %v3075_v57, %v6923_v42 }
 0x5a6   : > { %v3183_v26 = vadd.f32 %v3182_v20, %v3070_v38 }
 0x5a7   : > { %v3527_v61 = vmax.f32 %v3495_v62, 0.0  ;;  %v3078_v47 = vpop.f32.mrf.mxu3 }
 0x5a8   : > { %v3448_v25 = vpop.f32.mrf.mxu2 }
 0x5a9   : > { %3559 = vst [vmem:[%s6949_s27 + $0xb8] sm:$0xff] %v3527_v61  ;;  %v3449_v12 = vadd.f32 %v6938_v52, %v3448_v25 }
 0x5aa   : > { %v3283_v5 = vpop.f32.mrf.mxu1 }
 0x5ab   : > { %v3284_v60 = vadd.f32 %v3283_v5, %v3171_v33 }
 0x5ad   : > { %v3496_v3 = vadd.f32 %v3449_v12, %v3284_v60  ;;  %v3185_v11 = vpop.f32.mrf.mxu0  ;;  %v3079_v12 = vadd.f32 %v3078_v47, %v6933_v55 }
 0x5ae   : > { %v3186_v45 = vadd.f32 %v3185_v11, %v3073_v48 }
 0x5af   : > { %v3528_v37 = vmax.f32 %v3496_v3, 0.0 }
 0x5b0   : > { %v3451_v51 = vpop.f32.mrf.mxu2 }
 0x5b1   : > { %3560 = vst [vmem:[%s6949_s27 + $0xc0] sm:$0xff] %v3528_v37  ;;  %v3452_v1 = vadd.f32 %v6938_v52, %v3451_v51 }
 0x5b2   : > { %v3286_v46 = vpop.f32.mrf.mxu1 }
 0x5b3   : > { %v3287_v0 = vadd.f32 %v3286_v46, %v3174_v40 }
 0x5b5   : > { %v3497_v13 = vadd.f32 %v3452_v1, %v3287_v0  ;;  %v3188_v58 = vpop.f32.mrf.mxu0 }
 0x5b6   : > { %v3189_v61 = vadd.f32 %v3188_v58, %v3076_v23 }
 0x5b7   : > { %v3529_v34 = vmax.f32 %v3497_v13, 0.0 }
 0x5b8   : > { %v3454_v14 = vpop.f32.mrf.mxu2 }
 0x5b9   : > { %3561 = vst [vmem:[%s6949_s27 + $0xc8] sm:$0xff] %v3529_v34  ;;  %v3455_v35 = vadd.f32 %v6938_v52, %v3454_v14 }
 0x5ba   : > { %v3289_v63 = vpop.f32.mrf.mxu1 }
 0x5bb   : > { %v3290_v59 = vadd.f32 %v3289_v63, %v3177_v54 }
 0x5bd   : > { %v3498_v6 = vadd.f32 %v3455_v35, %v3290_v59  ;;  %v3191_v60 = vpop.f32.mrf.mxu0 }
 0x5be   : > { %v3192_v22 = vadd.f32 %v3191_v60, %v3079_v12 }
 0x5bf   : > { %v3530_v44 = vmax.f32 %v3498_v6, 0.0 }
 0x5c0   : > { %v3457_v4 = vpop.f32.mrf.mxu2 }
 0x5c1   : > { %3562 = vst [vmem:[%s6949_s27 + $0xd0] sm:$0xff] %v3530_v44  ;;  %v3458_v50 = vadd.f32 %v6938_v52, %v3457_v4 }
 0x5c2   : > { %v3292_v24 = vpop.f32.mrf.mxu1 }
 0x5c3   : > { %v3293_v27 = vadd.f32 %v3292_v24, %v3180_v49 }
 0x5c5   : > { %v3499_v53 = vadd.f32 %v3458_v50, %v3293_v27 }
 0x5c7   : > { %v3531_v30 = vmax.f32 %v3499_v53, 0.0 }
 0x5c8   : > { %v3460_v18 = vpop.f32.mrf.mxu2 }
 0x5c9   : > { %3563 = vst [vmem:[%s6949_s27 + $0xd8] sm:$0xff] %v3531_v30  ;;  %v3461_v56 = vadd.f32 %v6938_v52, %v3460_v18 }
 0x5ca   : > { %v3295_v10 = vpop.f32.mrf.mxu1 }
 0x5cb   : > { %v3296_v29 = vadd.f32 %v3295_v10, %v3183_v26 }
 0x5cd   : > { %v3500_v16 = vadd.f32 %v3461_v56, %v3296_v29 }
 0x5cf   : > { %v3532_v39 = vmax.f32 %v3500_v16, 0.0 }
 0x5d0   : > { %v3463_v43 = vpop.f32.mrf.mxu2 }
 0x5d1   : > { %3564 = vst [vmem:[%s6949_s27 + $0xe0] sm:$0xff] %v3532_v39  ;;  %v3464_v28 = vadd.f32 %v6938_v52, %v3463_v43 }
 0x5d2   : > { %v3298_v41 = vpop.f32.mrf.mxu1 }
 0x5d3   : > { %v3299_v21 = vadd.f32 %v3298_v41, %v3186_v45 }
 0x5d5   : > { %v3501_v15 = vadd.f32 %v3464_v28, %v3299_v21 }
 0x5d7   : > { %v3533_v31 = vmax.f32 %v3501_v15, 0.0 }
 0x5d8   : > { %v3466_v62 = vpop.f32.mrf.mxu2 }
 0x5d9   : > { %3565 = vst [vmem:[%s6949_s27 + $0xe8] sm:$0xff] %v3533_v31  ;;  %v3467_v36 = vadd.f32 %v6938_v52, %v3466_v62 }
 0x5da   : > { %v3301_v25 = vpop.f32.mrf.mxu1 }
 0x5db   : > { %v3302_v33 = vadd.f32 %v3301_v25, %v3189_v61 }
 0x5dd   : > { %v3502_v5 = vadd.f32 %v3467_v36, %v3302_v33 }
 0x5df   : > { %v3534_v19 = vmax.f32 %v3502_v5, 0.0 }
 0x5e0   : > { %v3469_v3 = vpop.f32.mrf.mxu2 }
 0x5e1   : > { %3566 = vst [vmem:[%s6949_s27 + $0xf0] sm:$0xff] %v3534_v19  ;;  %v3470_v42 = vadd.f32 %v6938_v52, %v3469_v3 }
 0x5e2   : > { %v3304_v37 = vpop.f32.mrf.mxu1 }
 0x5e3   : > { %v3305_v51 = vadd.f32 %v3304_v37, %v3192_v22 }
 0x5e5   : > { %v3503_v40 = vadd.f32 %v3470_v42, %v3305_v51 }
 0x5e7   : > { %v3535_v1 = vmax.f32 %v3503_v40, 0.0 }
 0x5e9   : > { %3567 = vst [vmem:[%s6949_s27 + $0xf8] sm:$0xff] %v3535_v1 }
 0x5ea PF: > { %s17_s24 = sadd.s32 1, %s3928_s24  }
 0x5eb   : > { %p14_p4 = scmp.ge.s32.totalorder %s17_s24, 4  }
 0x5ed   :  { %16 = sbr.rel (!%p14_p4) target bundleno = 1 (0x1), region = 82 }

</bundles_post_ra>
